<compile_context>
chip_gen: v5e
topology: v5e:2x2
jax: 0.10.0
libtpu: 0.0.40
codegen_flags: <defaults>
</compile_context>

<pallas_src>
import math

import jax
import jax.numpy as jnp
from jax.experimental import pallas as pl
from jax.experimental.pallas import tpu as pltpu


# ---------------------------------------------------------------------------
# BlockSpec helper: whole array as a single VMEM block (grid = ()).
# ---------------------------------------------------------------------------
def _full_spec(shape):
    return pl.BlockSpec(shape, lambda: (0,) * len(shape))


# ---------------------------------------------------------------------------
# Fully fused ActiveModel forward kernel.
# ---------------------------------------------------------------------------
def _fused_active_model_kernel(
    # data
    train_x_ref,    # (N, 1024) f32
    train_y_ref,    # (N, 1)    f32
    fx_ref,         # (M, 1024) f32   former_X
    fy_ref,         # (M, 1)    f32   former_y
    sota_ref,       # (1, 1)    f32
    hx_ref,         # (1, H)    f32
    cx_ref,         # (1, H)    f32
    # dr MLP(1024 -> 128 -> 256)
    dr_w1_ref,      # (1024, 128) bf16
    dr_b1_ref,      # (1, 128)    f32
    dr_w2_ref,      # (128, 256)  bf16
    dr_b2_ref,      # (1, 256)    f32
    # LSTMCell(258, H)
    wih_sota_ref,   # (1, 4H)       f32   row 0 of weight_ih^T  -> SOTA
    wih_newy_ref,   # (1, 4H)       f32   row 257               -> newy
    w_rnn_ref,      # (256 + H, 4H) bf16  [wih_dr ; whh] pre-stacked
    b_lstm_ref,     # (1, 4H)       f32   b_ih + b_hh
    # head MLP(516 -> 128 -> 1), fc1 split by feature block
    w1_hx_ref,      # (H, 128)   bf16
    w1_prop_ref,    # (1, 128)   f32
    w1_dr_ref,      # (256, 128) bf16
    w1_ty_ref,      # (1, 128)   f32
    w1_mind_ref,    # (1, 128)   f32
    w1_dsota_ref,   # (1, 128)   f32
    mlp_b1_ref,     # (1, 128)   f32
    mlp_w2_ref,     # (128, 1)   f32
    mlp_b2_ref,     # (1, 1)     f32
    # outputs
    score_ref,      # (N, 1)
    hx_out_ref,     # (1, H)
    cx_out_ref,     # (1, H)
):
    m = fx_ref.shape[0]
    H = hx_ref.shape[1]
    bf16 = jnp.bfloat16

    tx = train_x_ref[...]                                   # (N, 1024) f32
    fx = fx_ref[...]                                        # (M, 1024) f32
    new_x = fx[m - 1:m, :]                                  # (1, 1024) f32

    # ---- dr MLP: weights are resident in VMEM, so running it twice
    #      (once on train_X, once on newX) costs one nearly-free MXU pass.
    def dr_mlp(x_f32):
        h = jnp.dot(x_f32.astype(bf16), dr_w1_ref[...],
                    preferred_element_type=jnp.float32) + dr_b1_ref[...]
        h = jnp.maximum(h, 0.0)
        return jnp.dot(h.astype(bf16), dr_w2_ref[...],
                       preferred_element_type=jnp.float32) + dr_b2_ref[...]

    dr_train = dr_mlp(tx)                                   # (N, 256) f32
    dr_new = dr_mlp(new_x)                                  # (1, 256) f32

    sota = sota_ref[...]                                    # (1, 1)
    newy = fy_ref[...][m - 1:m, :]                          # (1, 1)

    # ---- LSTMCell: rnninput = [SOTA | dr(newX) | newy].  The SOTA / newy
    #      columns are applied as scalar*row outer products; the big part is
    #      one fused dot of [dr_new | hx] against the pre-stacked weight.
    rnn_in = jnp.concatenate([dr_new, hx_ref[...]], axis=1).astype(bf16)   # (1, 256+H)
    gates = (jnp.dot(rnn_in, w_rnn_ref[...], preferred_element_type=jnp.float32)
             + sota * wih_sota_ref[...]
             + newy * wih_newy_ref[...]
             + b_lstm_ref[...])                                            # (1, 4H) f32
    gi = jax.nn.sigmoid(gates[:, 0 * H:1 * H])
    gf = jax.nn.sigmoid(gates[:, 1 * H:2 * H])
    gg = jnp.tanh(gates[:, 2 * H:3 * H])
    go = jax.nn.sigmoid(gates[:, 3 * H:4 * H])
    c_new = gf * cx_ref[...] + gi * gg
    h_new = go * jnp.tanh(c_new)
    hx_out_ref[...] = h_new
    cx_out_ref[...] = c_new

    # ---- minD = sqrt(min_m ||train_X - former_X[m]||^2)  (VPU/XLU, f32).
    # diff**2 >= 0, so the sqrt argument is never negative.
    # TODO(synk): once N is tiled, switch to the MXU form
    #   d2 = ||tx||^2 + ||fx||^2 - 2*tx@fx.T, clamped at 0 before sqrt.
    min_d2 = None
    for j in range(m):                                      # static unroll over M
        diff = tx - fx[j:j + 1, :]
        d2 = jnp.sum(diff * diff, axis=1, keepdims=True)    # (N, 1)
        min_d2 = d2 if min_d2 is None else jnp.minimum(min_d2, d2)
    min_d = jnp.sqrt(min_d2)                                # (N, 1)

    # ---- prop = (train_y - min) / (max - min + 1e-5)
    ty = train_y_ref[...]                                   # (N, 1)
    max_y = jnp.max(ty, axis=0, keepdims=True)
    min_y = jnp.min(ty, axis=0, keepdims=True)
    prop = (ty - min_y) / (max_y - min_y + 1e-05)

    # ---- head MLP: fc1 applied block-wise (no (N, 516) concat).
    h1 = (jnp.dot(dr_train.astype(bf16), w1_dr_ref[...],
                  preferred_element_type=jnp.float32)
          + jnp.dot(h_new.astype(bf16), w1_hx_ref[...],
                    preferred_element_type=jnp.float32)      # (1,128) bcast over N
          + prop * w1_prop_ref[...]
          + ty * w1_ty_ref[...]
          + min_d * w1_mind_ref[...]
          + (ty - sota) * w1_dsota_ref[...]
          + mlp_b1_ref[...])                                 # (N, 128) f32
    h1 = jnp.maximum(h1, 0.0)
    pred = jnp.dot(h1, mlp_w2_ref[...],
                   preferred_element_type=jnp.float32) + mlp_b2_ref[...]   # (N, 1)

    # ---- softmax over the sample axis (dim 0).
    # TODO(synk): for large N, emit the score lane-dense as (1, N).
    m_max = jnp.max(pred, axis=0, keepdims=True)
    e = jnp.exp(pred - m_max)
    denom = jnp.sum(e, axis=0, keepdims=True)
    score_ref[...] = e * pl.reciprocal(denom, approx=True)


# ---------------------------------------------------------------------------
# Parameter construction (deterministic, PyTorch-style uniform init) and the
# ONE-TIME layout preparation (split / stack / bf16-cast) for the kernel.
# ---------------------------------------------------------------------------
def _init_linear(key, in_dim, out_dim):
    k1, k2 = jax.random.split(key)
    bound = 1.0 / math.sqrt(in_dim)
    w = jax.random.uniform(k1, (in_dim, out_dim), jnp.float32, -bound, bound)
    b = jax.random.uniform(k2, (1, out_dim), jnp.float32, -bound, bound)
    return w, b


def init_active_model_params(key, lstmdim=256, out_dim=1):
    """Raw f32 parameters, mirroring the PyTorch module's layout."""
    keys = jax.random.split(key, 8)
    # dr = MLP(1024, 256):  Linear(1024,128), Linear(128,256)
    dr_w1, dr_b1 = _init_linear(keys[0], 1024, 128)
    dr_w2, dr_b2 = _init_linear(keys[1], 128, 256)
    # rnn = LSTMCell(258, lstmdim); weights stored transposed: (in, 4H), (H, 4H)
    bound = 1.0 / math.sqrt(lstmdim)
    wih = jax.random.uniform(keys[2], (258, 4 * lstmdim), jnp.float32, -bound, bound)
    whh = jax.random.uniform(keys[3], (lstmdim, 4 * lstmdim), jnp.float32, -bound, bound)
    bih = jax.random.uniform(keys[4], (1, 4 * lstmdim), jnp.float32, -bound, bound)
    bhh = jax.random.uniform(keys[5], (1, 4 * lstmdim), jnp.float32, -bound, bound)
    # mlp = MLP(516, out_dim): Linear(516,128), Linear(128,out_dim)
    mlp_w1, mlp_b1 = _init_linear(keys[6], 516, 128)
    mlp_w2, mlp_b2 = _init_linear(keys[7], 128, out_dim)
    return {
        "dr": (dr_w1, dr_b1, dr_w2, dr_b2),
        "rnn": (wih, whh, bih + bhh),      # combined bias == b_ih + b_hh
        "mlp": (mlp_w1, mlp_b1, mlp_w2, mlp_b2),
    }


def prepare_active_model_params(raw, lstmdim=256):
    """One-time re-layout: done OUTSIDE the jitted forward so no slicing /
    stacking / casting happens per call."""
    bf16 = jnp.bfloat16
    dr_w1, dr_b1, dr_w2, dr_b2 = raw["dr"]
    wih, whh, b_lstm = raw["rnn"]
    mlp_w1, mlp_b1, mlp_w2, mlp_b2 = raw["mlp"]
    H = lstmdim
    dr_out = dr_w2.shape[1]

    # LSTM: rnninput = [SOTA | dr(newX) | newy].  Stack the two dense blocks.
    wih_sota = wih[0:1, :]
    wih_dr = wih[1:1 + dr_out, :]
    wih_newy = wih[1 + dr_out:2 + dr_out, :]
    w_rnn = jnp.concatenate([wih_dr, whh], axis=0).astype(bf16)    # (256+H, 4H)

    # Head fc1 split by feature block
    # (head input = [hx | prop | dr(train_X) | train_y | minD | train_y - SOTA]).
    i0 = 0
    w1_hx = mlp_w1[i0:i0 + H, :];         i0 += H
    w1_prop = mlp_w1[i0:i0 + 1, :];       i0 += 1
    w1_dr = mlp_w1[i0:i0 + dr_out, :];    i0 += dr_out
    w1_ty = mlp_w1[i0:i0 + 1, :];         i0 += 1
    w1_mind = mlp_w1[i0:i0 + 1, :];       i0 += 1
    w1_dsota = mlp_w1[i0:i0 + 1, :];      i0 += 1
    assert i0 == mlp_w1.shape[0]

    prep = {
        # dr MLP (MXU operands -> bf16, biases f32)
        "dr_w1": dr_w1.astype(bf16), "dr_b1": dr_b1,
        "dr_w2": dr_w2.astype(bf16), "dr_b2": dr_b2,
        # LSTM
        "wih_sota": wih_sota, "wih_newy": wih_newy,
        "w_rnn": w_rnn, "b_lstm": b_lstm,
        # head
        "w1_hx": w1_hx.astype(bf16), "w1_prop": w1_prop,
        "w1_dr": w1_dr.astype(bf16), "w1_ty": w1_ty,
        "w1_mind": w1_mind, "w1_dsota": w1_dsota,
        "mlp_b1": mlp_b1, "mlp_w2": mlp_w2, "mlp_b2": mlp_b2,
    }
    return jax.tree_util.tree_map(jax.device_put, prep)


# ---------------------------------------------------------------------------
# ActiveModel forward pass: one fused pallas_call, no per-call weight re-layout.
# ---------------------------------------------------------------------------
def active_model_forward(prep, train_X, train_y, SOTA, former_X, former_y, hx, cx):
    n = train_X.shape[0]
    H = hx.shape[1]
    # Aligned lane slicing of the LSTM gates requires H % 128 == 0 (true for 256).
    assert H % 128 == 0, "lstmdim must be a multiple of 128 for aligned gate slices"

    sota = jnp.full((1, 1), SOTA, jnp.float32)       # only per-call scalar packaging

    args = (train_X, train_y, former_X, former_y, sota, hx, cx,
            prep["dr_w1"], prep["dr_b1"], prep["dr_w2"], prep["dr_b2"],
            prep["wih_sota"], prep["wih_newy"], prep["w_rnn"], prep["b_lstm"],
            prep["w1_hx"], prep["w1_prop"], prep["w1_dr"], prep["w1_ty"],
            prep["w1_mind"], prep["w1_dsota"],
            prep["mlp_b1"], prep["mlp_w2"], prep["mlp_b2"])

    out_shapes = (jax.ShapeDtypeStruct((n, 1), jnp.float32),   # score (squeezed below)
                  jax.ShapeDtypeStruct((1, H), jnp.float32),   # hx
                  jax.ShapeDtypeStruct((1, H), jnp.float32))   # cx

    score, hx_new, cx_new = pl.pallas_call(
        _fused_active_model_kernel,
        out_shape=out_shapes,
        in_specs=[_full_spec(a.shape) for a in args],
        out_specs=tuple(_full_spec(s.shape) for s in out_shapes),
        compiler_params=pltpu.CompilerParams(vmem_limit_bytes=32 * 1024 * 1024),
    )(*args)

    return jnp.squeeze(score, axis=1), hx_new, cx_new


# ---------------------------------------------------------------------------
# Pure-JAX reference (mirrors the PyTorch forward and the kernel's bf16 weight
# quantization points) for a correctness check.
# ---------------------------------------------------------------------------
def _reference_forward(prep, train_X, train_y, SOTA, former_X, former_y, hx, cx):
    hp = jax.lax.Precision.HIGHEST
    f32, bf16 = jnp.float32, jnp.bfloat16

    def bdot(a, b):   # bf16-rounded operands, f32 accumulation (MXU-like)
        return jnp.dot(a.astype(bf16).astype(f32), b.astype(f32), precision=hp)

    def dr(x):
        h = jnp.maximum(bdot(x, prep["dr_w1"]) + prep["dr_b1"], 0.0)
        return bdot(h, prep["dr_w2"]) + prep["dr_b2"]

    newX = former_X[-1:, :]
    newy = former_y[-1:, :]
    sota = jnp.full((1, 1), SOTA, f32)

    rnn_in = jnp.concatenate([dr(newX), hx], axis=1)
    gates = (bdot(rnn_in, prep["w_rnn"]) + sota * prep["wih_sota"]
             + newy * prep["wih_newy"] + prep["b_lstm"])
    H = hx.shape[1]
    gi = jax.nn.sigmoid(gates[:, 0 * H:1 * H])
    gf = jax.nn.sigmoid(gates[:, 1 * H:2 * H])
    gg = jnp.tanh(gates[:, 2 * H:3 * H])
    go = jax.nn.sigmoid(gates[:, 3 * H:4 * H])
    c_new = gf * cx + gi * gg
    h_new = go * jnp.tanh(c_new)

    d2 = jnp.min(jnp.sum((train_X[:, None, :] - former_X[None, :, :]) ** 2, axis=-1),
                 axis=1, keepdims=True)
    minD = jnp.sqrt(d2)

    prop = (train_y - jnp.min(train_y)) / (jnp.max(train_y) - jnp.min(train_y) + 1e-05)
    h1 = (bdot(dr(train_X), prep["w1_dr"]) + bdot(h_new, prep["w1_hx"])
          + prop * prep["w1_prop"] + train_y * prep["w1_ty"]
          + minD * prep["w1_mind"] + (train_y - SOTA) * prep["w1_dsota"]
          + prep["mlp_b1"])
    h1 = jnp.maximum(h1, 0.0)
    pred = jnp.dot(h1, prep["mlp_w2"], precision=hp) + prep["mlp_b2"]
    score = jax.nn.softmax(pred, axis=0)[:, 0]
    return score, h_new, c_new


# ---------------------------------------------------------------------------
# Demo / smoke test.
# ---------------------------------------------------------------------------
if __name__ == "__main__":
    key = jax.random.PRNGKey(0)
    k_params, k_tx, k_ty, k_fx, k_fy = jax.random.split(key, 5)

    raw_params = init_active_model_params(k_params, lstmdim=256, out_dim=1)
    prep = prepare_active_model_params(raw_params, lstmdim=256)   # one-time re-layout

    N, M, FEAT, H = 8, 4, 1024, 256
    train_X = jax.random.normal(k_tx, (N, FEAT), jnp.float32)
    train_y = jax.random.normal(k_ty, (N, 1), jnp.float32)
    former_X = jax.random.normal(k_fx, (M, FEAT), jnp.float32)
    former_y = jax.random.normal(k_fy, (M, 1), jnp.float32)
    hx = jnp.zeros((1, H), jnp.float32)
    cx = jnp.zeros((1, H), jnp.float32)
    SOTA = 0.5

    fwd = jax.jit(active_model_forward)
    score, hx_new, cx_new = fwd(prep, train_X, train_y, SOTA, former_X, former_y, hx, cx)
    jax.block_until_ready((score, hx_new, cx_new))

    # Shape / numerical checks against a pure-JAX reference.
    ref_score, ref_hx, ref_cx = _reference_forward(
        prep, train_X, train_y, SOTA, former_X, former_y, hx, cx)

    assert score.shape == (N,)
    assert hx_new.shape == (1, H) and cx_new.shape == (1, H)
    assert bool(jnp.all(jnp.isfinite(score)))
    assert bool(jnp.allclose(score, ref_score, rtol=2e-2, atol=5e-3))
    assert bool(jnp.allclose(hx_new, ref_hx, rtol=2e-2, atol=2e-3))
    assert bool(jnp.allclose(cx_new, ref_cx, rtol=2e-2, atol=2e-3))
    print("KERNEL_OK")
</pallas_src>

<mosaic_0001>
module attributes {stable_mosaic.version = 11 : i64} {
  func.func @_fused_active_model_kernel(%arg0: memref<8x1024xf32, #tpu.memory_space<vmem>>, %arg1: memref<8x1xf32, #tpu.memory_space<vmem>>, %arg2: memref<4x1024xf32, #tpu.memory_space<vmem>>, %arg3: memref<4x1xf32, #tpu.memory_space<vmem>>, %arg4: memref<1x1xf32, #tpu.memory_space<vmem>>, %arg5: memref<1x256xf32, #tpu.memory_space<vmem>>, %arg6: memref<1x256xf32, #tpu.memory_space<vmem>>, %arg7: memref<1024x128xbf16, #tpu.memory_space<vmem>>, %arg8: memref<1x128xf32, #tpu.memory_space<vmem>>, %arg9: memref<128x256xbf16, #tpu.memory_space<vmem>>, %arg10: memref<1x256xf32, #tpu.memory_space<vmem>>, %arg11: memref<1x1024xf32, #tpu.memory_space<vmem>>, %arg12: memref<1x1024xf32, #tpu.memory_space<vmem>>, %arg13: memref<512x1024xbf16, #tpu.memory_space<vmem>>, %arg14: memref<1x1024xf32, #tpu.memory_space<vmem>>, %arg15: memref<256x128xbf16, #tpu.memory_space<vmem>>, %arg16: memref<1x128xf32, #tpu.memory_space<vmem>>, %arg17: memref<256x128xbf16, #tpu.memory_space<vmem>>, %arg18: memref<1x128xf32, #tpu.memory_space<vmem>>, %arg19: memref<1x128xf32, #tpu.memory_space<vmem>>, %arg20: memref<1x128xf32, #tpu.memory_space<vmem>>, %arg21: memref<1x128xf32, #tpu.memory_space<vmem>>, %arg22: memref<128x1xf32, #tpu.memory_space<vmem>>, %arg23: memref<1x1xf32, #tpu.memory_space<vmem>>, %arg24: memref<8x1xf32, #tpu.memory_space<vmem>>, %arg25: memref<1x256xf32, #tpu.memory_space<vmem>>, %arg26: memref<1x256xf32, #tpu.memory_space<vmem>>) attributes {dimension_semantics = [], scalar_prefetch = 0 : i64, scratch_operands = 0 : i64, tpu.core_type = #tpu.core_type<tc>} {
    %c0 = arith.constant 0 : index
    %c0_0 = arith.constant 0 : index
    %0 = vector.load %arg0[%c0, %c0_0] : memref<8x1024xf32, #tpu.memory_space<vmem>>, vector<8x1024xf32>
    %c0_1 = arith.constant 0 : index
    %c0_2 = arith.constant 0 : index
    %1 = vector.load %arg2[%c0_1, %c0_2] : memref<4x1024xf32, #tpu.memory_space<vmem>>, vector<4x1024xf32>
    %2 = vector.extract_strided_slice %1 {offsets = [3, 0], sizes = [1, 1024], strides = [1, 1]} : vector<4x1024xf32> to vector<1x1024xf32>
    %3 = arith.truncf %0 : vector<8x1024xf32> to vector<8x1024xbf16>
    %c0_3 = arith.constant 0 : index
    %c0_4 = arith.constant 0 : index
    %4 = vector.load %arg7[%c0_3, %c0_4] : memref<1024x128xbf16, #tpu.memory_space<vmem>>, vector<1024x128xbf16>
    %cst = arith.constant dense<0.000000e+00> : vector<8x128xf32>
    %5 = tpu.matmul %3, %4, %cst {dimension_numbers = #tpu.dot_dimension_numbers<[1], [0], [0], [1], [0, 0, 1, 1], [], []>} : vector<8x1024xbf16>, vector<1024x128xbf16>, vector<8x128xf32> -> vector<8x128xf32>
    %c0_5 = arith.constant 0 : index
    %c0_6 = arith.constant 0 : index
    %6 = vector.load %arg8[%c0_5, %c0_6] : memref<1x128xf32, #tpu.memory_space<vmem>>, vector<1x128xf32>
    %7 = vector.broadcast %6 : vector<1x128xf32> to vector<8x128xf32>
    %8 = arith.addf %5, %7 : vector<8x128xf32>
    %cst_7 = arith.constant 0.000000e+00 : f32
    %9 = vector.broadcast %cst_7 : f32 to vector<8x128xf32>
    %10 = arith.maximumf %8, %9 : vector<8x128xf32>
    %11 = arith.truncf %10 : vector<8x128xf32> to vector<8x128xbf16>
    %c0_8 = arith.constant 0 : index
    %c0_9 = arith.constant 0 : index
    %12 = vector.load %arg9[%c0_8, %c0_9] : memref<128x256xbf16, #tpu.memory_space<vmem>>, vector<128x256xbf16>
    %cst_10 = arith.constant dense<0.000000e+00> : vector<8x256xf32>
    %13 = tpu.matmul %11, %12, %cst_10 {dimension_numbers = #tpu.dot_dimension_numbers<[1], [0], [0], [1], [0, 0, 1, 1], [], []>} : vector<8x128xbf16>, vector<128x256xbf16>, vector<8x256xf32> -> vector<8x256xf32>
    %c0_11 = arith.constant 0 : index
    %c0_12 = arith.constant 0 : index
    %14 = vector.load %arg10[%c0_11, %c0_12] : memref<1x256xf32, #tpu.memory_space<vmem>>, vector<1x256xf32>
    %15 = vector.broadcast %14 : vector<1x256xf32> to vector<8x256xf32>
    %16 = arith.addf %13, %15 : vector<8x256xf32>
    %17 = arith.truncf %2 : vector<1x1024xf32> to vector<1x1024xbf16>
    %c0_13 = arith.constant 0 : index
    %c0_14 = arith.constant 0 : index
    %18 = vector.load %arg7[%c0_13, %c0_14] : memref<1024x128xbf16, #tpu.memory_space<vmem>>, vector<1024x128xbf16>
    %cst_15 = arith.constant dense<0.000000e+00> : vector<1x128xf32>
    %19 = tpu.matmul %17, %18, %cst_15 {dimension_numbers = #tpu.dot_dimension_numbers<[1], [0], [0], [1], [0, 0, 1, 1], [], []>} : vector<1x1024xbf16>, vector<1024x128xbf16>, vector<1x128xf32> -> vector<1x128xf32>
    %c0_16 = arith.constant 0 : index
    %c0_17 = arith.constant 0 : index
    %20 = vector.load %arg8[%c0_16, %c0_17] : memref<1x128xf32, #tpu.memory_space<vmem>>, vector<1x128xf32>
    %21 = arith.addf %19, %20 : vector<1x128xf32>
    %cst_18 = arith.constant 0.000000e+00 : f32
    %22 = vector.broadcast %cst_18 : f32 to vector<1x128xf32>
    %23 = arith.maximumf %21, %22 : vector<1x128xf32>
    %24 = arith.truncf %23 : vector<1x128xf32> to vector<1x128xbf16>
    %c0_19 = arith.constant 0 : index
    %c0_20 = arith.constant 0 : index
    %25 = vector.load %arg9[%c0_19, %c0_20] : memref<128x256xbf16, #tpu.memory_space<vmem>>, vector<128x256xbf16>
    %cst_21 = arith.constant dense<0.000000e+00> : vector<1x256xf32>
    %26 = tpu.matmul %24, %25, %cst_21 {dimension_numbers = #tpu.dot_dimension_numbers<[1], [0], [0], [1], [0, 0, 1, 1], [], []>} : vector<1x128xbf16>, vector<128x256xbf16>, vector<1x256xf32> -> vector<1x256xf32>
    %c0_22 = arith.constant 0 : index
    %c0_23 = arith.constant 0 : index
    %27 = vector.load %arg10[%c0_22, %c0_23] : memref<1x256xf32, #tpu.memory_space<vmem>>, vector<1x256xf32>
    %28 = arith.addf %26, %27 : vector<1x256xf32>
    %c0_24 = arith.constant 0 : index
    %c0_25 = arith.constant 0 : index
    %29 = vector.load %arg4[%c0_24, %c0_25] : memref<1x1xf32, #tpu.memory_space<vmem>>, vector<1x1xf32>
    %c0_26 = arith.constant 0 : index
    %c0_27 = arith.constant 0 : index
    %30 = vector.load %arg3[%c0_26, %c0_27] : memref<4x1xf32, #tpu.memory_space<vmem>>, vector<4x1xf32>
    %31 = vector.extract_strided_slice %30 {offsets = [3, 0], sizes = [1, 1], strides = [1, 1]} : vector<4x1xf32> to vector<1x1xf32>
    %c0_28 = arith.constant 0 : index
    %c0_29 = arith.constant 0 : index
    %32 = vector.load %arg5[%c0_28, %c0_29] : memref<1x256xf32, #tpu.memory_space<vmem>>, vector<1x256xf32>
    %33 = tpu.concatenate %28, %32 in 1 : vector<1x256xf32>, vector<1x256xf32> -> vector<1x512xf32>
    %34 = arith.truncf %33 : vector<1x512xf32> to vector<1x512xbf16>
    %c0_30 = arith.constant 0 : index
    %c0_31 = arith.constant 0 : index
    %35 = vector.load %arg13[%c0_30, %c0_31] : memref<512x1024xbf16, #tpu.memory_space<vmem>>, vector<512x1024xbf16>
    %cst_32 = arith.constant dense<0.000000e+00> : vector<1x1024xf32>
    %36 = tpu.matmul %34, %35, %cst_32 {dimension_numbers = #tpu.dot_dimension_numbers<[1], [0], [0], [1], [0, 0, 1, 1], [], []>} : vector<1x512xbf16>, vector<512x1024xbf16>, vector<1x1024xf32> -> vector<1x1024xf32>
    %c0_33 = arith.constant 0 : index
    %c0_34 = arith.constant 0 : index
    %37 = vector.load %arg11[%c0_33, %c0_34] : memref<1x1024xf32, #tpu.memory_space<vmem>>, vector<1x1024xf32>
    %38 = vector.broadcast %29 : vector<1x1xf32> to vector<1x1024xf32>
    %39 = arith.mulf %38, %37 : vector<1x1024xf32>
    %40 = arith.addf %36, %39 : vector<1x1024xf32>
    %c0_35 = arith.constant 0 : index
    %c0_36 = arith.constant 0 : index
    %41 = vector.load %arg12[%c0_35, %c0_36] : memref<1x1024xf32, #tpu.memory_space<vmem>>, vector<1x1024xf32>
    %42 = vector.broadcast %31 : vector<1x1xf32> to vector<1x1024xf32>
    %43 = arith.mulf %42, %41 : vector<1x1024xf32>
    %44 = arith.addf %40, %43 : vector<1x1024xf32>
    %c0_37 = arith.constant 0 : index
    %c0_38 = arith.constant 0 : index
    %45 = vector.load %arg14[%c0_37, %c0_38] : memref<1x1024xf32, #tpu.memory_space<vmem>>, vector<1x1024xf32>
    %46 = arith.addf %44, %45 : vector<1x1024xf32>
    %47 = vector.extract_strided_slice %46 {offsets = [0, 0], sizes = [1, 256], strides = [1, 1]} : vector<1x1024xf32> to vector<1x256xf32>
    %48 = arith.negf %47 : vector<1x256xf32>
    %49 = math.exp %48 : vector<1x256xf32>
    %cst_39 = arith.constant 1.000000e+00 : f32
    %50 = vector.broadcast %cst_39 : f32 to vector<1x256xf32>
    %51 = arith.addf %50, %49 : vector<1x256xf32>
    %52 = arith.divf %50, %51 : vector<1x256xf32>
    %53 = vector.extract_strided_slice %46 {offsets = [0, 256], sizes = [1, 256], strides = [1, 1]} : vector<1x1024xf32> to vector<1x256xf32>
    %54 = arith.negf %53 : vector<1x256xf32>
    %55 = math.exp %54 : vector<1x256xf32>
    %cst_40 = arith.constant 1.000000e+00 : f32
    %56 = vector.broadcast %cst_40 : f32 to vector<1x256xf32>
    %57 = arith.addf %56, %55 : vector<1x256xf32>
    %58 = arith.divf %56, %57 : vector<1x256xf32>
    %59 = vector.extract_strided_slice %46 {offsets = [0, 512], sizes = [1, 256], strides = [1, 1]} : vector<1x1024xf32> to vector<1x256xf32>
    %60 = math.tanh %59 : vector<1x256xf32>
    %61 = vector.extract_strided_slice %46 {offsets = [0, 768], sizes = [1, 256], strides = [1, 1]} : vector<1x1024xf32> to vector<1x256xf32>
    %62 = arith.negf %61 : vector<1x256xf32>
    %63 = math.exp %62 : vector<1x256xf32>
    %cst_41 = arith.constant 1.000000e+00 : f32
    %64 = vector.broadcast %cst_41 : f32 to vector<1x256xf32>
    %65 = arith.addf %64, %63 : vector<1x256xf32>
    %66 = arith.divf %64, %65 : vector<1x256xf32>
    %c0_42 = arith.constant 0 : index
    %c0_43 = arith.constant 0 : index
    %67 = vector.load %arg6[%c0_42, %c0_43] : memref<1x256xf32, #tpu.memory_space<vmem>>, vector<1x256xf32>
    %68 = arith.mulf %58, %67 : vector<1x256xf32>
    %69 = arith.mulf %52, %60 : vector<1x256xf32>
    %70 = arith.addf %68, %69 : vector<1x256xf32>
    %71 = math.tanh %70 : vector<1x256xf32>
    %72 = arith.mulf %66, %71 : vector<1x256xf32>
    %c0_44 = arith.constant 0 : index
    %c0_45 = arith.constant 0 : index
    %73 = vector.load %arg25[%c0_44, %c0_45] : memref<1x256xf32, #tpu.memory_space<vmem>>, vector<1x256xf32>
    tpu.vector_store %arg25[%c0_44, %c0_45], %72 {strides = array<i32>} : memref<1x256xf32, #tpu.memory_space<vmem>>, vector<1x256xf32>,
    %c0_46 = arith.constant 0 : index
    %c0_47 = arith.constant 0 : index
    %74 = vector.load %arg26[%c0_46, %c0_47] : memref<1x256xf32, #tpu.memory_space<vmem>>, vector<1x256xf32>
    tpu.vector_store %arg26[%c0_46, %c0_47], %70 {strides = array<i32>} : memref<1x256xf32, #tpu.memory_space<vmem>>, vector<1x256xf32>,
    %75 = vector.extract_strided_slice %1 {offsets = [0, 0], sizes = [1, 1024], strides = [1, 1]} : vector<4x1024xf32> to vector<1x1024xf32>
    %76 = vector.broadcast %75 : vector<1x1024xf32> to vector<8x1024xf32>
    %77 = arith.subf %0, %76 : vector<8x1024xf32>
    %78 = arith.mulf %77, %77 : vector<8x1024xf32>
    %cst_48 = arith.constant dense<0.000000e+00> : vector<8xf32>
    %79 = vector.multi_reduction <add>, %78, %cst_48 [1] : vector<8x1024xf32> to vector<8xf32>
    %80 = vector.shape_cast %79 : vector<8xf32> to vector<8x1xf32>
    %81 = vector.extract_strided_slice %1 {offsets = [1, 0], sizes = [1, 1024], strides = [1, 1]} : vector<4x1024xf32> to vector<1x1024xf32>
    %82 = vector.broadcast %81 : vector<1x1024xf32> to vector<8x1024xf32>
    %83 = arith.subf %0, %82 : vector<8x1024xf32>
    %84 = arith.mulf %83, %83 : vector<8x1024xf32>
    %cst_49 = arith.constant dense<0.000000e+00> : vector<8xf32>
    %85 = vector.multi_reduction <add>, %84, %cst_49 [1] : vector<8x1024xf32> to vector<8xf32>
    %86 = vector.shape_cast %85 : vector<8xf32> to vector<8x1xf32>
    %87 = arith.minimumf %80, %86 : vector<8x1xf32>
    %88 = vector.extract_strided_slice %1 {offsets = [2, 0], sizes = [1, 1024], strides = [1, 1]} : vector<4x1024xf32> to vector<1x1024xf32>
    %89 = vector.broadcast %88 : vector<1x1024xf32> to vector<8x1024xf32>
    %90 = arith.subf %0, %89 : vector<8x1024xf32>
    %91 = arith.mulf %90, %90 : vector<8x1024xf32>
    %cst_50 = arith.constant dense<0.000000e+00> : vector<8xf32>
    %92 = vector.multi_reduction <add>, %91, %cst_50 [1] : vector<8x1024xf32> to vector<8xf32>
    %93 = vector.shape_cast %92 : vector<8xf32> to vector<8x1xf32>
    %94 = arith.minimumf %87, %93 : vector<8x1xf32>
    %95 = vector.extract_strided_slice %1 {offsets = [3, 0], sizes = [1, 1024], strides = [1, 1]} : vector<4x1024xf32> to vector<1x1024xf32>
    %96 = vector.broadcast %95 : vector<1x1024xf32> to vector<8x1024xf32>
    %97 = arith.subf %0, %96 : vector<8x1024xf32>
    %98 = arith.mulf %97, %97 : vector<8x1024xf32>
    %cst_51 = arith.constant dense<0.000000e+00> : vector<8xf32>
    %99 = vector.multi_reduction <add>, %98, %cst_51 [1] : vector<8x1024xf32> to vector<8xf32>
    %100 = vector.shape_cast %99 : vector<8xf32> to vector<8x1xf32>
    %101 = arith.minimumf %94, %100 : vector<8x1xf32>
    %102 = math.sqrt %101 : vector<8x1xf32>
    %c0_52 = arith.constant 0 : index
    %c0_53 = arith.constant 0 : index
    %103 = vector.load %arg1[%c0_52, %c0_53] : memref<8x1xf32, #tpu.memory_space<vmem>>, vector<8x1xf32>
    %cst_54 = arith.constant dense<0xFF800000> : vector<1xf32>
    %104 = vector.multi_reduction <maximumf>, %103, %cst_54 [0] : vector<8x1xf32> to vector<1xf32>
    %105 = vector.shape_cast %104 : vector<1xf32> to vector<1x1xf32>
    %cst_55 = arith.constant dense<0x7F800000> : vector<1xf32>
    %106 = vector.multi_reduction <minimumf>, %103, %cst_55 [0] : vector<8x1xf32> to vector<1xf32>
    %107 = vector.shape_cast %106 : vector<1xf32> to vector<1x1xf32>
    %108 = vector.broadcast %107 : vector<1x1xf32> to vector<8x1xf32>
    %109 = arith.subf %103, %108 : vector<8x1xf32>
    %110 = arith.subf %105, %107 : vector<1x1xf32>
    %cst_56 = arith.constant 9.99999974E-6 : f32
    %111 = vector.broadcast %cst_56 : f32 to vector<1x1xf32>
    %112 = arith.addf %110, %111 : vector<1x1xf32>
    %113 = vector.broadcast %112 : vector<1x1xf32> to vector<8x1xf32>
    %114 = arith.divf %109, %113 : vector<8x1xf32>
    %115 = arith.truncf %16 : vector<8x256xf32> to vector<8x256xbf16>
    %c0_57 = arith.constant 0 : index
    %c0_58 = arith.constant 0 : index
    %116 = vector.load %arg17[%c0_57, %c0_58] : memref<256x128xbf16, #tpu.memory_space<vmem>>, vector<256x128xbf16>
    %cst_59 = arith.constant dense<0.000000e+00> : vector<8x128xf32>
    %117 = tpu.matmul %115, %116, %cst_59 {dimension_numbers = #tpu.dot_dimension_numbers<[1], [0], [0], [1], [0, 0, 1, 1], [], []>} : vector<8x256xbf16>, vector<256x128xbf16>, vector<8x128xf32> -> vector<8x128xf32>
    %118 = arith.truncf %72 : vector<1x256xf32> to vector<1x256xbf16>
    %c0_60 = arith.constant 0 : index
    %c0_61 = arith.constant 0 : index
    %119 = vector.load %arg15[%c0_60, %c0_61] : memref<256x128xbf16, #tpu.memory_space<vmem>>, vector<256x128xbf16>
    %cst_62 = arith.constant dense<0.000000e+00> : vector<1x128xf32>
    %120 = tpu.matmul %118, %119, %cst_62 {dimension_numbers = #tpu.dot_dimension_numbers<[1], [0], [0], [1], [0, 0, 1, 1], [], []>} : vector<1x256xbf16>, vector<256x128xbf16>, vector<1x128xf32> -> vector<1x128xf32>
    %121 = vector.broadcast %120 : vector<1x128xf32> to vector<8x128xf32>
    %122 = arith.addf %117, %121 : vector<8x128xf32>
    %c0_63 = arith.constant 0 : index
    %c0_64 = arith.constant 0 : index
    %123 = vector.load %arg16[%c0_63, %c0_64] : memref<1x128xf32, #tpu.memory_space<vmem>>, vector<1x128xf32>
    %124 = vector.broadcast %114 : vector<8x1xf32> to vector<8x128xf32>
    %125 = vector.broadcast %123 : vector<1x128xf32> to vector<8x128xf32>
    %126 = arith.mulf %124, %125 : vector<8x128xf32>
    %127 = arith.addf %122, %126 : vector<8x128xf32>
    %c0_65 = arith.constant 0 : index
    %c0_66 = arith.constant 0 : index
    %128 = vector.load %arg18[%c0_65, %c0_66] : memref<1x128xf32, #tpu.memory_space<vmem>>, vector<1x128xf32>
    %129 = vector.broadcast %103 : vector<8x1xf32> to vector<8x128xf32>
    %130 = vector.broadcast %128 : vector<1x128xf32> to vector<8x128xf32>
    %131 = arith.mulf %129, %130 : vector<8x128xf32>
    %132 = arith.addf %127, %131 : vector<8x128xf32>
    %c0_67 = arith.constant 0 : index
    %c0_68 = arith.constant 0 : index
    %133 = vector.load %arg19[%c0_67, %c0_68] : memref<1x128xf32, #tpu.memory_space<vmem>>, vector<1x128xf32>
    %134 = vector.broadcast %102 : vector<8x1xf32> to vector<8x128xf32>
    %135 = vector.broadcast %133 : vector<1x128xf32> to vector<8x128xf32>
    %136 = arith.mulf %134, %135 : vector<8x128xf32>
    %137 = arith.addf %132, %136 : vector<8x128xf32>
    %138 = vector.broadcast %29 : vector<1x1xf32> to vector<8x1xf32>
    %139 = arith.subf %103, %138 : vector<8x1xf32>
    %c0_69 = arith.constant 0 : index
    %c0_70 = arith.constant 0 : index
    %140 = vector.load %arg20[%c0_69, %c0_70] : memref<1x128xf32, #tpu.memory_space<vmem>>, vector<1x128xf32>
    %141 = vector.broadcast %139 : vector<8x1xf32> to vector<8x128xf32>
    %142 = vector.broadcast %140 : vector<1x128xf32> to vector<8x128xf32>
    %143 = arith.mulf %141, %142 : vector<8x128xf32>
    %144 = arith.addf %137, %143 : vector<8x128xf32>
    %c0_71 = arith.constant 0 : index
    %c0_72 = arith.constant 0 : index
    %145 = vector.load %arg21[%c0_71, %c0_72] : memref<1x128xf32, #tpu.memory_space<vmem>>, vector<1x128xf32>
    %146 = vector.broadcast %145 : vector<1x128xf32> to vector<8x128xf32>
    %147 = arith.addf %144, %146 : vector<8x128xf32>
    %cst_73 = arith.constant 0.000000e+00 : f32
    %148 = vector.broadcast %cst_73 : f32 to vector<8x128xf32>
    %149 = arith.maximumf %147, %148 : vector<8x128xf32>
    %c0_74 = arith.constant 0 : index
    %c0_75 = arith.constant 0 : index
    %150 = vector.load %arg22[%c0_74, %c0_75] : memref<128x1xf32, #tpu.memory_space<vmem>>, vector<128x1xf32>
    %cst_76 = arith.constant dense<0.000000e+00> : vector<8x1xf32>
    %151 = tpu.matmul %149, %150, %cst_76 {dimension_numbers = #tpu.dot_dimension_numbers<[1], [0], [0], [1], [0, 0, 1, 1], [], []>} : vector<8x128xf32>, vector<128x1xf32>, vector<8x1xf32> -> vector<8x1xf32>
    %c0_77 = arith.constant 0 : index
    %c0_78 = arith.constant 0 : index
    %152 = vector.load %arg23[%c0_77, %c0_78] : memref<1x1xf32, #tpu.memory_space<vmem>>, vector<1x1xf32>
    %153 = vector.broadcast %152 : vector<1x1xf32> to vector<8x1xf32>
    %154 = arith.addf %151, %153 : vector<8x1xf32>
    %cst_79 = arith.constant dense<0xFF800000> : vector<1xf32>
    %155 = vector.multi_reduction <maximumf>, %154, %cst_79 [0] : vector<8x1xf32> to vector<1xf32>
    %156 = vector.shape_cast %155 : vector<1xf32> to vector<1x1xf32>
    %157 = vector.broadcast %156 : vector<1x1xf32> to vector<8x1xf32>
    %158 = arith.subf %154, %157 : vector<8x1xf32>
    %159 = math.exp %158 : vector<8x1xf32>
    %cst_80 = arith.constant dense<0.000000e+00> : vector<1xf32>
    %160 = vector.multi_reduction <add>, %159, %cst_80 [0] : vector<8x1xf32> to vector<1xf32>
    %161 = vector.shape_cast %160 : vector<1xf32> to vector<1x1xf32>
    %162 = tpu.reciprocal %161 {approx = true} : vector<1x1xf32> -> vector<1x1xf32>
    %163 = vector.broadcast %162 : vector<1x1xf32> to vector<8x1xf32>
    %164 = arith.mulf %159, %163 : vector<8x1xf32>
    %c0_81 = arith.constant 0 : index
    %c0_82 = arith.constant 0 : index
    %165 = vector.load %arg24[%c0_81, %c0_82] : memref<8x1xf32, #tpu.memory_space<vmem>>, vector<8x1xf32>
    tpu.vector_store %arg24[%c0_81, %c0_82], %164 {strides = array<i32>} : memref<8x1xf32, #tpu.memory_space<vmem>>, vector<8x1xf32>,
    return
  }
}

</mosaic_0001>

<bundles_post_ra>
// kernel: active_model_forward.1
= control target key start
LH: loop header
LB: loop body
LE: loop exit
PB: predicated region body
PF: predicated region fallthrough
CT: control target
= control target key end

     0   :  { %s7444_s0 = inlined_call_operand.hbm [shape: f32[8,1024], index: 0, kind: input, shape index: {}]   ;;  %s7445_s1 = inlined_call_operand.vmem [shape: f32[8,1], index: 1, kind: input, shape index: {}]   ;;  %s7446_s2 = inlined_call_operand.hbm [shape: f32[4,1024], index: 2, kind: input, shape index: {}]   ;;  %s7447_s3 = inlined_call_operand.vmem [shape: f32[4,1], index: 3, kind: input, shape index: {}]   ;;  %s7448_s4 = inlined_call_operand.<no memory space> [shape: f32[1,1], index: 4, kind: input, shape index: {}]   ;;  %s7449_s5 = inlined_call_operand.vmem [shape: f32[1,256], index: 5, kind: input, shape index: {}]   ;;  %s7450_s6 = inlined_call_operand.vmem [shape: f32[1,256], index: 6, kind: input, shape index: {}]   ;;  %s7451_s7 = inlined_call_operand.hbm [shape: bf16[1024,128], index: 7, kind: input, shape index: {}]   ;;  %s7452_s8 = inlined_call_operand.hbm [shape: f32[1,128], index: 8, kind: input, shape index: {}]   ;;  %s7453_s9 = inlined_call_operand.vmem [shape: bf16[128,256], index: 9, kind: input, shape index: {}]   ;;  %s7454_s10 = inlined_call_operand.vmem [shape: f32[1,256], index: 10, kind: input, shape index: {}]   ;;  %s7455_s11 = inlined_call_operand.vmem [shape: f32[1,1024], index: 11, kind: input, shape index: {}]   ;;  %s7456_s12 = inlined_call_operand.vmem [shape: f32[1,1024], index: 12, kind: input, shape index: {}]   ;;  %s7457_s13 = inlined_call_operand.hbm [shape: bf16[512,1024], index: 13, kind: input, shape index: {}]   ;;  %s7458_s14 = inlined_call_operand.hbm [shape: f32[1,1024], index: 14, kind: input, shape index: {}]   ;;  %s7459_s15 = inlined_call_operand.hbm [shape: bf16[256,128], index: 15, kind: input, shape index: {}]   ;;  %s7460_s16 = inlined_call_operand.vmem [shape: f32[1,128], index: 16, kind: input, shape index: {}]   ;;  %s7461_s17 = inlined_call_operand.hbm [shape: bf16[256,128], index: 17, kind: input, shape index: {}]   ;;  %s7462_s18 = inlined_call_operand.vmem [shape: f32[1,128], index: 18, kind: input, shape index: {}]   ;;  %s7463_s19 = inlined_call_operand.vmem [shape: f32[1,128], index: 19, kind: input, shape index: {}]   ;;  %s7464_s20 = inlined_call_operand.hbm [shape: f32[1,128], index: 20, kind: input, shape index: {}]   ;;  %s7465_s21 = inlined_call_operand.hbm [shape: f32[1,128], index: 21, kind: input, shape index: {}]   ;;  %s7466_s22 = inlined_call_operand.vmem [shape: f32[128,1], index: 22, kind: input, shape index: {}]   ;;  %s7467_s24 = inlined_call_operand.vmem [shape: f32[8,1], index: 24, kind: output, shape index: {0}]   ;;  %s7468_s25 = inlined_call_operand.hbm [shape: f32[1,256], index: 25, kind: output, shape index: {1}]   ;;  %s7469_s26 = inlined_call_operand.hbm [shape: f32[1,256], index: 26, kind: output, shape index: {2}]   ;;  %s7470_s23 = inlined_call_operand.<no memory space> [shape: f32[1,1], index: 23, kind: input, shape index: {}]  }
   0x1   :  { %7488 = sst [smem:[#allocation47_spill]] %s7444_s0  ;;  %v34_v1 = vstv %s7470_s23 }
   0x2   :  { %7489 = sst [smem:[#allocation48_spill]] %s7445_s1  ;;  %35 = vst [vmem:[#allocation3] sm:$0x1] %v34_v1 }
   0x3   :  { %7490 = sst [smem:[#allocation49_spill]] %s7446_s2 }
   0x4   :  { %7491 = sst [smem:[#allocation50_spill]] %s7447_s3 }
   0x5   :  { %7492 = sst [smem:[#allocation51_spill]] %s7448_s4 }
   0x6   :  { %7493 = sst [smem:[#allocation52_spill]] %s7449_s5 }
   0x7   :  { %7494 = sst [smem:[#allocation53_spill]] %s7450_s6 }
   0x8   :  { %7495 = sst [smem:[#allocation54_spill]] %s7451_s7 }
   0x9   :  { %7496 = sst [smem:[#allocation55_spill]] %s7452_s8 }
   0xa   :  { %7497 = sst [smem:[#allocation56_spill]] %s7453_s9 }
   0xb   :  { %7498 = sst [smem:[#allocation57_spill]] %s7454_s10 }
   0xc   :  { %s7499_s7 = sld [smem:[#allocation51_spill]] }
  0x12   :  { %v32_v0 = vstv %s7499_s7 }
  0x13   :  { %33 = vst [vmem:[#allocation2] sm:$0x1] %v32_v0 }
  0x14   :  { %36 = vsyncpa [#allocation5], 0 }
  0x15   :  { %37 = vsyncpa [#allocation8], 0 }
  0x16   :  { %38 = vsyncpa [#allocation11], 0 }
  0x17   :  { %39 = vsyncpa [#allocation14], 0 }
  0x18   :  { %40 = vsyncpa [#allocation17], 0 }
  0x19   :  { %41 = vsyncpa [#allocation20], 0 }
  0x1a   :  { %42 = vsyncpa [#allocation6], 0  ;;  %s7500_s0 = sld [smem:[#allocation49_spill]] }
  0x20   :  { %s62_s9 = sshll.u32 %s7500_s0, 4  ;;  %s63_s9 = int_to_ptr.hbm [resolvable:$true] %s62_s9 }
  0x21   :  { %43 = vsyncpa [#allocation23], 0  ;;  %s6350_s30 = smov [#allocation7]   ;;  %s7501_s10 = sld [smem:[#allocation55_spill]] }
  0x22   :  { %s64_s2 = sshll.u32 %s6350_s30, 4  ;;  %s6351_s1 = smov [#allocation10]   ;;  %s65_s2 = int_to_ptr.vmem [resolvable:$true] %s64_s2 }
  0x23   :  { %67 = dma.hbm_to_vmem [thread:$0]  %s63_s9, 512, %s65_s2, [#allocation8]  }
  0x24   :  { %s96_s27 = sshll.u32 %s6351_s1, 4  ;;  %s126_s28 = sshll.u32 %s7458_s14, 4  ;;  %s97_s27 = int_to_ptr.vmem [resolvable:$true] %s96_s27  ;;  %s127_s28 = int_to_ptr.hbm [resolvable:$true] %s126_s28 }
  0x25   :  { %s6352_s8 = smov [#allocation13]   ;;  %s151_s30 = sshll.u32 %s7461_s17, 4  ;;  %s152_s30 = int_to_ptr.hbm [resolvable:$true] %s151_s30 }
  0x26   :  { %s128_s4 = sshll.u32 %s6352_s8, 4  ;;  %s6353_s9 = smov [#allocation16]   ;;  %s129_s4 = int_to_ptr.vmem [resolvable:$true] %s128_s4 }
  0x27   :  { %s94_s6 = sshll.u32 %s7501_s10, 4  ;;  %s153_s2 = sshll.u32 %s6353_s9, 4  ;;  %s95_s6 = int_to_ptr.hbm [resolvable:$true] %s94_s6  ;;  %s154_s2 = int_to_ptr.vmem [resolvable:$true] %s153_s2 }
  0x28   :  { %99 = dma.hbm_to_vmem [thread:$0]  %s95_s6, 16, %s97_s27, [#allocation11]  }
  0x29   :  { %131 = dma.hbm_to_vmem [thread:$0]  %s127_s28, 128, %s129_s4, [#allocation14]  }
  0x2a   :  { %s7502_s10 = sld [smem:[#allocation47_spill]]  ;;  %s6354_s14 = smov 64  }
  0x2b   :  { %s6355_s3 = smov 4   ;;  %s7503_s7 = sld [smem:[#allocation54_spill]] }
  0x2c   :  { %159 = dma.hbm_to_vmem [thread:$0]  %s152_s30, 2048, %s154_s2, [#allocation17], %s6354_s14, %s6354_s14, %s6355_s3  }
  0x2d   :  { %s6356_s28 = smov [#allocation4]   ;;  %s6357_s4 = smov [#allocation9]  }
  0x2e   :  { %s51_s8 = sshll.u32 %s6356_s28, 4  ;;  %s82_s29 = sshll.u32 %s6357_s4, 4  ;;  %s52_s8 = int_to_ptr.vmem [resolvable:$true] %s51_s8  ;;  %s83_s29 = int_to_ptr.vmem [resolvable:$true] %s82_s29 }
  0x2f   :  { %s112_s5 = sshll.u32 %s7457_s13, 4  ;;  %s6358_s30 = smov [#allocation12]   ;;  %s113_s5 = int_to_ptr.hbm [resolvable:$true] %s112_s5 }
  0x30   :  { %s49_s1 = sshll.u32 %s7502_s10, 4  ;;  %s114_s2 = sshll.u32 %s6358_s30, 4  ;;  %s50_s1 = int_to_ptr.hbm [resolvable:$true] %s49_s1  ;;  %s115_s2 = int_to_ptr.vmem [resolvable:$true] %s114_s2 }
  0x31   :  { %s80_s17 = sshll.u32 %s7503_s7, 4  ;;  %s136_s6 = sshll.u32 %s7459_s15, 4  ;;  %s81_s17 = int_to_ptr.hbm [resolvable:$true] %s80_s17  ;;  %s137_s6 = int_to_ptr.hbm [resolvable:$true] %s136_s6 }
  0x32   :  { %54 = dma.hbm_to_vmem [thread:$0]  %s50_s1, 1024, %s52_s8, [#allocation5]  }
  0x33   :  { %88 = dma.hbm_to_vmem [thread:$0]  %s81_s17, 8192, %s83_s29, [#allocation8], %s6354_s14, %s6354_s14, %s6355_s3  }
  0x34   :  { %s6359_s1 = smov 512   ;;  %s6360_s27 = smov 32  }
  0x35   :  { %120 = dma.hbm_to_vmem [thread:$0]  %s113_s5, 32768, %s115_s2, [#allocation11], %s6359_s1, %s6359_s1, %s6360_s27  }
  0x36   :  { %s6361_s7 = smov [#allocation15]   ;;  %s169_s4 = sshll.u32 %s7464_s20, 4  ;;  %s170_s4 = int_to_ptr.hbm [resolvable:$true] %s169_s4 }
  0x37   :  { %s138_s28 = sshll.u32 %s6361_s7, 4  ;;  %s180_s15 = sshll.u32 %s7465_s21, 4  ;;  %s139_s28 = int_to_ptr.vmem [resolvable:$true] %s138_s28  ;;  %s181_s15 = int_to_ptr.hbm [resolvable:$true] %s180_s15 }
  0x38   :  { %144 = dma.hbm_to_vmem [thread:$0]  %s137_s6, 2048, %s139_s28, [#allocation14], %s6354_s14, %s6354_s14, %s6355_s3  }
  0x39   :  { %s6362_s0 = smov [#allocation18]   ;;  %s6363_s5 = smov [#allocation19]  }
  0x3a   :  { %s171_s9 = sshll.u32 %s6362_s0, 4  ;;  %s182_s30 = sshll.u32 %s6363_s5, 4  ;;  %s172_s9 = int_to_ptr.vmem [resolvable:$true] %s171_s9  ;;  %s183_s30 = int_to_ptr.vmem [resolvable:$true] %s182_s30 }
  0x3b   :  { %174 = dma.hbm_to_vmem [thread:$0]  %s170_s4, 16, %s172_s9, [#allocation17]  }
  0x3c   :  { %185 = dma.hbm_to_vmem [thread:$0]  %s181_s15, 16, %s183_s30, [#allocation20]  }
  0x3d   :  { %6334 = dma.done.wait [#allocation5], 1024  }
  0x3e   :  { %6335 = vsyncadd [#allocation5], 4294966272 }
  0x3f   :  { %6336 = dma.done.wait [#allocation8], 8704  }
  0x40   :  { %6337 = vsyncadd [#allocation8], 4294958592 }
  0x41   :  { %6338 = dma.done.wait [#allocation11], 32784  }
  0x42   :  { %6339 = vsyncadd [#allocation11], 4294934512 }
  0x43   :  { %6340 = dma.done.wait [#allocation14], 2176  }
  0x44   :  { %6341 = vsyncadd [#allocation14], 4294965120 }
  0x45   :  { %6342 = dma.done.wait [#allocation17], 2064  }
  0x46   :  { %6343 = vsyncadd [#allocation17], 4294965232 }
  0x47   :  { %6344 = dma.done.wait [#allocation20], 16  }
  0x48   :  { %6345 = vsyncadd [#allocation20], 4294967280  ;;  %v6547_v2 = vld [vmem:[#allocation9 + $0x38] sm:$0xff]  ;;  %v6557_v6 = vld [vmem:[#allocation9 + $0x30] sm:$0xff]  ;;  %s7519_s14 = sld [smem:[#allocation56_spill]]  ;;  %vm3623_vm0 = vcmask 7168  }
  0x49   :  { %v6549_v3 = vld [vmem:[#allocation9 + $0x78] sm:$0xff]  ;;  %766 = vmatpush.bf16.msra.mxu0 %v6547_v2  ;;  %v6559_v7 = vld [vmem:[#allocation9 + $0x70] sm:$0xff]  ;;  %v6569_v10 = vld [vmem:[#allocation9 + $0x28] sm:$0xff]  ;;  %s7535_s3 = sld [smem:[#allocation52_spill]]  ;;  %s6366_s17 = smov [#allocation22]  }
  0x4a   :  { %v6551_v4 = vld [vmem:[#allocation9 + $0xb8] sm:$0xff]  ;;  %779 = vmatpush.bf16.msra.mxu1 %v6549_v3  ;;  %v6563_v8 = vld [vmem:[#allocation9 + $0xb0] sm:$0xff]  ;;  %v6571_v11 = vld [vmem:[#allocation9 + $0x68] sm:$0xff]  ;;  %s7536_s10 = sld [smem:[#allocation50_spill]] }
  0x4b   :  { %v6553_v5 = vld [vmem:[#allocation9 + $0xf8] sm:$0xff]  ;;  %792 = vmatpush.bf16.msra.mxu2 %v6551_v4  ;;  %v6565_v9 = vld [vmem:[#allocation9 + $0xf0] sm:$0xff]  ;;  %v6575_v12 = vld [vmem:[#allocation9 + $0xa8] sm:$0xff]  ;;  %s7537_s27 = sld [smem:[#allocation57_spill]] }
  0x4c   :  { %805 = vmatpush.bf16.msra.mxu3 %v6553_v5  ;;  %v6577_v13 = vld [vmem:[#allocation9 + $0xe8] sm:$0xff]  ;;  %v6581_v14 = vld [vmem:[#allocation9 + $0x20] sm:$0xff]  ;;  %v6593_v18 = vld [vmem:[#allocation9 + $0x18] sm:$0xff]  ;;  %s7538_s13 = sld [smem:[#allocation48_spill]] }
  0x4d   :  { %767 = vmatpush.bf16.msra.mxu0 %v6557_v6  ;;  %v6583_v15 = vld [vmem:[#allocation9 + $0x60] sm:$0xff]  ;;  %v6595_v19 = vld [vmem:[#allocation9 + $0x58] sm:$0xff]  ;;  %v6605_v22 = vld [vmem:[#allocation9 + $0x10] sm:$0xff]  ;;  %s7541_s15 = sld [smem:[#allocation53_spill]] }
  0x4e   :  { %780 = vmatpush.bf16.msra.mxu1 %v6559_v7  ;;  %v6587_v16 = vld [vmem:[#allocation9 + $0xa0] sm:$0xff]  ;;  %v6599_v20 = vld [vmem:[#allocation9 + $0x98] sm:$0xff]  ;;  %v6607_v23 = vld [vmem:[#allocation9 + $0x50] sm:$0xff] }
  0x4f   :  { %793 = vmatpush.bf16.msra.mxu2 %v6563_v8  ;;  %v6589_v17 = vld [vmem:[#allocation9 + $0xe0] sm:$0xff]  ;;  %v6601_v21 = vld [vmem:[#allocation9 + $0xd8] sm:$0xff]  ;;  %v6611_v24 = vld [vmem:[#allocation9 + $0x90] sm:$0xff] }
  0x50   :  { %806 = vmatpush.bf16.msra.mxu3 %v6565_v9  ;;  %v6613_v25 = vld [vmem:[#allocation9 + $0xd0] sm:$0xff]  ;;  %v6615_v26 = vld [vmem:[#allocation9 + $0x8] sm:$0xff]  ;;  %v6627_v30 = vld [vmem:[#allocation9] sm:$0xff] }
  0x51   :  { %768 = vmatpush.bf16.msra.mxu0 %v6569_v10  ;;  %v6617_v27 = vld [vmem:[#allocation9 + $0x48] sm:$0xff]  ;;  %v6631_v31 = vld [vmem:[#allocation9 + $0x40] sm:$0xff]  ;;  %v6639_v34 = vld [vmem:[#allocation9 + $0x138] sm:$0xff] }
  0x52   :  { %781 = vmatpush.bf16.msra.mxu1 %v6571_v11  ;;  %v6623_v28 = vld [vmem:[#allocation9 + $0x88] sm:$0xff]  ;;  %v6633_v32 = vld [vmem:[#allocation9 + $0x80] sm:$0xff]  ;;  %v232_v35 = vld [vmem:[#allocation4 + $0x10] sm:$0xff] }
  0x53   :  { %794 = vmatpush.bf16.msra.mxu2 %v6575_v12  ;;  %v6625_v29 = vld [vmem:[#allocation9 + $0xc8] sm:$0xff]  ;;  %v6635_v33 = vld [vmem:[#allocation9 + $0xc0] sm:$0xff]  ;;  %v6641_v37 = vld [vmem:[#allocation9 + $0x178] sm:$0xff]  ;;  %v244_v42 = vpack.c.bf16 %v232_v35, %v232_v35 }
  0x54   :  { %807 = vmatpush.bf16.msra.mxu3 %v6577_v13  ;;  %7504 = vst [vmem:[#allocation32_spill] sm:$0xff] %v6635_v33  ;;  %v230_v36 = vld [vmem:[#allocation4] sm:$0xff]  ;;  %v233_v38 = vld [vmem:[#allocation4 + $0x18] sm:$0xff]  ;;  %v231_v39 = vld [vmem:[#allocation4 + $0x8] sm:$0xff] }
  0x55   :  { %769 = vmatpush.bf16.msra.mxu0 %v6581_v14  ;;  %v6643_v40 = vld [vmem:[#allocation9 + $0x1b8] sm:$0xff]  ;;  %v242_v43 = vpack.c.bf16 %v230_v36, %v230_v36  ;;  %v245_v44 = vpack.c.bf16 %v233_v38, %v233_v38  ;;  %v243_v45 = vpack.c.bf16 %v231_v39, %v231_v39  ;;  %v6653_v46 = vld [vmem:[#allocation9 + $0x130] sm:$0xff]  ;;  %v6665_v50 = vld [vmem:[#allocation9 + $0x128] sm:$0xff] }
  0x56   :  { %782 = vmatpush.bf16.msra.mxu1 %v6583_v15  ;;  %7505 = vst [vmem:[#allocation33_spill] sm:$0xff] %v6643_v40  ;;  %v6645_v41 = vld [vmem:[#allocation9 + $0x1f8] sm:$0xff]  ;;  %v6655_v47 = vld [vmem:[#allocation9 + $0x170] sm:$0xff]  ;;  %v6667_v51 = vld [vmem:[#allocation9 + $0x168] sm:$0xff] }
  0x57   :  { %795 = vmatpush.bf16.msra.mxu2 %v6587_v16  ;;  %7506 = vst [vmem:[#allocation34_spill] sm:$0xff] %v6645_v41  ;;  %v6659_v48 = vld [vmem:[#allocation9 + $0x1b0] sm:$0xff]  ;;  %v6671_v52 = vld [vmem:[#allocation9 + $0x1a8] sm:$0xff]  ;;  %v6677_v54 = vld [vmem:[#allocation9 + $0x120] sm:$0xff] }
  0x58   :  { %808 = vmatpush.bf16.msra.mxu3 %v6589_v17  ;;  %7507 = vst [vmem:[#allocation35_spill] sm:$0xff] %v6659_v48  ;;  %v6661_v49 = vld [vmem:[#allocation9 + $0x1f0] sm:$0xff]  ;;  %v6673_v53 = vld [vmem:[#allocation9 + $0x1e8] sm:$0xff]  ;;  %v6679_v55 = vld [vmem:[#allocation9 + $0x160] sm:$0xff] }
  0x59   :  { %770 = vmatpush.bf16.msra.mxu0 %v6593_v18  ;;  %7508 = vst [vmem:[#allocation36_spill] sm:$0xff] %v6661_v49  ;;  %v6683_v56 = vld [vmem:[#allocation9 + $0x1a0] sm:$0xff]  ;;  %v6689_v58 = vld [vmem:[#allocation9 + $0x118] sm:$0xff]  ;;  %v6701_v62 = vld [vmem:[#allocation9 + $0x110] sm:$0xff] }
  0x5a   :  { %783 = vmatpush.bf16.msra.mxu1 %v6595_v19  ;;  %7509 = vst [vmem:[#allocation37_spill] sm:$0xff] %v6671_v52  ;;  %v6685_v57 = vld [vmem:[#allocation9 + $0x1e0] sm:$0xff]  ;;  %v6691_v59 = vld [vmem:[#allocation9 + $0x158] sm:$0xff]  ;;  %v6703_v63 = vld [vmem:[#allocation9 + $0x150] sm:$0xff] }
  0x5b   :  { %796 = vmatpush.bf16.msra.mxu2 %v6599_v20  ;;  %7510 = vst [vmem:[#allocation38_spill] sm:$0xff] %v6673_v53  ;;  %v6695_v60 = vld [vmem:[#allocation9 + $0x198] sm:$0xff]  ;;  %v6707_v0 = vld [vmem:[#allocation9 + $0x190] sm:$0xff]  ;;  %v6713_v35 = vld [vmem:[#allocation9 + $0x108] sm:$0xff] }
  0x5c   :  { %809 = vmatpush.bf16.msra.mxu3 %v6601_v21  ;;  %7511 = vst [vmem:[#allocation39_spill] sm:$0xff] %v6683_v56  ;;  %v6697_v61 = vld [vmem:[#allocation9 + $0x1d8] sm:$0xff]  ;;  %v6709_v1 = vld [vmem:[#allocation9 + $0x1d0] sm:$0xff]  ;;  %v6715_v36 = vld [vmem:[#allocation9 + $0x148] sm:$0xff] }
  0x5d   :  { %771 = vmatpush.bf16.msra.mxu0 %v6605_v22  ;;  %7512 = vst [vmem:[#allocation40_spill] sm:$0xff] %v6685_v57  ;;  %v6719_v38 = vld [vmem:[#allocation9 + $0x188] sm:$0xff] }
  0x5e   :  { %784 = vmatpush.bf16.msra.mxu1 %v6607_v23  ;;  %7513 = vst [vmem:[#allocation41_spill] sm:$0xff] %v6695_v60  ;;  %v6721_v39 = vld [vmem:[#allocation9 + $0x1c8] sm:$0xff] }
  0x5f   :  { %797 = vmatpush.bf16.msra.mxu2 %v6611_v24  ;;  %7514 = vst [vmem:[#allocation42_spill] sm:$0xff] %v6697_v61 }
  0x60   :  { %810 = vmatpush.bf16.msra.mxu3 %v6613_v25  ;;  %7515 = vst [vmem:[#allocation43_spill] sm:$0xff] %v6707_v0 }
  0x61   :  { %772 = vmatpush.bf16.msra.mxu0 %v6615_v26  ;;  %7516 = vst [vmem:[#allocation44_spill] sm:$0xff] %v6709_v1 }
  0x62   :  { %785 = vmatpush.bf16.msra.mxu1 %v6617_v27  ;;  %7517 = vst [vmem:[#allocation45_spill] sm:$0xff] %v6719_v38 }
  0x63   :  { %798 = vmatpush.bf16.msra.mxu2 %v6623_v28  ;;  %7518 = vst [vmem:[#allocation46_spill] sm:$0xff] %v6721_v39 }
  0x64   :  { %811 = vmatpush.bf16.msra.mxu3 %v6625_v29 }
  0x65   :  { %773 = vmatpush.bf16.msra.mxu0 %v6627_v30 }
  0x66   :  { %786 = vmatpush.bf16.msra.mxu1 %v6631_v31 }
  0x67   :  { %799 = vmatpush.bf16.msra.mxu2 %v6633_v32 }
  0x68   :  { %812 = vmatpush.bf16.msra.mxu3 %v6635_v33  ;;  %774 = vmatmul.bf16.vlgmr.msra.gmra.mxu0 %v242_v43  ;;  %v6725_v43 = vld [vmem:[#allocation9 + $0x140] sm:$0xff] }
  0x69   :  { %818 = vmatpush.bf16.msrb.mxu0 %v6639_v34  ;;  %787 = vmatmul.bf16.vlgmr.msra.gmra.mxu1 %v243_v45  ;;  %v5676_v45 = vld [vmem:[%s7519_s14 + $0x74] sm:$0xf0] }
  0x6a   :  { %831 = vmatpush.bf16.msrb.mxu1 %v6641_v37  ;;  %800 = vmatmul.bf16.vlgmr.msra.gmra.mxu2 %v244_v42  ;;  %v6723_v42 = vld [vmem:[#allocation9 + $0x100] sm:$0xff] }
  0x6b   :  { %844 = vmatpush.bf16.msrb.mxu2 %v6643_v40  ;;  %813 = vmatmul.bf16.vlgmr.msra.gmra.mxu3 %v245_v44  ;;  %v4433_v44 = vld [vmem:[%s7519_s14 + $0x70] sm:$0xf] }
  0x6c   :  { %857 = vmatpush.bf16.msrb.mxu3 %v6645_v41  ;;  %v4425_v41 = vld [vmem:[%s7519_s14 + $0x60] sm:$0xf] }
  0x6d   :  { %819 = vmatpush.bf16.msrb.mxu0 %v6653_v46 }
  0x6e   :  { %832 = vmatpush.bf16.msrb.mxu1 %v6655_v47 }
  0x6f   :  { %845 = vmatpush.bf16.msrb.mxu2 %v6659_v48 }
  0x70   :  { %858 = vmatpush.bf16.msrb.mxu3 %v6661_v49  ;;  %v6747_v49 = vor.u32 %v5676_v45, %v4433_v44  ;;  %v4427_v44 = vld [vmem:[%s7519_s14 + $0x68] sm:$0xf0]  ;;  %v4417_v45 = vld [vmem:[%s7519_s14 + $0x50] sm:$0xf] }
  0x71   :  { %820 = vmatpush.bf16.msrb.mxu0 %v6665_v50 }
  0x72   :  { %833 = vmatpush.bf16.msrb.mxu1 %v6667_v51 }
  0x73   :  { %846 = vmatpush.bf16.msrb.mxu2 %v6671_v52  ;;  %v237_v52 = vld [vmem:[#allocation4 + $0x38] sm:$0xff] }
  0x74   :  { %859 = vmatpush.bf16.msrb.mxu3 %v6673_v53  ;;  %v236_v53 = vld [vmem:[#allocation4 + $0x30] sm:$0xff] }
  0x75   :  { %821 = vmatpush.bf16.msrb.mxu0 %v6677_v54 }
  0x76   :  { %834 = vmatpush.bf16.msrb.mxu1 %v6679_v55 }
  0x77   :  { %847 = vmatpush.bf16.msrb.mxu2 %v6683_v56  ;;  %v6745_v56 = vld [vmem:[#allocation9 + $0x1c0] sm:$0xff] }
  0x78   :  { %860 = vmatpush.bf16.msrb.mxu3 %v6685_v57  ;;  %v235_v57 = vld [vmem:[#allocation4 + $0x28] sm:$0xff] }
  0x79   :  { %822 = vmatpush.bf16.msrb.mxu0 %v6689_v58  ;;  %v247_v33 = vpack.c.bf16 %v235_v57, %v235_v57 }
  0x7a   :  { %835 = vmatpush.bf16.msrb.mxu1 %v6691_v59 }
  0x7b   :  { %848 = vmatpush.bf16.msrb.mxu2 %v6695_v60  ;;  %v234_v60 = vld [vmem:[#allocation4 + $0x20] sm:$0xff] }
  0x7c   :  { %861 = vmatpush.bf16.msrb.mxu3 %v6697_v61  ;;  %v6741_v61 = vld [vmem:[#allocation9 + $0x180] sm:$0xff]  ;;  %v246_v40 = vpack.c.bf16 %v234_v60, %v234_v60 }
  0x7d   :  { %823 = vmatpush.bf16.msrb.mxu0 %v6701_v62 }
  0x7e   :  { %836 = vmatpush.bf16.msrb.mxu1 %v6703_v63 }
  0x7f   :  { %849 = vmatpush.bf16.msrb.mxu2 %v6707_v0  ;;  %v4435_v0 = vld [vmem:[%s7519_s14 + $0x78] sm:$0xf0] }
  0x80   :  { %862 = vmatpush.bf16.msrb.mxu3 %v6709_v1  ;;  %v5675_v1 = vld [vmem:[%s7519_s14 + $0x74] sm:$0xf] }
  0x81   :  { %824 = vmatpush.bf16.msrb.mxu0 %v6713_v35  ;;  %v6749_v48 = vor.u32 %v5675_v1, %v4435_v0  ;;  %v248_v0 = vpack.c.bf16 %v236_v53, %v236_v53  ;;  %v249_v1 = vpack.c.bf16 %v237_v52, %v237_v52  ;;  %v5672_v52 = vld [vmem:[%s7519_s14 + $0x54] sm:$0xf0]  ;;  %v5671_v53 = vld [vmem:[%s7519_s14 + $0x54] sm:$0xf] }
  0x82   :  { %837 = vmatpush.bf16.msrb.mxu1 %v6715_v36 }
  0x83   :  { %850 = vmatpush.bf16.msrb.mxu2 %v6719_v38  ;;  %v5674_v38 = vld [vmem:[%s7519_s14 + $0x64] sm:$0xf0] }
  0x84   :  { %863 = vmatpush.bf16.msrb.mxu3 %v6721_v39  ;;  %v5673_v39 = vld [vmem:[%s7519_s14 + $0x64] sm:$0xf]  ;;  %v6769_v57 = vor.u32 %v5674_v38, %v4425_v41  ;;  %v4419_v41 = vld [vmem:[%s7519_s14 + $0x58] sm:$0xf0]  ;;  %v4409_v38 = vld [vmem:[%s7519_s14 + $0x40] sm:$0xf] }
  0x85   :  { %825 = vmatpush.bf16.msrb.mxu0 %v6723_v42  ;;  %v6771_v60 = vor.u32 %v5673_v39, %v4427_v44  ;;  %v5670_v39 = vld [vmem:[%s7519_s14 + $0x44] sm:$0xf0] }
  0x86   :  { %838 = vmatpush.bf16.msrb.mxu1 %v6725_v43  ;;  %v6809_v44 = vor.u32 %v5670_v39, %v4409_v38 }
  0x87   :  { %851 = vmatpush.bf16.msrb.mxu2 %v6741_v61 }
  0x88   :  { %864 = vmatpush.bf16.msrb.mxu3 %v6745_v56  ;;  %826 = vmatmul.bf16.vlgmr.msrb.gmra.mxu0 %v246_v40  ;;  %v6791_v40 = vor.u32 %v5671_v53, %v4419_v41 }
  0x89   :  { %974 = vmatpush.bf16.msra.mxu0 %v6747_v49  ;;  %839 = vmatmul.bf16.vlgmr.msrb.gmra.mxu1 %v247_v33  ;;  %v6789_v33 = vor.u32 %v5672_v52, %v4417_v45  ;;  %v5668_v45 = vld [vmem:[%s7519_s14 + $0x34] sm:$0xf0] }
  0x8a   :  { %987 = vmatpush.bf16.msra.mxu1 %v6749_v48  ;;  %852 = vmatmul.bf16.vlgmr.msrb.gmra.mxu2 %v248_v0 }
  0x8b   :  { %865 = vmatmul.bf16.vlgmr.msrb.gmra.mxu3 %v249_v1  ;;  %1068 = vmatpush.bf16.msra.mxu2 %v6547_v2  ;;  %v5669_v2 = vld [vmem:[%s7519_s14 + $0x44] sm:$0xf]  ;;  %v4401_v1 = vld [vmem:[%s7519_s14 + $0x30] sm:$0xf] }
  0x8c   :  { %1081 = vmatpush.bf16.msra.mxu3 %v6549_v3  ;;  %v4411_v3 = vld [vmem:[%s7519_s14 + $0x48] sm:$0xf0]  ;;  %v6829_v52 = vor.u32 %v5668_v45, %v4401_v1 }
  0x8d   :  { %975 = vmatpush.bf16.msra.mxu0 %v6769_v57  ;;  %v6811_v0 = vor.u32 %v5669_v2, %v4411_v3 }
  0x8e   :  { %988 = vmatpush.bf16.msra.mxu1 %v6771_v60 }
  0x8f   :  { %1069 = vmatpush.bf16.msra.mxu2 %v6557_v6  ;;  %v5667_v6 = vld [vmem:[%s7519_s14 + $0x34] sm:$0xf] }
  0x90   :  { %1082 = vmatpush.bf16.msra.mxu3 %v6559_v7  ;;  %v4403_v7 = vld [vmem:[%s7519_s14 + $0x38] sm:$0xf0] }
  0x91   :  { %976 = vmatpush.bf16.msra.mxu0 %v6789_v33  ;;  %v6831_v53 = vor.u32 %v5667_v6, %v4403_v7 }
  0x92   :  { %989 = vmatpush.bf16.msra.mxu1 %v6791_v40 }
  0x93   :  { %1070 = vmatpush.bf16.msra.mxu2 %v6569_v10  ;;  %v4393_v10 = vld [vmem:[%s7519_s14 + $0x20] sm:$0xf] }
  0x94   :  { %1083 = vmatpush.bf16.msra.mxu3 %v6571_v11  ;;  %v5666_v11 = vld [vmem:[%s7519_s14 + $0x24] sm:$0xf0] }
  0x95   :  { %977 = vmatpush.bf16.msra.mxu0 %v6809_v44 }
  0x96   :  { %990 = vmatpush.bf16.msra.mxu1 %v6811_v0 }
  0x97   :  { %1071 = vmatpush.bf16.msra.mxu2 %v6581_v14  ;;  %v5665_v14 = vld [vmem:[%s7519_s14 + $0x24] sm:$0xf] }
  0x98   :  { %1084 = vmatpush.bf16.msra.mxu3 %v6583_v15  ;;  %v6870_v15 = vor.u32 %v5666_v11, %v4393_v10 }
  0x99   :  { %978 = vmatpush.bf16.msra.mxu0 %v6829_v52 }
  0x9a   :  { %991 = vmatpush.bf16.msra.mxu1 %v6831_v53 }
  0x9b   :  { %1072 = vmatpush.bf16.msra.mxu2 %v6593_v18  ;;  %v4395_v18 = vld [vmem:[%s7519_s14 + $0x28] sm:$0xf0] }
  0x9c   :  { %1085 = vmatpush.bf16.msra.mxu3 %v6595_v19  ;;  %v6875_v19 = vor.u32 %v5665_v14, %v4395_v18 }
  0x9d   :  { %979 = vmatpush.bf16.msra.mxu0 %v6870_v15 }
  0x9e   :  { %992 = vmatpush.bf16.msra.mxu1 %v6875_v19 }
  0x9f   :  { %1073 = vmatpush.bf16.msra.mxu2 %v6605_v22  ;;  %v4385_v22 = vld [vmem:[%s7519_s14 + $0x10] sm:$0xf] }
  0xa0   :  { %1086 = vmatpush.bf16.msra.mxu3 %v6607_v23  ;;  %v5664_v23 = vld [vmem:[%s7519_s14 + $0x14] sm:$0xf0] }
  0xa3   :  { %1074 = vmatpush.bf16.msra.mxu2 %v6615_v26  ;;  %v5663_v26 = vld [vmem:[%s7519_s14 + $0x14] sm:$0xf] }
  0xa4   :  { %1087 = vmatpush.bf16.msra.mxu3 %v6617_v27  ;;  %v6888_v27 = vor.u32 %v5664_v23, %v4385_v22  ;;  %v7522_v22 = vld [vmem:[#allocation34_spill] sm:$0xff] }
  0xa6   :  { %980 = vmatpush.bf16.msra.mxu0 %v6888_v27 }
  0xa7   :  { %1075 = vmatpush.bf16.msra.mxu2 %v6627_v30  ;;  %v4387_v30 = vld [vmem:[%s7519_s14 + $0x18] sm:$0xf0] }
  0xa8   :  { %1088 = vmatpush.bf16.msra.mxu3 %v6631_v31  ;;  %v6893_v31 = vor.u32 %v5663_v26, %v4387_v30  ;;  %v7524_v30 = vld [vmem:[#allocation36_spill] sm:$0xff] }
  0xaa   :  { %993 = vmatpush.bf16.msra.mxu1 %v6893_v31 }
  0xab   :  { %1120 = vmatpush.bf16.msrb.mxu2 %v6639_v34  ;;  %v4377_v34 = vld [vmem:[%s7519_s14] sm:$0xf] }
  0xac   :  { %1133 = vmatpush.bf16.msrb.mxu3 %v6641_v37  ;;  %v5662_v37 = vld [vmem:[%s7519_s14 + $0x4] sm:$0xf0] }
  0xaf   :  { %1121 = vmatpush.bf16.msrb.mxu2 %v6653_v46  ;;  %v5661_v46 = vld [vmem:[%s7519_s14 + $0x4] sm:$0xf] }
  0xb0   :  { %1134 = vmatpush.bf16.msrb.mxu3 %v6655_v47  ;;  %v6905_v47 = vor.u32 %v5662_v37, %v4377_v34  ;;  %v7525_v37 = vld [vmem:[#allocation37_spill] sm:$0xff] }
  0xb2   :  { %981 = vmatpush.bf16.msra.mxu0 %v6905_v47 }
  0xb3   :  { %1122 = vmatpush.bf16.msrb.mxu2 %v6665_v50  ;;  %v4379_v50 = vld [vmem:[%s7519_s14 + $0x8] sm:$0xf0] }
  0xb4   :  { %1135 = vmatpush.bf16.msrb.mxu3 %v6667_v51  ;;  %v6911_v51 = vor.u32 %v5661_v46, %v4379_v50  ;;  %v7526_v46 = vld [vmem:[#allocation38_spill] sm:$0xff] }
  0xb6   :  { %994 = vmatpush.bf16.msra.mxu1 %v6911_v51  ;;  %1094 = vmatpush.bf16.msrb.mxu0 %v6551_v4 }
  0xb7   :  { %1123 = vmatpush.bf16.msrb.mxu2 %v6677_v54  ;;  %v238_v54 = vld [vmem:[#allocation7] sm:$0xff] }
  0xb8   :  { %1136 = vmatpush.bf16.msrb.mxu3 %v6679_v55 }
  0xba   :  { %1107 = vmatpush.bf16.msrb.mxu1 %v6553_v5  ;;  %1095 = vmatpush.bf16.msrb.mxu0 %v6563_v8  ;;  %v6926_v5 = vperm.slane %v238_v54, 3 }
  0xbb   :  { %1124 = vmatpush.bf16.msrb.mxu2 %v6689_v58 }
  0xbc   :  { %1137 = vmatpush.bf16.msrb.mxu3 %v6691_v59  ;;  %v1020_v8 = vpack.c.bf16 %v6926_v5, %v6926_v5  ;;  %v7520_v59 = vld [vmem:[#allocation32_spill] sm:$0xff] }
  0xbe   :  { %1108 = vmatpush.bf16.msrb.mxu1 %v6565_v9  ;;  %1096 = vmatpush.bf16.msrb.mxu0 %v6575_v12  ;;  %v6931_v9 = vperm.slane %v238_v54, 7  ;;  %v7528_v54 = vld [vmem:[#allocation40_spill] sm:$0xff] }
  0xbf   :  { %1125 = vmatpush.bf16.msrb.mxu2 %v6701_v62  ;;  %v5985_v62 = vld [vmem:[#allocation10] ss:$0 sm:$0xff] }
  0xc0   :  { %1138 = vmatpush.bf16.msrb.mxu3 %v6703_v63 }
  0xc2   :  { %1109 = vmatpush.bf16.msrb.mxu1 %v6577_v13  ;;  %1097 = vmatpush.bf16.msrb.mxu0 %v6587_v16  ;;  %v1029_v16 = vshrl.u32 %v1020_v8, 16 }
  0xc3   :  { %1126 = vmatpush.bf16.msrb.mxu2 %v6713_v35  ;;  %v240_v35 = vld [vmem:[#allocation7 + $0x10] sm:$0xff] }
  0xc4   :  { %1139 = vmatpush.bf16.msrb.mxu3 %v6715_v36  ;;  %v6943_v36 = vperm.slane %v240_v35, 3 }
  0xc6   :  { %1110 = vmatpush.bf16.msrb.mxu1 %v6589_v17  ;;  %1098 = vmatpush.bf16.msrb.mxu0 %v6599_v20  ;;  %v1021_v17 = vpack.c.bf16 %v6931_v9, %v6931_v9 }
  0xc7   :  { %1127 = vmatpush.bf16.msrb.mxu2 %v6723_v42  ;;  %v6948_v42 = vperm.slane %v240_v35, 7  ;;  %v5177_v35 = vld [vmem:[#allocation12 + $0x5c0] sm:$0xf] }
  0xc8   :  { %1140 = vmatpush.bf16.msrb.mxu3 %v6725_v43  ;;  %v1033_v58 = vshrl.u32 %v1021_v17, 16 }
  0xc9   :  { %v1025_v43 = vpack.c.bf16 %v6948_v42, %v6948_v42 }
  0xca   :  { %1111 = vmatpush.bf16.msrb.mxu1 %v6601_v21  ;;  %1099 = vmatpush.bf16.msrb.mxu0 %v6611_v24  ;;  %v1031_v24 = vrot.slane %v1029_v16, 1 }
  0xcb   :  { %v1049_v41 = vshrl.u32 %v1025_v43, 16  ;;  %v5929_v43 = vld [vmem:[#allocation12 + $0x7dc] sm:$0xf0] }
  0xcc   :  { %1076 = vmatmul.bf16.vlgmr.msra.gmra.mxu2 %v1031_v24 }
  0xcd   :  { %1174 = vmatpush.bf16.msra.mxu2 %v6747_v49  ;;  %v1024_v49 = vpack.c.bf16 %v6943_v36, %v6943_v36 }
  0xce   :  { %1112 = vmatpush.bf16.msrb.mxu1 %v6613_v25  ;;  %1100 = vmatpush.bf16.msrb.mxu0 %v6623_v28  ;;  %v1035_v25 = vrot.slane %v1033_v58, 1 }
  0xd0   :  { %1089 = vmatmul.bf16.vlgmr.msra.gmra.mxu3 %v1035_v25  ;;  %v7533_v25 = vld [vmem:[#allocation45_spill] sm:$0xff] }
  0xd1   :  { %1187 = vmatpush.bf16.msra.mxu3 %v6749_v48  ;;  %1175 = vmatpush.bf16.msra.mxu2 %v6769_v57  ;;  %v1045_v48 = vshrl.u32 %v1024_v49, 16  ;;  %v5433_v49 = vld [vmem:[#allocation12 + $0x7c0] sm:$0xf] }
  0xd2   :  { %1113 = vmatpush.bf16.msrb.mxu1 %v6625_v29  ;;  %1101 = vmatpush.bf16.msrb.mxu0 %v6633_v32 }
  0xd5   :  { %1188 = vmatpush.bf16.msra.mxu3 %v6771_v60  ;;  %1176 = vmatpush.bf16.msra.mxu2 %v6789_v33  ;;  %v1047_v60 = vrot.slane %v1045_v48, 1  ;;  %v1051_v33 = vrot.slane %v1049_v41, 1  ;;  %v5145_v41 = vld [vmem:[#allocation12 + $0x580] sm:$0xf] }
  0xd6   :  { %1114 = vmatpush.bf16.msrb.mxu1 %v7520_v59  ;;  %v7534_v59 = vld [vmem:[#allocation46_spill] sm:$0xff] }
  0xd9   :  { %1189 = vmatpush.bf16.msra.mxu3 %v6791_v40  ;;  %1177 = vmatpush.bf16.msra.mxu2 %v6809_v44 }
  0xdc   :  { %1128 = vmatmul.bf16.vlgmr.msrb.gmra.mxu2 %v1047_v60 }
  0xdd   :  { %1190 = vmatpush.bf16.msra.mxu3 %v6811_v0  ;;  %1178 = vmatpush.bf16.msra.mxu2 %v6829_v52 }
  0xe0   :  { %1141 = vmatmul.bf16.vlgmr.msrb.gmra.mxu3 %v1051_v33  ;;  %v5857_v33 = vld [vmem:[#allocation12 + $0x59c] sm:$0xf0] }
  0xe1   :  { %1191 = vmatpush.bf16.msra.mxu3 %v6831_v53  ;;  %1179 = vmatpush.bf16.msra.mxu2 %v6870_v15  ;;  %v239_v53 = vld [vmem:[#allocation7 + $0x8] sm:$0xff] }
  0xe2   :  { %v6963_v15 = vperm.slane %v239_v53, 3  ;;  %v6965_v18 = vperm.slane %v239_v53, 7  ;;  %v5337_v53 = vld [vmem:[#allocation12 + $0x700] sm:$0xf] }
  0xe4   :  { %v1022_v23 = vpack.c.bf16 %v6963_v15, %v6963_v15  ;;  %v1023_v26 = vpack.c.bf16 %v6965_v18, %v6965_v18 }
  0xe5   :  { %v775_v55 = vpop.f32.mrf.mxu0  ;;  %1192 = vmatpush.bf16.msra.mxu3 %v6875_v19  ;;  %1180 = vmatpush.bf16.msra.mxu2 %v6888_v27  ;;  %v7521_v19 = vld [vmem:[#allocation33_spill] sm:$0xff]  ;;  %v7523_v27 = vld [vmem:[#allocation35_spill] sm:$0xff] }
  0xe6   :  { %v788_v4 = vpop.f32.mrf.mxu1  ;;  %v776_v29 = vadd.f32 %v5985_v62, %v775_v55  ;;  %v1041_v34 = vshrl.u32 %v1023_v26, 16  ;;  %v241_v55 = vld [vmem:[#allocation7 + $0x18] sm:$0xff]  ;;  %v5305_v26 = vld [vmem:[#allocation12 + $0x6c0] sm:$0xf] }
  0xe7   :  { %v6981_v8 = vperm.slane %v241_v55, 7 }
  0xe8   :  { %v789_v32 = vadd.f32 %v788_v4, %v776_v29  ;;  %v1043_v50 = vrot.slane %v1041_v34, 1  ;;  %v6979_v4 = vperm.slane %v241_v55, 3 }
  0xe9   :  { %1193 = vmatpush.bf16.msra.mxu3 %v6893_v31  ;;  %1181 = vmatpush.bf16.msra.mxu2 %v6905_v47  ;;  %v1037_v31 = vshrl.u32 %v1022_v23, 16  ;;  %v1027_v17 = vpack.c.bf16 %v6981_v8, %v6981_v8  ;;  %v5833_v23 = vld [vmem:[#allocation12 + $0x4dc] sm:$0xf0] }
  0xea   :  { %v1026_v16 = vpack.c.bf16 %v6979_v4, %v6979_v4 }
  0xeb   :  { %v1039_v47 = vrot.slane %v1037_v31, 1  ;;  %v1057_v58 = vshrl.u32 %v1027_v17, 16  ;;  %v5817_v17 = vld [vmem:[#allocation12 + $0x45c] sm:$0xf0] }
  0xec   :  { %v1053_v24 = vshrl.u32 %v1026_v16, 16  ;;  %v4985_v16 = vld [vmem:[#allocation12 + $0x440] sm:$0xf] }
  0xed   :  { %v801_v12 = vpop.f32.mrf.mxu2  ;;  %v777_v20 = vpop.f32.mrf.mxu0  ;;  %1194 = vmatpush.bf16.msra.mxu3 %v6911_v51  ;;  %v7527_v51 = vld [vmem:[#allocation39_spill] sm:$0xff] }
  0xee   :  { %v814_v13 = vpop.f32.mrf.mxu3  ;;  %v790_v21 = vpop.f32.mrf.mxu1  ;;  %v802_v57 = vadd.f32 %v801_v12, %v789_v32  ;;  %v7529_v12 = vld [vmem:[#allocation41_spill] sm:$0xff]  ;;  %v7531_v20 = vld [vmem:[#allocation43_spill] sm:$0xff]  ;;  %v1055_v62 = vrot.slane %v1053_v24, 1  ;;  %v5865_v32 = vld [vmem:[#allocation12 + $0x5dc] sm:$0xf0] }
  0xef   :  { %v7532_v21 = vld [vmem:[#allocation44_spill] sm:$0xff]  ;;  %v5178_v48 = vor.u32 %v5865_v32, %v5177_v35  ;;  %v5881_v24 = vld [vmem:[#allocation12 + $0x65c] sm:$0xf0] }
  0xf0   :  { %v815_v38 = vadd.f32 %v814_v13, %v802_v57  ;;  %v7530_v13 = vld [vmem:[#allocation42_spill] sm:$0xff]  ;;  %v5434_v57 = vor.u32 %v5929_v43, %v5433_v49  ;;  %v378_v49 = vld [vmem:[#allocation10] sm:$0x1] }
  0xf1   :  { %2799 = vmatpush.bf16.msrb.mxu2 %v5178_v48  ;;  %v5873_v35 = vld [vmem:[#allocation12 + $0x61c] sm:$0xf0] }
  0xf2   :  { %2812 = vmatpush.bf16.msrb.mxu3 %v5434_v57 }
  0xf5   :  { %v803_v28 = vpop.f32.mrf.mxu2 }
  0xf6   :  { %v816_v63 = vpop.f32.mrf.mxu3  ;;  %v1059_v28 = vrot.slane %v1057_v58, 1 }
 0x105   :  { %v827_v39 = vpop.f32.mrf.mxu0 }
 0x106   :  { %v840_v2 = vpop.f32.mrf.mxu1  ;;  %v828_v40 = vadd.f32 %v827_v39, %v815_v38  ;;  %v5921_v39 = vld [vmem:[#allocation12 + $0x79c] sm:$0xf0] }
 0x108   :  { %v841_v3 = vadd.f32 %v840_v2, %v828_v40  ;;  %v5113_v40 = vld [vmem:[#allocation12 + $0x540] sm:$0xf] }
 0x10d   :  { %v853_v44 = vpop.f32.mrf.mxu2  ;;  %v829_v45 = vpop.f32.mrf.mxu0 }
 0x10e   :  { %v866_v1 = vpop.f32.mrf.mxu3  ;;  %v854_v0 = vadd.f32 %v853_v44, %v841_v3  ;;  %v842_v6 = vpop.f32.mrf.mxu1  ;;  %v5849_v3 = vld [vmem:[#allocation12 + $0x55c] sm:$0xf0] }
 0x10f   :  { %v5369_v44 = vld [vmem:[#allocation12 + $0x740] sm:$0xf] }
 0x110   :  { %v867_v7 = vadd.f32 %v866_v1, %v854_v0  ;;  %v5114_v1 = vor.u32 %v5849_v3, %v5113_v40  ;;  %v5913_v0 = vld [vmem:[#allocation12 + $0x75c] sm:$0xf0] }
 0x111   :  { %v5370_v45 = vor.u32 %v5913_v0, %v5369_v44  ;;  %v5861_v0 = vld [vmem:[#allocation12 + $0x5c4] sm:$0xf] }
 0x112   :  { %v870_v52 = vmax.f32 %v867_v7, 0.0  ;;  %v5081_v7 = vld [vmem:[#allocation12 + $0x500] sm:$0xf] }
 0x114   :  { %v871_v10 = vpack.c.bf16 %v870_v52, %v870_v52  ;;  %v5841_v52 = vld [vmem:[#allocation12 + $0x51c] sm:$0xf0] }
 0x115   :  { %v855_v11 = vpop.f32.mrf.mxu2 }
 0x116   :  { %v868_v14 = vpop.f32.mrf.mxu3  ;;  %982 = vmatmul.bf16.vlgmr.msra.gmra.mxu0 %v871_v10  ;;  %995 = vmatmul.bf16.vlgmr.msra.gmra.mxu1 %v871_v10  ;;  %v5082_v11 = vor.u32 %v5841_v52, %v5081_v7  ;;  %v5179_v7 = vld [vmem:[#allocation12 + $0x5e0] sm:$0xf0] }
 0x117   :  { %1146 = vmatpush.bf16.msra.mxu0 %v7521_v19  ;;  %1159 = vmatpush.bf16.msra.mxu1 %v7522_v22  ;;  %v5905_v14 = vld [vmem:[#allocation12 + $0x71c] sm:$0xf0]  ;;  %v5925_v52 = vld [vmem:[#allocation12 + $0x7c4] sm:$0xf] }
 0x118   :  { %v5338_v19 = vor.u32 %v5905_v14, %v5337_v53  ;;  %v5049_v22 = vld [vmem:[#allocation12 + $0x4c0] sm:$0xf]  ;;  %v5435_v53 = vld [vmem:[#allocation12 + $0x7e0] sm:$0xf0] }
 0x119   :  { %v5438_v14 = vor.u32 %v5925_v52, %v5435_v53  ;;  %v5866_v52 = vld [vmem:[#allocation12 + $0x5e4] sm:$0xf0] }
 0x11a   :  { %v5441_v53 = vld [vmem:[#allocation12 + $0x7c8] sm:$0xf] }
 0x11b   :  { %1147 = vmatpush.bf16.msra.mxu0 %v7523_v27  ;;  %1160 = vmatpush.bf16.msra.mxu1 %v7524_v30  ;;  %v5050_v27 = vor.u32 %v5833_v23, %v5049_v22  ;;  %v5897_v30 = vld [vmem:[#allocation12 + $0x6dc] sm:$0xf0]  ;;  %v5147_v22 = vld [vmem:[#allocation12 + $0x5a0] sm:$0xf0] }
 0x11c   :  { %v5306_v31 = vor.u32 %v5897_v30, %v5305_v26  ;;  %v5917_v23 = vld [vmem:[#allocation12 + $0x784] sm:$0xf] }
 0x11d   :  { %v5403_v26 = vld [vmem:[#allocation12 + $0x7a0] sm:$0xf0] }
 0x11f   :  { %1148 = vmatpush.bf16.msra.mxu0 %v7525_v37  ;;  %1161 = vmatpush.bf16.msra.mxu1 %v7526_v46  ;;  %v5017_v37 = vld [vmem:[#allocation12 + $0x480] sm:$0xf] }
 0x120   :  { %v5825_v46 = vld [vmem:[#allocation12 + $0x49c] sm:$0xf0] }
 0x123   :  { %1149 = vmatpush.bf16.msra.mxu0 %v7527_v51  ;;  %1162 = vmatpush.bf16.msra.mxu1 %v7528_v54  ;;  %v5018_v51 = vor.u32 %v5825_v46, %v5017_v37  ;;  %v5889_v54 = vld [vmem:[#allocation12 + $0x69c] sm:$0xf0]  ;;  %v5909_v37 = vld [vmem:[#allocation12 + $0x744] sm:$0xf] }
 0x124   :  { %v5371_v46 = vld [vmem:[#allocation12 + $0x760] sm:$0xf0] }
 0x126   :  { %1102 = vmatmul.bf16.vlgmr.msrb.gmra.mxu0 %v1039_v47  ;;  %1115 = vmatmul.bf16.vlgmr.msrb.gmra.mxu1 %v1043_v50  ;;  %v5273_v47 = vld [vmem:[#allocation12 + $0x680] sm:$0xf] }
 0x127   :  { %1150 = vmatpush.bf16.msra.mxu0 %v7529_v12  ;;  %1163 = vmatpush.bf16.msra.mxu1 %v7530_v13  ;;  %v5274_v55 = vor.u32 %v5889_v54, %v5273_v47  ;;  %v1202_v54 = vld [vmem:[%s7535_s3] sm:$0x3] }
 0x12b   :  { %1151 = vmatpush.bf16.msra.mxu0 %v7531_v20  ;;  %1164 = vmatpush.bf16.msra.mxu1 %v7532_v21  ;;  %v5241_v20 = vld [vmem:[#allocation12 + $0x640] sm:$0xf]  ;;  %v4986_v21 = vor.u32 %v5817_v17, %v4985_v16  ;;  %v5901_v16 = vld [vmem:[#allocation12 + $0x704] sm:$0xf] }
 0x12c   :  { %v5242_v58 = vor.u32 %v5881_v24, %v5241_v20  ;;  %v5339_v17 = vld [vmem:[#allocation12 + $0x720] sm:$0xf0]  ;;  %v1204_v20 = vperm.slane %v1202_v54, 0 }
 0x12f   :  { %1152 = vmatpush.bf16.msra.mxu0 %v7533_v25  ;;  %1165 = vmatpush.bf16.msra.mxu1 %v7534_v59  ;;  %v4953_v25 = vld [vmem:[#allocation12 + $0x400] sm:$0xf] }
 0x130   :  { %v5809_v59 = vld [vmem:[#allocation12 + $0x41c] sm:$0xf0] }
 0x133   :  { %1153 = vmatpush.bf16.msra.mxu0 %v6741_v61  ;;  %1166 = vmatpush.bf16.msra.mxu1 %v6745_v56  ;;  %v5401_v61 = vld [vmem:[#allocation12 + $0x780] sm:$0xf]  ;;  %v5146_v56 = vor.u32 %v5857_v33, %v5145_v41 }
 0x134   :  { %v5402_v2 = vor.u32 %v5921_v39, %v5401_v61 }
 0x135   :  { %2800 = vmatpush.bf16.msrb.mxu2 %v5146_v56 }
 0x136   :  { %1154 = vmatmul.bf16.vlgmr.msra.gmra.mxu0 %v1055_v62  ;;  %1167 = vmatmul.bf16.vlgmr.msra.gmra.mxu1 %v1059_v28  ;;  %v5209_v62 = vld [vmem:[#allocation12 + $0x600] sm:$0xf]  ;;  %v4954_v28 = vor.u32 %v5809_v59, %v4953_v25  ;;  %v5829_v25 = vld [vmem:[#allocation12 + $0x4c4] sm:$0xf] }
 0x137   :  { %2813 = vmatpush.bf16.msrb.mxu3 %v5402_v2  ;;  %v5210_v32 = vor.u32 %v5873_v35, %v5209_v62  ;;  %v5051_v59 = vld [vmem:[#allocation12 + $0x4e0] sm:$0xf0]  ;;  %v7008_v35 = vpack.c.bf16 %v1204_v20, %v1204_v20  ;;  %v5057_v20 = vld [vmem:[#allocation12 + $0x4c8] sm:$0xf] }
 0x138   :  { %v5893_v62 = vld [vmem:[#allocation12 + $0x6c4] sm:$0xf] }
 0x139   :  { %2801 = vmatpush.bf16.msrb.mxu2 %v5114_v1 }
 0x13b   :  { %2814 = vmatpush.bf16.msrb.mxu3 %v5370_v45 }
 0x13d   :  { %2802 = vmatpush.bf16.msrb.mxu2 %v5082_v11 }
 0x13f   :  { %2815 = vmatpush.bf16.msrb.mxu3 %v5338_v19 }
 0x141   :  { %2803 = vmatpush.bf16.msrb.mxu2 %v5050_v27 }
 0x143   :  { %2816 = vmatpush.bf16.msrb.mxu3 %v5306_v31  ;;  %v5845_v31 = vld [vmem:[#allocation12 + $0x544] sm:$0xf] }
 0x145   :  { %2804 = vmatpush.bf16.msrb.mxu2 %v5018_v51  ;;  %v5837_v51 = vld [vmem:[#allocation12 + $0x504] sm:$0xf] }
 0x147   :  { %2817 = vmatpush.bf16.msrb.mxu3 %v5274_v55  ;;  %v5083_v55 = vld [vmem:[#allocation12 + $0x520] sm:$0xf0] }
 0x148   :  { %v5086_v24 = vor.u32 %v5837_v51, %v5083_v55  ;;  %v5842_v51 = vld [vmem:[#allocation12 + $0x524] sm:$0xf0] }
 0x149   :  { %2805 = vmatpush.bf16.msrb.mxu2 %v4986_v21  ;;  %v1205_v21 = vperm.slane %v1202_v54, 1  ;;  %v5345_v54 = vld [vmem:[#allocation12 + $0x708] sm:$0xf] }
 0x14a   :  { %v5906_v55 = vld [vmem:[#allocation12 + $0x724] sm:$0xf0] }
 0x14b   :  { %2818 = vmatpush.bf16.msrb.mxu3 %v5242_v58  ;;  %v5342_v58 = vor.u32 %v5901_v16, %v5339_v17  ;;  %v5346_v17 = vor.u32 %v5906_v55, %v5345_v54  ;;  %v5155_v55 = vld [vmem:[#allocation12 + $0x5a8] sm:$0xf0] }
 0x14d   :  { %2806 = vmatpush.bf16.msrb.mxu2 %v4954_v28  ;;  %v5307_v28 = vld [vmem:[#allocation12 + $0x6e0] sm:$0xf0] }
 0x14f   :  { %v6995_v63 = vpop.f32.mrf.mxu2  ;;  %2819 = vmatpush.bf16.msrb.mxu3 %v5210_v32  ;;  %v7010_v32 = vpack.c.bf16 %v1205_v21, %v1205_v21  ;;  %v5834_v21 = vld [vmem:[#allocation12 + $0x4e4] sm:$0xf0] }
 0x150   :  { %v1078_v57 = vadd.f32 %v6995_v63, %v378_v49  ;;  %v5182_v63 = vor.u32 %v5861_v0, %v5179_v7  ;;  %v5054_v49 = vor.u32 %v5829_v25, %v5051_v59  ;;  %v5869_v0 = vld [vmem:[#allocation12 + $0x604] sm:$0xf]  ;;  %v5185_v7 = vld [vmem:[#allocation12 + $0x5c8] sm:$0xf]  ;;  %v5058_v59 = vor.u32 %v5834_v21, %v5057_v20  ;;  %v4569_v20 = vld [vmem:[#allocation12 + $0x100] sm:$0xf] }
 0x151   :  { %v5025_v25 = vld [vmem:[#allocation12 + $0x488] sm:$0xf]  ;;  %v5713_v21 = vld [vmem:[#allocation12 + $0x11c] sm:$0xf0] }
 0x153   :  { %v6997_v29 = vpop.f32.mrf.mxu3 }
 0x157   :  { %v1079_v60 = vpop.f32.mrf.mxu2 }
 0x158   :  { %v1091_v60 = vadd.f32 %v6997_v29, %v1078_v57  ;;  %v5853_v29 = vld [vmem:[#allocation12 + $0x584] sm:$0xf] }
 0x159   :  { %v5019_v57 = vld [vmem:[#allocation12 + $0x4a0] sm:$0xf0] }
 0x15b   :  { %v1092_v38 = vpop.f32.mrf.mxu3 }
 0x15f   :  { %v1129_v6 = vpop.f32.mrf.mxu2 }
 0x163   :  { %v1142_v10 = vpop.f32.mrf.mxu3 }
 0x167   :  { %v1131_v34 = vpop.f32.mrf.mxu2 }
 0x168   :  { %v5115_v34 = vld [vmem:[#allocation12 + $0x560] sm:$0xf0] }
 0x169   :  { %v5118_v47 = vor.u32 %v5845_v31, %v5115_v34  ;;  %v5850_v31 = vld [vmem:[#allocation12 + $0x564] sm:$0xf0] }
 0x16a   :  { %v5377_v34 = vld [vmem:[#allocation12 + $0x748] sm:$0xf] }
 0x16b   :  { %v1144_v50 = vpop.f32.mrf.mxu3 }
 0x16c   :  { %v5374_v50 = vor.u32 %v5909_v37, %v5371_v46  ;;  %v5914_v37 = vld [vmem:[#allocation12 + $0x764] sm:$0xf0] }
 0x193   :  { %v6999_v12 = vpop.f32.mrf.mxu0  ;;  %v7001_v13 = vpop.f32.mrf.mxu1 }
 0x19b   :  { %v985_v48 = vpop.f32.mrf.mxu0  ;;  %v998_v43 = vpop.f32.mrf.mxu1 }
 0x19c   :  { %v5310_v48 = vor.u32 %v5893_v62, %v5307_v28  ;;  %v5821_v43 = vld [vmem:[#allocation12 + $0x484] sm:$0xf]  ;;  %v5826_v28 = vld [vmem:[#allocation12 + $0x4a4] sm:$0xf0] }
 0x1a3   :  { %v1103_v41 = vpop.f32.mrf.mxu0  ;;  %v1116_v33 = vpop.f32.mrf.mxu1 }
 0x1a4   :  { %v1104_v61 = vadd.f32 %v1103_v41, %v1091_v60  ;;  %v5885_v60 = vld [vmem:[#allocation12 + $0x684] sm:$0xf] }
 0x1a5   :  { %v5275_v41 = vld [vmem:[#allocation12 + $0x6a0] sm:$0xf0] }
 0x1a6   :  { %v1117_v38 = vadd.f32 %v1116_v33, %v1104_v61  ;;  %v5022_v33 = vor.u32 %v5821_v43, %v5019_v57  ;;  %v5278_v61 = vor.u32 %v5885_v60, %v5275_v41  ;;  %v4665_v43 = vld [vmem:[#allocation12 + $0x1c0] sm:$0xf] }
 0x1a7   :  { %v5737_v57 = vld [vmem:[#allocation12 + $0x1dc] sm:$0xf0] }
 0x1a8   :  { %v1130_v2 = vadd.f32 %v1129_v6, %v1117_v38  ;;  %v5150_v6 = vor.u32 %v5853_v29, %v5147_v22  ;;  %v5813_v38 = vld [vmem:[#allocation12 + $0x444] sm:$0xf]  ;;  %v5186_v29 = vor.u32 %v5866_v52, %v5185_v7  ;;  %v5153_v22 = vld [vmem:[#allocation12 + $0x588] sm:$0xf]  ;;  %v4921_v60 = vld [vmem:[#allocation12 + $0x3c0] sm:$0xf]  ;;  %v4666_v41 = vor.u32 %v5737_v57, %v4665_v43 }
 0x1a9   :  { %v5793_v7 = vld [vmem:[#allocation12 + $0x39c] sm:$0xf0]  ;;  %v4961_v52 = vld [vmem:[#allocation12 + $0x408] sm:$0xf]  ;;  %v5910_v43 = vld [vmem:[#allocation12 + $0x74c] sm:$0xf] }
 0x1aa   :  { %v1143_v40 = vadd.f32 %v1142_v10, %v1130_v2  ;;  %v5406_v10 = vor.u32 %v5917_v23, %v5403_v26  ;;  %v5243_v2 = vld [vmem:[#allocation12 + $0x660] sm:$0xf0]  ;;  %v5858_v23 = vld [vmem:[#allocation12 + $0x5a4] sm:$0xf0]  ;;  %2773 = vmatpush.bf16.msrb.mxu0 %v4666_v41  ;;  %v5379_v57 = vld [vmem:[#allocation12 + $0x768] sm:$0xf0] }
 0x1ab   :  { %v1105_v56 = vpop.f32.mrf.mxu0  ;;  %v1118_v39 = vpop.f32.mrf.mxu1  ;;  %v5409_v26 = vld [vmem:[#allocation12 + $0x788] sm:$0xf]  ;;  %v5705_v41 = vld [vmem:[#allocation12 + $0xdc] sm:$0xf0] }
 0x1ac   :  { %v4987_v56 = vld [vmem:[#allocation12 + $0x460] sm:$0xf0] }
 0x1ad   :  { %v5877_v39 = vld [vmem:[#allocation12 + $0x644] sm:$0xf] }
 0x1b3   :  { %v1155_v3 = vpop.f32.mrf.mxu0  ;;  %v1168_v44 = vpop.f32.mrf.mxu1 }
 0x1b4   :  { %v1156_v1 = vadd.f32 %v1155_v3, %v1143_v40  ;;  %v4990_v40 = vor.u32 %v5813_v38, %v4987_v56  ;;  %v5246_v3 = vor.u32 %v5877_v39, %v5243_v2  ;;  %v5026_v56 = vor.u32 %v5826_v28, %v5025_v25  ;;  %v5818_v2 = vld [vmem:[#allocation12 + $0x464] sm:$0xf0]  ;;  %v5777_v25 = vld [vmem:[#allocation12 + $0x31c] sm:$0xf0] }
 0x1b6   :  { %v1169_v45 = vadd.f32 %v1168_v44, %v1156_v1  ;;  %v5805_v44 = vld [vmem:[#allocation12 + $0x404] sm:$0xf] }
 0x1b7   :  { %v4955_v1 = vld [vmem:[#allocation12 + $0x420] sm:$0xf0] }
 0x1b8   :  { %v1172_v11 = vmax.f32 %v1169_v45, 0.0  ;;  %v5211_v45 = vld [vmem:[#allocation12 + $0x620] sm:$0xf0] }
 0x1ba   :  { %v1173_v19 = vpack.c.bf16 %v1172_v11, %v1172_v11  ;;  %v5930_v11 = vld [vmem:[#allocation12 + $0x7e4] sm:$0xf0] }
 0x1bb   :  { %v1157_v27 = vpop.f32.mrf.mxu0  ;;  %v1170_v30 = vpop.f32.mrf.mxu1 }
 0x1bc   :  { %1182 = vmatmul.bf16.vlgmr.msra.gmra.mxu2 %v1173_v19  ;;  %1195 = vmatmul.bf16.vlgmr.msra.gmra.mxu3 %v1173_v19  ;;  %v5442_v19 = vor.u32 %v5930_v11, %v5441_v53  ;;  %v5922_v27 = vld [vmem:[#allocation12 + $0x7a4] sm:$0xf0]  ;;  %v5154_v30 = vor.u32 %v5858_v23, %v5153_v22  ;;  %v5862_v22 = vld [vmem:[#allocation12 + $0x5cc] sm:$0xf] }
 0x1bd   :  { %2851 = vmatpush.bf16.msra.mxu2 %v5182_v63  ;;  %2864 = vmatpush.bf16.msra.mxu3 %v5438_v14  ;;  %v4958_v63 = vor.u32 %v5805_v44, %v4955_v1  ;;  %v5214_v14 = vor.u32 %v5869_v0, %v5211_v45  ;;  %v4633_v44 = vld [vmem:[#allocation12 + $0x180] sm:$0xf]  ;;  %v5810_v53 = vld [vmem:[#allocation12 + $0x424] sm:$0xf0]  ;;  %v5187_v23 = vld [vmem:[#allocation12 + $0x5e8] sm:$0xf0] }
 0x1be   :  { %v5729_v1 = vld [vmem:[#allocation12 + $0x19c] sm:$0xf0]  ;;  %v5217_v11 = vld [vmem:[#allocation12 + $0x608] sm:$0xf] }
 0x1bf   :  { %v4889_v0 = vld [vmem:[#allocation12 + $0x380] sm:$0xf]  ;;  %v4634_v45 = vor.u32 %v5729_v1, %v4633_v44  ;;  %v5902_v44 = vld [vmem:[#allocation12 + $0x70c] sm:$0xf] }
 0x1c0   :  { %v5347_v1 = vld [vmem:[#allocation12 + $0x728] sm:$0xf0] }
 0x1c1   :  { %2852 = vmatpush.bf16.msra.mxu2 %v5150_v6  ;;  %2865 = vmatpush.bf16.msra.mxu3 %v5406_v10  ;;  %v5410_v6 = vor.u32 %v5922_v27, %v5409_v26  ;;  %v5121_v10 = vld [vmem:[#allocation12 + $0x548] sm:$0xf]  ;;  %v4601_v26 = vld [vmem:[#allocation12 + $0x140] sm:$0xf] }
 0x1c2   :  { %v5122_v46 = vor.u32 %v5850_v31, %v5121_v10  ;;  %2774 = vmatpush.bf16.msrb.mxu0 %v4634_v45  ;;  %v5721_v27 = vld [vmem:[#allocation12 + $0x15c] sm:$0xf0]  ;;  %v5443_v10 = vld [vmem:[#allocation12 + $0x7e8] sm:$0xf0] }
 0x1c3   :  { %v4602_v31 = vor.u32 %v5721_v27, %v4601_v26  ;;  %v5697_v45 = vld [vmem:[#allocation12 + $0x9c] sm:$0xf0] }
 0x1c4   :  { %v4473_v26 = vld [vmem:[#allocation12 + $0x40] sm:$0xf] }
 0x1c5   :  { %2853 = vmatpush.bf16.msra.mxu2 %v5118_v47  ;;  %2866 = vmatpush.bf16.msra.mxu3 %v5374_v50  ;;  %v5378_v47 = vor.u32 %v5914_v37, %v5377_v34  ;;  %v5089_v50 = vld [vmem:[#allocation12 + $0x508] sm:$0xf]  ;;  %v5785_v34 = vld [vmem:[#allocation12 + $0x35c] sm:$0xf0] }
 0x1c6   :  { %v5090_v16 = vor.u32 %v5842_v51, %v5089_v50  ;;  %v5854_v50 = vld [vmem:[#allocation12 + $0x58c] sm:$0xf]  ;;  %v5190_v51 = vor.u32 %v5862_v22, %v5187_v23  ;;  %2775 = vmatpush.bf16.msrb.mxu0 %v4602_v31  ;;  %v5689_v27 = vld [vmem:[#allocation12 + $0x5c] sm:$0xf0] }
 0x1c7   :  { %v5158_v28 = vor.u32 %v5854_v50, %v5155_v55  ;;  %v5894_v22 = vld [vmem:[#allocation12 + $0x6cc] sm:$0xf]  ;;  %v5681_v55 = vld [vmem:[#allocation12 + $0x1c] sm:$0xf0] }
 0x1c8   :  { %v5315_v23 = vld [vmem:[#allocation12 + $0x6e8] sm:$0xf0] }
 0x1c9   :  { %2854 = vmatpush.bf16.msra.mxu2 %v5086_v24  ;;  %2867 = vmatpush.bf16.msra.mxu3 %v5342_v58  ;;  %v5313_v24 = vld [vmem:[#allocation12 + $0x6c8] sm:$0xf]  ;;  %v5822_v31 = vld [vmem:[#allocation12 + $0x48c] sm:$0xf] }
 0x1ca   :  { %v5898_v58 = vld [vmem:[#allocation12 + $0x6e4] sm:$0xf0]  ;;  %v5886_v50 = vld [vmem:[#allocation12 + $0x68c] sm:$0xf] }
 0x1cb   :  { %v5314_v62 = vor.u32 %v5898_v58, %v5313_v24  ;;  %v4825_v24 = vld [vmem:[#allocation12 + $0x300] sm:$0xf]  ;;  %v4570_v58 = vor.u32 %v5713_v21, %v4569_v20  ;;  %v5733_v21 = vld [vmem:[#allocation12 + $0x1c4] sm:$0xf] }
 0x1cc   :  { %2807 = vmatmul.bf16.vlgmr.msrb.gmra.mxu2 %v7008_v35  ;;  %2820 = vmatmul.bf16.vlgmr.msrb.gmra.mxu3 %v7010_v32  ;;  %v5745_v20 = vld [vmem:[#allocation12 + $0x21c] sm:$0xf0] }
 0x1cd   :  { %2855 = vmatpush.bf16.msra.mxu2 %v5054_v49  ;;  %2868 = vmatpush.bf16.msra.mxu3 %v5310_v48  ;;  %v5281_v49 = vld [vmem:[#allocation12 + $0x688] sm:$0xf] }
 0x1ce   :  { %v5890_v48 = vld [vmem:[#allocation12 + $0x6a4] sm:$0xf0]  ;;  %2776 = vmatpush.bf16.msrb.mxu0 %v4570_v58  ;;  %v5814_v58 = vld [vmem:[#allocation12 + $0x44c] sm:$0xf] }
 0x1cf   :  { %v5282_v39 = vor.u32 %v5890_v48, %v5281_v49  ;;  %v5123_v48 = vld [vmem:[#allocation12 + $0x568] sm:$0xf0] }
 0x1d1   :  { %2856 = vmatpush.bf16.msra.mxu2 %v5022_v33  ;;  %2869 = vmatpush.bf16.msra.mxu3 %v5278_v61  ;;  %v5801_v33 = vld [vmem:[#allocation12 + $0x3dc] sm:$0xf0]  ;;  %v4993_v61 = vld [vmem:[#allocation12 + $0x448] sm:$0xf] }
 0x1d2   :  { %v4922_v38 = vor.u32 %v5801_v33, %v4921_v60  ;;  %v4537_v60 = vld [vmem:[#allocation12 + $0xc0] sm:$0xf] }
 0x1d3   :  { %v4793_v33 = vld [vmem:[#allocation12 + $0x2c0] sm:$0xf] }
 0x1d4   :  { %2786 = vmatpush.bf16.msrb.mxu1 %v4922_v38  ;;  %v5769_v38 = vld [vmem:[#allocation12 + $0x2dc] sm:$0xf0] }
 0x1d5   :  { %2857 = vmatpush.bf16.msra.mxu2 %v4990_v40  ;;  %2870 = vmatpush.bf16.msra.mxu3 %v5246_v3  ;;  %v5249_v40 = vld [vmem:[#allocation12 + $0x648] sm:$0xf] }
 0x1d6   :  { %v5882_v3 = vld [vmem:[#allocation12 + $0x664] sm:$0xf0] }
 0x1d9   :  { %2858 = vmatpush.bf16.msra.mxu2 %v4958_v63  ;;  %2871 = vmatpush.bf16.msra.mxu3 %v5214_v14  ;;  %v4890_v63 = vor.u32 %v5793_v7, %v4889_v0  ;;  %v4994_v14 = vor.u32 %v5818_v2, %v4993_v61  ;;  %v4538_v61 = vor.u32 %v5705_v41, %v4537_v60  ;;  %v4505_v0 = vld [vmem:[#allocation12 + $0x80] sm:$0xf]  ;;  %v5251_v60 = vld [vmem:[#allocation12 + $0x668] sm:$0xf0] }
 0x1da   :  { %v4761_v7 = vld [vmem:[#allocation12 + $0x280] sm:$0xf] }
 0x1db   :  { %2787 = vmatpush.bf16.msrb.mxu1 %v4890_v63  ;;  %2777 = vmatpush.bf16.msrb.mxu0 %v4538_v61  ;;  %v4635_v61 = vld [vmem:[#allocation12 + $0x1a0] sm:$0xf0] }
 0x1dc   :  { %2859 = vmatmul.bf16.vlgmr.msra.gmra.mxu2 %v7008_v35  ;;  %2872 = vmatmul.bf16.vlgmr.msra.gmra.mxu3 %v7010_v32 }
 0x1dd   :  { %2903 = vmatpush.bf16.msrb.mxu2 %v5186_v29  ;;  %2916 = vmatpush.bf16.msrb.mxu3 %v5442_v19  ;;  %v5250_v29 = vor.u32 %v5882_v3, %v5249_v40  ;;  %v5874_v19 = vld [vmem:[#allocation12 + $0x624] sm:$0xf0]  ;;  %v5382_v40 = vor.u32 %v5910_v43, %v5379_v57  ;;  %v5091_v3 = vld [vmem:[#allocation12 + $0x528] sm:$0xf0] }
 0x1de   :  { %v4995_v43 = vld [vmem:[#allocation12 + $0x468] sm:$0xf0] }
 0x1df   :  { %v5878_v57 = vld [vmem:[#allocation12 + $0x64c] sm:$0xf] }
 0x1e1   :  { %2904 = vmatpush.bf16.msrb.mxu2 %v5154_v30  ;;  %2917 = vmatpush.bf16.msrb.mxu3 %v5410_v6  ;;  %v4857_v30 = vld [vmem:[#allocation12 + $0x340] sm:$0xf]  ;;  %v5926_v6 = vld [vmem:[#allocation12 + $0x7cc] sm:$0xf] }
 0x1e2   :  { %v4858_v37 = vor.u32 %v5785_v34, %v4857_v30  ;;  %v5446_v54 = vor.u32 %v5926_v6, %v5443_v10  ;;  %v4729_v30 = vld [vmem:[#allocation12 + $0x240] sm:$0xf]  ;;  %v4474_v6 = vor.u32 %v5689_v27, %v4473_v26 }
 0x1e3   :  { %v5753_v10 = vld [vmem:[#allocation12 + $0x25c] sm:$0xf0] }
 0x1e4   :  { %2788 = vmatpush.bf16.msrb.mxu1 %v4858_v37  ;;  %v4730_v34 = vor.u32 %v5753_v10, %v4729_v30  ;;  %v5161_v30 = vld [vmem:[#allocation12 + $0x590] sm:$0xf] }
 0x1e5   :  { %2905 = vmatpush.bf16.msrb.mxu2 %v5122_v46  ;;  %2918 = vmatpush.bf16.msrb.mxu3 %v5378_v47  ;;  %v4962_v46 = vor.u32 %v5810_v53, %v4961_v52  ;;  %v5218_v47 = vor.u32 %v5874_v19, %v5217_v11  ;;  %v4506_v52 = vor.u32 %v5697_v45, %v4505_v0  ;;  %v5761_v53 = vld [vmem:[#allocation12 + $0x29c] sm:$0xf0]  ;;  %v5830_v11 = vld [vmem:[#allocation12 + $0x4cc] sm:$0xf] }
 0x1e6   :  { %v4762_v63 = vor.u32 %v5761_v53, %v4761_v7  ;;  %v5059_v19 = vld [vmem:[#allocation12 + $0x4e8] sm:$0xf0]  ;;  %v5254_v0 = vor.u32 %v5878_v57, %v5251_v60  ;;  %v5193_v7 = vld [vmem:[#allocation12 + $0x5d0] sm:$0xf]  ;;  %v5717_v53 = vld [vmem:[#allocation12 + $0x144] sm:$0xf] }
 0x1e7   :  { %2778 = vmatpush.bf16.msrb.mxu0 %v4506_v52  ;;  %v5062_v37 = vor.u32 %v5830_v11, %v5059_v19  ;;  %v5219_v45 = vld [vmem:[#allocation12 + $0x628] sm:$0xf0]  ;;  %v5867_v52 = vld [vmem:[#allocation12 + $0x5ec] sm:$0xf0]  ;;  %v4603_v11 = vld [vmem:[#allocation12 + $0x160] sm:$0xf0] }
 0x1e8   :  { %v4606_v19 = vor.u32 %v5717_v53, %v4603_v11  ;;  %v5685_v53 = vld [vmem:[#allocation12 + $0x44] sm:$0xf] }
 0x1e9   :  { %2906 = vmatpush.bf16.msrb.mxu2 %v5090_v16  ;;  %2919 = vmatpush.bf16.msrb.mxu3 %v5346_v17  ;;  %v5918_v16 = vld [vmem:[#allocation12 + $0x78c] sm:$0xf]  ;;  %v4475_v11 = vld [vmem:[#allocation12 + $0x60] sm:$0xf0] }
 0x1ea   :  { %v5411_v17 = vld [vmem:[#allocation12 + $0x7a8] sm:$0xf0] }
 0x1eb   :  { %v5414_v49 = vor.u32 %v5918_v16, %v5411_v17  ;;  %2779 = vmatpush.bf16.msrb.mxu0 %v4474_v6  ;;  %v4697_v16 = vld [vmem:[#allocation12 + $0x200] sm:$0xf]  ;;  %v5194_v6 = vor.u32 %v5867_v52, %v5193_v7  ;;  %v5321_v7 = vld [vmem:[#allocation12 + $0x6d0] sm:$0xf] }
 0x1ec   :  { %v5899_v52 = vld [vmem:[#allocation12 + $0x6ec] sm:$0xf0] }
 0x1ed   :  { %2907 = vmatpush.bf16.msrb.mxu2 %v5058_v59  ;;  %2920 = vmatpush.bf16.msrb.mxu3 %v5314_v62  ;;  %v5846_v59 = vld [vmem:[#allocation12 + $0x54c] sm:$0xf]  ;;  %v4826_v62 = vor.u32 %v5777_v25, %v4825_v24  ;;  %v4667_v24 = vld [vmem:[#allocation12 + $0x1e0] sm:$0xf0]  ;;  %v4698_v25 = vor.u32 %v5745_v20, %v4697_v16 }
 0x1ee   :  { %v5126_v2 = vor.u32 %v5846_v59, %v5123_v48  ;;  %v4670_v59 = vor.u32 %v5733_v21, %v4667_v24  ;;  %v5851_v21 = vld [vmem:[#allocation12 + $0x56c] sm:$0xf0] }
 0x1ef   :  { %2789 = vmatpush.bf16.msrb.mxu1 %v4826_v62  ;;  %v5797_v62 = vld [vmem:[#allocation12 + $0x3c4] sm:$0xf]  ;;  %v5385_v24 = vld [vmem:[#allocation12 + $0x750] sm:$0xf] }
 0x1f1   :  { %2908 = vmatpush.bf16.msrb.mxu2 %v5026_v56  ;;  %2921 = vmatpush.bf16.msrb.mxu3 %v5282_v39  ;;  %v5838_v56 = vld [vmem:[#allocation12 + $0x50c] sm:$0xf]  ;;  %v4794_v39 = vor.u32 %v5769_v38, %v4793_v33  ;;  %v5725_v33 = vld [vmem:[#allocation12 + $0x184] sm:$0xf] }
 0x1f2   :  { %v5789_v38 = vld [vmem:[#allocation12 + $0x384] sm:$0xf] }
 0x1f3   :  { %2790 = vmatpush.bf16.msrb.mxu1 %v4794_v39  ;;  %v4891_v39 = vld [vmem:[#allocation12 + $0x3a0] sm:$0xf0] }
 0x1f5   :  { %2909 = vmatpush.bf16.msrb.mxu2 %v4994_v14  ;;  %2922 = vmatpush.bf16.msrb.mxu3 %v5250_v29  ;;  %v5094_v14 = vor.u32 %v5838_v56, %v5091_v3  ;;  %v5350_v29 = vor.u32 %v5902_v44, %v5347_v1  ;;  %v4638_v56 = vor.u32 %v5725_v33, %v4635_v61  ;;  %v5870_v3 = vld [vmem:[#allocation12 + $0x60c] sm:$0xf]  ;;  %v5353_v33 = vld [vmem:[#allocation12 + $0x710] sm:$0xf] }
 0x1f6   :  { %v4894_v44 = vor.u32 %v5789_v38, %v4891_v39  ;;  %v4998_v1 = vor.u32 %v5814_v58, %v4995_v43  ;;  %v5222_v27 = vor.u32 %v5870_v3, %v5219_v45  ;;  %v5915_v58 = vld [vmem:[#allocation12 + $0x76c] sm:$0xf0]  ;;  %v5693_v38 = vld [vmem:[#allocation12 + $0x84] sm:$0xf] }
 0x1f7   :  { %2791 = vmatpush.bf16.msrb.mxu1 %v4762_v63  ;;  %v5781_v63 = vld [vmem:[#allocation12 + $0x344] sm:$0xf]  ;;  %v5386_v60 = vor.u32 %v5915_v58, %v5385_v24  ;;  %v5907_v61 = vld [vmem:[#allocation12 + $0x72c] sm:$0xf0] }
 0x1f8   :  { %v5757_v39 = vld [vmem:[#allocation12 + $0x284] sm:$0xf]  ;;  %v5065_v3 = vld [vmem:[#allocation12 + $0x4d0] sm:$0xf] }
 0x1f9   :  { %2910 = vmatpush.bf16.msrb.mxu2 %v4962_v46  ;;  %2923 = vmatpush.bf16.msrb.mxu3 %v5218_v47  ;;  %v5318_v46 = vor.u32 %v5894_v22, %v5315_v23  ;;  %v5027_v47 = vld [vmem:[#allocation12 + $0x4a8] sm:$0xf0]  ;;  %v4859_v22 = vld [vmem:[#allocation12 + $0x360] sm:$0xf0]  ;;  %v5835_v45 = vld [vmem:[#allocation12 + $0x4ec] sm:$0xf0] }
 0x1fa   :  { %v4862_v23 = vor.u32 %v5781_v63, %v4859_v22  ;;  %v5749_v63 = vld [vmem:[#allocation12 + $0x244] sm:$0xf]  ;;  %v4969_v24 = vld [vmem:[#allocation12 + $0x410] sm:$0xf] }
 0x1fb   :  { %2792 = vmatpush.bf16.msrb.mxu1 %v4730_v34  ;;  %v5417_v34 = vld [vmem:[#allocation12 + $0x790] sm:$0xf] }
 0x1fc   :  { %2911 = vmatmul.bf16.vlgmr.msrb.gmra.mxu2 %v7008_v35  ;;  %2924 = vmatmul.bf16.vlgmr.msrb.gmra.mxu3 %v7010_v32  ;;  %v5811_v58 = vld [vmem:[#allocation12 + $0x42c] sm:$0xf0] }
 0x1fd   :  { %2955 = vmatpush.bf16.msra.mxu2 %v5190_v51  ;;  %2968 = vmatpush.bf16.msra.mxu3 %v5446_v54  ;;  %v5283_v51 = vld [vmem:[#allocation12 + $0x6a8] sm:$0xf0]  ;;  %v4441_v54 = vld [vmem:[#allocation12] sm:$0xf] }
 0x1fe   :  { %v4442_v17 = vor.u32 %v5681_v55, %v4441_v54  ;;  %v5286_v48 = vor.u32 %v5886_v50, %v5283_v51  ;;  %v5773_v50 = vld [vmem:[#allocation12 + $0x304] sm:$0xf]  ;;  %v5129_v55 = vld [vmem:[#allocation12 + $0x550] sm:$0xf] }
 0x1ff   :  { %2793 = vmatpush.bf16.msrb.mxu1 %v4698_v25  ;;  %v4827_v54 = vld [vmem:[#allocation12 + $0x320] sm:$0xf0]  ;;  %v5130_v57 = vor.u32 %v5851_v21, %v5129_v55  ;;  %v5819_v55 = vld [vmem:[#allocation12 + $0x46c] sm:$0xf0] }
 0x200   :  { %2780 = vmatpush.bf16.msrb.mxu0 %v4442_v17  ;;  %v4830_v16 = vor.u32 %v5773_v50, %v4827_v54  ;;  %v5701_v25 = vld [vmem:[#allocation12 + $0xc4] sm:$0xf]  ;;  %v5001_v54 = vld [vmem:[#allocation12 + $0x450] sm:$0xf] }
 0x201   :  { %2956 = vmatpush.bf16.msra.mxu2 %v5158_v28  ;;  %2969 = vmatpush.bf16.msra.mxu3 %v5414_v49  ;;  %v4923_v28 = vld [vmem:[#allocation12 + $0x3e0] sm:$0xf0]  ;;  %v5030_v49 = vor.u32 %v5822_v31, %v5027_v47  ;;  %v5859_v31 = vld [vmem:[#allocation12 + $0x5ac] sm:$0xf0] }
 0x202   :  { %v4926_v41 = vor.u32 %v5797_v62, %v4923_v28  ;;  %v4571_v47 = vld [vmem:[#allocation12 + $0x120] sm:$0xf0]  ;;  %v5162_v17 = vor.u32 %v5859_v31, %v5161_v30  ;;  %v5289_v30 = vld [vmem:[#allocation12 + $0x690] sm:$0xf] }
 0x203   :  { %v5765_v62 = vld [vmem:[#allocation12 + $0x2c4] sm:$0xf] }
 0x204   :  { %2825 = vmatpush.bf16.msra.mxu0 %v4670_v59  ;;  %2838 = vmatpush.bf16.msra.mxu1 %v4926_v41  ;;  %v4539_v59 = vld [vmem:[#allocation12 + $0xe0] sm:$0xf0]  ;;  %v5843_v41 = vld [vmem:[#allocation12 + $0x52c] sm:$0xf0] }
 0x205   :  { %2957 = vmatpush.bf16.msra.mxu2 %v5126_v2  ;;  %2970 = vmatpush.bf16.msra.mxu3 %v5382_v40  ;;  %v5806_v2 = vld [vmem:[#allocation12 + $0x40c] sm:$0xf]  ;;  %v4542_v28 = vor.u32 %v5701_v25, %v4539_v59  ;;  %v4443_v31 = vld [vmem:[#allocation12 + $0x20] sm:$0xf0]  ;;  %v5225_v25 = vld [vmem:[#allocation12 + $0x610] sm:$0xf] }
 0x206   :  { %v4963_v40 = vld [vmem:[#allocation12 + $0x428] sm:$0xf0]  ;;  %v5875_v59 = vld [vmem:[#allocation12 + $0x62c] sm:$0xf0] }
 0x207   :  { %v4966_v26 = vor.u32 %v5806_v2, %v4963_v40  ;;  %v4763_v40 = vld [vmem:[#allocation12 + $0x2a0] sm:$0xf0] }
 0x208   :  { %2826 = vmatpush.bf16.msra.mxu0 %v4638_v56  ;;  %2839 = vmatpush.bf16.msra.mxu1 %v4894_v44  ;;  %v4507_v56 = vld [vmem:[#allocation12 + $0xa0] sm:$0xf0]  ;;  %v4766_v44 = vor.u32 %v5757_v39, %v4763_v40  ;;  %v5919_v39 = vld [vmem:[#allocation12 + $0x794] sm:$0xf] }
 0x209   :  { %2958 = vmatpush.bf16.msra.mxu2 %v5094_v14  ;;  %2971 = vmatpush.bf16.msra.mxu3 %v5350_v29  ;;  %v5449_v14 = vld [vmem:[#allocation12 + $0x7d0] sm:$0xf]  ;;  %v4510_v2 = vor.u32 %v5693_v38, %v4507_v56  ;;  %v5855_v38 = vld [vmem:[#allocation12 + $0x594] sm:$0xf] }
 0x20a   :  { %v5931_v29 = vld [vmem:[#allocation12 + $0x7ec] sm:$0xf0]  ;;  %v5163_v56 = vld [vmem:[#allocation12 + $0x5b0] sm:$0xf0] }
 0x20b   :  { %v5450_v10 = vor.u32 %v5931_v29, %v5449_v14  ;;  %v4478_v14 = vor.u32 %v5685_v53, %v4475_v11  ;;  %v4731_v29 = vld [vmem:[#allocation12 + $0x260] sm:$0xf0]  ;;  %v5166_v40 = vor.u32 %v5855_v38, %v5163_v56  ;;  %v5839_v11 = vld [vmem:[#allocation12 + $0x514] sm:$0xf] }
 0x20c   :  { %2827 = vmatpush.bf16.msra.mxu0 %v4606_v19  ;;  %2840 = vmatpush.bf16.msra.mxu1 %v4862_v23  ;;  %v5033_v19 = vld [vmem:[#allocation12 + $0x490] sm:$0xf]  ;;  %v4734_v22 = vor.u32 %v5749_v63, %v4731_v29  ;;  %v5066_v23 = vor.u32 %v5835_v45, %v5065_v3  ;;  %v5387_v45 = vld [vmem:[#allocation12 + $0x770] sm:$0xf0] }
 0x20d   :  { %2959 = vmatpush.bf16.msra.mxu2 %v5062_v37  ;;  %2972 = vmatpush.bf16.msra.mxu3 %v5318_v46  ;;  %v5923_v37 = vld [vmem:[#allocation12 + $0x7ac] sm:$0xf0]  ;;  %v5709_v46 = vld [vmem:[#allocation12 + $0x104] sm:$0xf]  ;;  %v5099_v63 = vld [vmem:[#allocation12 + $0x530] sm:$0xf0] }
 0x20e   :  { %v4574_v51 = vor.u32 %v5709_v46, %v4571_v47  ;;  %v5418_v20 = vor.u32 %v5923_v37, %v5417_v34  ;;  %v5741_v34 = vld [vmem:[#allocation12 + $0x204] sm:$0xf]  ;;  %v5355_v29 = vld [vmem:[#allocation12 + $0x730] sm:$0xf0] }
 0x20f   :  { %v4699_v46 = vld [vmem:[#allocation12 + $0x220] sm:$0xf0]  ;;  %v5879_v38 = vld [vmem:[#allocation12 + $0x654] sm:$0xf] }
 0x210   :  { %2828 = vmatpush.bf16.msra.mxu0 %v4574_v51  ;;  %2841 = vmatpush.bf16.msra.mxu1 %v4830_v16  ;;  %v4702_v47 = vor.u32 %v5741_v34, %v4699_v46  ;;  %v5257_v16 = vld [vmem:[#allocation12 + $0x650] sm:$0xf]  ;;  %v4673_v46 = vld [vmem:[#allocation12 + $0x1c8] sm:$0xf]  ;;  %v5259_v56 = vld [vmem:[#allocation12 + $0x670] sm:$0xf0] }
 0x211   :  { %2960 = vmatpush.bf16.msra.mxu2 %v5030_v49  ;;  %2973 = vmatpush.bf16.msra.mxu3 %v5286_v48  ;;  %v4795_v49 = vld [vmem:[#allocation12 + $0x2e0] sm:$0xf0]  ;;  %v5097_v48 = vld [vmem:[#allocation12 + $0x510] sm:$0xf] }
 0x212   :  { %v4798_v43 = vor.u32 %v5765_v62, %v4795_v49  ;;  %v5863_v62 = vld [vmem:[#allocation12 + $0x5d4] sm:$0xf]  ;;  %v6364_v49 = vmov 0  }
 0x213   :  { %5982 = vset.pattern.permute.xlu0 %v6364_v49  ;;  %5983 = vset.pattern.permute.xlu1 %v6364_v49 }
 0x214   :  { %2829 = vmatpush.bf16.msra.mxu0 %v4542_v28  ;;  %2842 = vmatpush.bf16.msra.mxu1 %v4798_v43  ;;  %v5195_v28 = vld [vmem:[#allocation12 + $0x5f0] sm:$0xf0] }
 0x215   :  { %2961 = vmatpush.bf16.msra.mxu2 %v4998_v1  ;;  %2974 = vmatpush.bf16.msra.mxu3 %v5254_v0  ;;  %v5098_v1 = vor.u32 %v5843_v41, %v5097_v48  ;;  %v5354_v0 = vor.u32 %v5907_v61, %v5353_v33  ;;  %v5927_v48 = vld [vmem:[#allocation12 + $0x7d4] sm:$0xf]  ;;  %v5226_v41 = vor.u32 %v5875_v59, %v5225_v25 }
 0x216   :  { %v5451_v43 = vld [vmem:[#allocation12 + $0x7f0] sm:$0xf0]  ;;  %5984 = vset.pattern.permute.xlu2 %v6364_v49  ;;  %v5198_v33 = vor.u32 %v5863_v62, %v5195_v28  ;;  %v4641_v62 = vld [vmem:[#allocation12 + $0x188] sm:$0xf] }
 0x217   :  { %v5454_v61 = vor.u32 %v5927_v48, %v5451_v43  ;;  %v5730_v28 = vld [vmem:[#allocation12 + $0x1a4] sm:$0xf0] }
 0x218   :  { %2830 = vmatpush.bf16.msra.mxu0 %v4510_v2  ;;  %2843 = vmatpush.bf16.msra.mxu1 %v4766_v44  ;;  %v5419_v2 = vld [vmem:[#allocation12 + $0x7b0] sm:$0xf0] }
 0x219   :  { %2962 = vmatpush.bf16.msra.mxu2 %v4966_v26  ;;  %2975 = vmatpush.bf16.msra.mxu3 %v5222_v27  ;;  %v5322_v26 = vor.u32 %v5899_v52, %v5321_v7  ;;  %v5827_v27 = vld [vmem:[#allocation12 + $0x4ac] sm:$0xf0]  ;;  %v5422_v3 = vor.u32 %v5919_v39, %v5419_v2  ;;  %v5847_v44 = vld [vmem:[#allocation12 + $0x554] sm:$0xf]  ;;  %v1201_v7 = vld [vmem:[%s7536_s10] sm:$0xf]  ;;  %v4642_v39 = vor.u32 %v5730_v28, %v4641_v62 }
 0x21a   :  { %v5034_v50 = vor.u32 %v5827_v27, %v5033_v19  ;;  %v7028_v19 = vld [vmem:[%s7537_s27] sm:$0x3]  ;;  %v5067_v27 = vld [vmem:[#allocation12 + $0x4f0] sm:$0xf0]  ;;  %v5770_v62 = vld [vmem:[#allocation12 + $0x2e4] sm:$0xf0] }
 0x21c   :  { %2963 = vmatmul.bf16.vlgmr.msra.gmra.mxu2 %v7008_v35  ;;  %2976 = vmatmul.bf16.vlgmr.msra.gmra.mxu3 %v7010_v32 }
 0x21d   :  { %3007 = vmatpush.bf16.msrb.mxu2 %v5194_v6  ;;  %3020 = vmatpush.bf16.msrb.mxu3 %v5450_v10  ;;  %v5891_v6 = vld [vmem:[#allocation12 + $0x6ac] sm:$0xf0]  ;;  %v5677_v10 = vld [vmem:[#allocation12 + $0x4] sm:$0xf] }
 0x21e   :  { %2831 = vmatpush.bf16.msra.mxu0 %v4478_v14  ;;  %2844 = vmatpush.bf16.msra.mxu1 %v4734_v22  ;;  %v4446_v37 = vor.u32 %v5677_v10, %v4443_v31  ;;  %v5290_v51 = vor.u32 %v5891_v6, %v5289_v30  ;;  %v5903_v14 = vld [vmem:[#allocation12 + $0x714] sm:$0xf]  ;;  %v5102_v22 = vor.u32 %v5839_v11, %v5099_v63  ;;  %v890_v10 = vperm.slane %v7028_v19, 0 }
 0x21f   :  { %v5895_v30 = vld [vmem:[#allocation12 + $0x6d4] sm:$0xf]  ;;  %v891_v31 = vperm.slane %v7028_v19, 1 }
 0x220   :  { %v5323_v6 = vld [vmem:[#allocation12 + $0x6f0] sm:$0xf0] }
 0x221   :  { %3008 = vmatpush.bf16.msrb.mxu2 %v5162_v17  ;;  %3021 = vmatpush.bf16.msrb.mxu3 %v5418_v20  ;;  %v5883_v17 = vld [vmem:[#allocation12 + $0x66c] sm:$0xf0]  ;;  %v5002_v20 = vor.u32 %v5819_v55, %v5001_v54  ;;  %v5823_v54 = vld [vmem:[#allocation12 + $0x494] sm:$0xf] }
 0x222   :  { %2832 = vmatpush.bf16.msra.mxu0 %v4446_v37  ;;  %2845 = vmatpush.bf16.msra.mxu1 %v4702_v47  ;;  %v5258_v21 = vor.u32 %v5883_v17, %v5257_v16  ;;  %v5326_v37 = vor.u32 %v5895_v30, %v5323_v6  ;;  %v5738_v47 = vld [vmem:[#allocation12 + $0x1e4] sm:$0xf0]  ;;  %v5035_v17 = vld [vmem:[#allocation12 + $0x4b0] sm:$0xf0] }
 0x223   :  { %v4674_v25 = vor.u32 %v5738_v47, %v4673_v46  ;;  %v5038_v43 = vor.u32 %v5823_v54, %v5035_v17  ;;  %v5871_v63 = vld [vmem:[#allocation12 + $0x614] sm:$0xf]  ;;  %v4577_v6 = vld [vmem:[#allocation12 + $0x108] sm:$0xf]  ;;  %v5425_v17 = vld [vmem:[#allocation12 + $0x798] sm:$0xf] }
 0x224   :  { %v5714_v46 = vld [vmem:[#allocation12 + $0x124] sm:$0xf0]  ;;  %v5703_v19 = vld [vmem:[#allocation12 + $0xd4] sm:$0xf] }
 0x225   :  { %3009 = vmatpush.bf16.msrb.mxu2 %v5130_v57  ;;  %3022 = vmatpush.bf16.msrb.mxu3 %v5386_v60  ;;  %v1200_v57 = vld [vmem:[#allocation2] sm:$0x1]  ;;  %v4970_v60 = vor.u32 %v5811_v58, %v4969_v24  ;;  %v4833_v47 = vld [vmem:[#allocation12 + $0x308] sm:$0xf] }
 0x226   :  { %1471 = vperm.xlu0 %5982, %v1200_v57  }
 0x229   :  { %3010 = vmatpush.bf16.msrb.mxu2 %v5098_v1  ;;  %3023 = vmatpush.bf16.msrb.mxu3 %v5354_v0  ;;  %v5131_v1 = vld [vmem:[#allocation12 + $0x570] sm:$0xf0] }
 0x22a   :  { %v5911_v0 = vld [vmem:[#allocation12 + $0x754] sm:$0xf]  ;;  %v5134_v52 = vor.u32 %v5847_v44, %v5131_v1  ;;  %v4865_v44 = vld [vmem:[#allocation12 + $0x348] sm:$0xf] }
 0x22b   :  { %v5390_v53 = vor.u32 %v5911_v0, %v5387_v45  ;;  %v5262_v0 = vor.u32 %v5879_v38, %v5259_v56  ;;  %v5786_v45 = vld [vmem:[#allocation12 + $0x364] sm:$0xf0] }
 0x22c   :  { %v4866_v30 = vor.u32 %v5786_v45, %v4865_v44  ;;  %v4513_v56 = vld [vmem:[#allocation12 + $0x88] sm:$0xf]  ;;  %v5361_v45 = vld [vmem:[#allocation12 + $0x718] sm:$0xf] }
 0x22d   :  { %3011 = vmatpush.bf16.msrb.mxu2 %v5066_v23  ;;  %3024 = vmatpush.bf16.msrb.mxu3 %v5322_v26  ;;  %v5358_v23 = vor.u32 %v5903_v14, %v5355_v29  ;;  %v5831_v26 = vld [vmem:[#allocation12 + $0x4d4] sm:$0xf]  ;;  %v5201_v29 = vld [vmem:[#allocation12 + $0x5d8] sm:$0xf] }
 0x22e   :  { %3192 = vperm.xlu0 %5982, %v1201_v7   ;;  %v5070_v34 = vor.u32 %v5831_v26, %v5067_v27  ;;  %v5807_v7 = vld [vmem:[#allocation12 + $0x414] sm:$0xf]  ;;  %v5932_v26 = vld [vmem:[#allocation12 + $0x7f4] sm:$0xf0] }
 0x22f   :  { %v5227_v14 = vld [vmem:[#allocation12 + $0x630] sm:$0xf0] }
 0x231   :  { %3012 = vmatpush.bf16.msrb.mxu2 %v5034_v50  ;;  %3025 = vmatpush.bf16.msrb.mxu3 %v5290_v51  ;;  %v4929_v50 = vld [vmem:[#allocation12 + $0x3c8] sm:$0xf] }
 0x232   :  { %v5802_v51 = vld [vmem:[#allocation12 + $0x3e4] sm:$0xf0] }
 0x233   :  { %v4930_v59 = vor.u32 %v5802_v51, %v4929_v50  ;;  %v5778_v50 = vld [vmem:[#allocation12 + $0x324] sm:$0xf0] }
 0x235   :  { %3013 = vmatpush.bf16.msrb.mxu2 %v5002_v20  ;;  %3026 = vmatpush.bf16.msrb.mxu3 %v5258_v21  ;;  %v5887_v20 = vld [vmem:[#allocation12 + $0x694] sm:$0xf] }
 0x236   :  { %v5291_v21 = vld [vmem:[#allocation12 + $0x6b0] sm:$0xf0] }
 0x237   :  { %v5294_v57 = vor.u32 %v5887_v20, %v5291_v21  ;;  %v5924_v20 = vld [vmem:[#allocation12 + $0x7b4] sm:$0xf0]  ;;  %v4578_v21 = vor.u32 %v5714_v46, %v4577_v6  ;;  %v4449_v46 = vld [vmem:[#allocation12 + $0x8] sm:$0xf] }
 0x238   :  { %v5900_v6 = vld [vmem:[#allocation12 + $0x6f4] sm:$0xf0] }
 0x239   :  { %3014 = vmatpush.bf16.msrb.mxu2 %v4970_v60  ;;  %3027 = vmatpush.bf16.msrb.mxu3 %v5226_v41  ;;  %v4897_v60 = vld [vmem:[#allocation12 + $0x388] sm:$0xf] }
 0x23a   :  { %v5794_v41 = vld [vmem:[#allocation12 + $0x3a4] sm:$0xf0] }
 0x23b   :  { %v4898_v2 = vor.u32 %v5794_v41, %v4897_v60  ;;  %v5852_v60 = vld [vmem:[#allocation12 + $0x574] sm:$0xf0] }
 0x23c   :  { %3015 = vmatmul.bf16.vlgmr.msrb.gmra.mxu2 %v7008_v35  ;;  %3028 = vmatmul.bf16.vlgmr.msrb.gmra.mxu3 %v7010_v32  ;;  %v5393_v41 = vld [vmem:[#allocation12 + $0x758] sm:$0xf] }
 0x23d   :  { %3059 = vmatpush.bf16.msra.mxu2 %v5198_v33  ;;  %3072 = vmatpush.bf16.msra.mxu3 %v5454_v61  ;;  %v5815_v33 = vld [vmem:[#allocation12 + $0x454] sm:$0xf] }
 0x23e   :  { %v5003_v61 = vld [vmem:[#allocation12 + $0x470] sm:$0xf0] }
 0x23f   :  { %v1183_v55 = vpop.f32.mrf.mxu2  ;;  %v1196_v16 = vpop.f32.mrf.mxu3  ;;  %v5006_v1 = vor.u32 %v5815_v33, %v5003_v61  ;;  %v5916_v33 = vld [vmem:[#allocation12 + $0x774] sm:$0xf0] }
 0x240   :  { %v1184_v24 = vadd.f32 %v1183_v55, %v890_v10  ;;  %v1197_v58 = vadd.f32 %v1196_v16, %v891_v31  ;;  %v5169_v55 = vld [vmem:[#allocation12 + $0x598] sm:$0xf]  ;;  %v5394_v44 = vor.u32 %v5916_v33, %v5393_v41  ;;  %v4643_v41 = vld [vmem:[#allocation12 + $0x1a8] sm:$0xf0] }
 0x241   :  { %3060 = vmatpush.bf16.msra.mxu2 %v5166_v40  ;;  %3073 = vmatpush.bf16.msra.mxu3 %v5422_v3  ;;  %v4609_v40 = vld [vmem:[#allocation12 + $0x148] sm:$0xf]  ;;  %v5860_v16 = vld [vmem:[#allocation12 + $0x5b4] sm:$0xf0] }
 0x242   :  { %v7036_v49 = vpack.c.bf16 %v1184_v24, %v1184_v24  ;;  %v7038_v48 = vpack.c.bf16 %v1197_v58, %v1197_v58  ;;  %v5722_v3 = vld [vmem:[#allocation12 + $0x164] sm:$0xf0]  ;;  %v4834_v24 = vor.u32 %v5778_v50, %v4833_v47  ;;  %v5170_v28 = vor.u32 %v5860_v16, %v5169_v55  ;;  %v4675_v55 = vld [vmem:[#allocation12 + $0x1e8] sm:$0xf0] }
 0x243   :  { %v4610_v27 = vor.u32 %v5722_v3, %v4609_v40  ;;  %v4545_v58 = vld [vmem:[#allocation12 + $0xc8] sm:$0xf] }
 0x244   :  { %2781 = vmatmul.bf16.vlgmr.msrb.gmra.mxu0 %v7036_v49  ;;  %2794 = vmatmul.bf16.vlgmr.msrb.gmra.mxu1 %v7038_v48  ;;  %v5762_v40 = vld [vmem:[#allocation12 + $0x2a4] sm:$0xf0] }
 0x245   :  { %3061 = vmatpush.bf16.msra.mxu2 %v5134_v52  ;;  %3074 = vmatpush.bf16.msra.mxu3 %v5390_v53  ;;  %v4971_v52 = vld [vmem:[#allocation12 + $0x430] sm:$0xf0]  ;;  %v5682_v47 = vld [vmem:[#allocation12 + $0x24] sm:$0xf0] }
 0x246   :  { %2877 = vmatpush.bf16.msrb.mxu0 %v4674_v25  ;;  %2890 = vmatpush.bf16.msrb.mxu1 %v4930_v59  ;;  %v5706_v25 = vld [vmem:[#allocation12 + $0xe4] sm:$0xf0] }
 0x247   :  { %v1185_v53 = vpop.f32.mrf.mxu2  ;;  %v1198_v11 = vpop.f32.mrf.mxu3  ;;  %v4801_v59 = vld [vmem:[#allocation12 + $0x2c8] sm:$0xf]  ;;  %v4546_v61 = vor.u32 %v5706_v25, %v4545_v58  ;;  %v5828_v58 = vld [vmem:[#allocation12 + $0x4b4] sm:$0xf0] }
 0x248   :  { %v4802_v38 = vor.u32 %v5770_v62, %v4801_v59  ;;  %v4481_v11 = vld [vmem:[#allocation12 + $0x48] sm:$0xf]  ;;  %v5297_v25 = vld [vmem:[#allocation12 + $0x698] sm:$0xf]  ;;  %v4450_v62 = vor.u32 %v5682_v47, %v4449_v46 }
 0x249   :  { %3062 = vmatpush.bf16.msra.mxu2 %v5102_v22  ;;  %3075 = vmatpush.bf16.msra.mxu3 %v5358_v23  ;;  %v5868_v22 = vld [vmem:[#allocation12 + $0x5f4] sm:$0xf0]  ;;  %v4705_v50 = vld [vmem:[#allocation12 + $0x208] sm:$0xf] }
 0x24a   :  { %v5457_v23 = vld [vmem:[#allocation12 + $0x7d8] sm:$0xf]  ;;  %2878 = vmatpush.bf16.msrb.mxu0 %v4642_v39  ;;  %2891 = vmatpush.bf16.msrb.mxu1 %v4898_v2  ;;  %v5202_v51 = vor.u32 %v5868_v22, %v5201_v29  ;;  %v5698_v39 = vld [vmem:[#allocation12 + $0xa4] sm:$0xf0] }
 0x24b   :  { %v5458_v54 = vor.u32 %v5932_v26, %v5457_v23  ;;  %v4769_v2 = vld [vmem:[#allocation12 + $0x288] sm:$0xf]  ;;  %v5073_v26 = vld [vmem:[#allocation12 + $0x4d8] sm:$0xf] }
 0x24c   :  { %v4770_v53 = vor.u32 %v5762_v40, %v4769_v2  ;;  %v5754_v29 = vld [vmem:[#allocation12 + $0x264] sm:$0xf0]  ;;  %v5892_v59 = vld [vmem:[#allocation12 + $0x6b4] sm:$0xf0] }
 0x24d   :  { %3063 = vmatpush.bf16.msra.mxu2 %v5070_v34  ;;  %3076 = vmatpush.bf16.msra.mxu3 %v5326_v37  ;;  %v4974_v34 = vor.u32 %v5807_v7, %v4971_v52  ;;  %v5230_v37 = vor.u32 %v5871_v63, %v5227_v14  ;;  %v5908_v7 = vld [vmem:[#allocation12 + $0x734] sm:$0xf0]  ;;  %v4514_v52 = vor.u32 %v5698_v39, %v4513_v56  ;;  %v5690_v63 = vld [vmem:[#allocation12 + $0x64] sm:$0xf0]  ;;  %v4899_v56 = vld [vmem:[#allocation12 + $0x3a8] sm:$0xf0] }
 0x24e   :  { %2879 = vmatpush.bf16.msrb.mxu0 %v4610_v27  ;;  %2892 = vmatpush.bf16.msrb.mxu1 %v4866_v30  ;;  %v4737_v14 = vld [vmem:[#allocation12 + $0x248] sm:$0xf]  ;;  %v5362_v23 = vor.u32 %v5908_v7, %v5361_v45  ;;  %v5836_v27 = vld [vmem:[#allocation12 + $0x4f4] sm:$0xf0]  ;;  %v4611_v45 = vld [vmem:[#allocation12 + $0x168] sm:$0xf0] }
 0x24f   :  { %v5329_v30 = vld [vmem:[#allocation12 + $0x6d8] sm:$0xf]  ;;  %v5074_v16 = vor.u32 %v5836_v27, %v5073_v26  ;;  %v5782_v7 = vld [vmem:[#allocation12 + $0x34c] sm:$0xf]  ;;  %v5203_v26 = vld [vmem:[#allocation12 + $0x5f8] sm:$0xf0] }
 0x250   :  { %v5009_v39 = vld [vmem:[#allocation12 + $0x458] sm:$0xf]  ;;  %v5928_v27 = vld [vmem:[#allocation12 + $0x7dc] sm:$0xf] }
 0x251   :  { %3064 = vmatpush.bf16.msra.mxu2 %v5038_v43  ;;  %3077 = vmatpush.bf16.msra.mxu3 %v5294_v57  ;;  %v5426_v43 = vor.u32 %v5924_v20, %v5425_v17  ;;  %v5137_v57 = vld [vmem:[#allocation12 + $0x558] sm:$0xf]  ;;  %v5330_v17 = vor.u32 %v5900_v6, %v5329_v30  ;;  %v5798_v20 = vld [vmem:[#allocation12 + $0x3cc] sm:$0xf]  ;;  %v5459_v30 = vld [vmem:[#allocation12 + $0x7f8] sm:$0xf0] }
 0x252   :  { %2880 = vmatpush.bf16.msrb.mxu0 %v4578_v21  ;;  %2893 = vmatpush.bf16.msrb.mxu1 %v4834_v24  ;;  %v5138_v3 = vor.u32 %v5852_v60, %v5137_v57  ;;  %v4931_v21 = vld [vmem:[#allocation12 + $0x3e8] sm:$0xf0]  ;;  %v5041_v24 = vld [vmem:[#allocation12 + $0x498] sm:$0xf] }
 0x253   :  { %v4934_v57 = vor.u32 %v5798_v20, %v4931_v21  ;;  %v5726_v60 = vld [vmem:[#allocation12 + $0x18c] sm:$0xf]  ;;  %v5042_v33 = vor.u32 %v5828_v58, %v5041_v24  ;;  %v5820_v2 = vld [vmem:[#allocation12 + $0x474] sm:$0xf0]  ;;  %v5171_v20 = vld [vmem:[#allocation12 + $0x5b8] sm:$0xf0] }
 0x254   :  { %2833 = vmatmul.bf16.vlgmr.msra.gmra.mxu0 %v7036_v49  ;;  %2846 = vmatmul.bf16.vlgmr.msra.gmra.mxu1 %v7038_v48  ;;  %v5265_v40 = vld [vmem:[#allocation12 + $0x658] sm:$0xf]  ;;  %v5920_v21 = vld [vmem:[#allocation12 + $0x79c] sm:$0xf] }
 0x255   :  { %3065 = vmatpush.bf16.msra.mxu2 %v5006_v1  ;;  %3078 = vmatpush.bf16.msra.mxu3 %v5262_v0  ;;  %v5105_v1 = vld [vmem:[#allocation12 + $0x518] sm:$0xf]  ;;  %v5427_v24 = vld [vmem:[#allocation12 + $0x7b8] sm:$0xf0] }
 0x256   :  { %v5844_v0 = vld [vmem:[#allocation12 + $0x534] sm:$0xf0]  ;;  %2881 = vmatpush.bf16.msrb.mxu0 %v4546_v61  ;;  %2894 = vmatpush.bf16.msrb.mxu1 %v4802_v38  ;;  %v5298_v61 = vor.u32 %v5892_v59, %v5297_v25  ;;  %v5790_v38 = vld [vmem:[#allocation12 + $0x38c] sm:$0xf] }
 0x257   :  { %v5106_v22 = vor.u32 %v5844_v0, %v5105_v1  ;;  %v4902_v1 = vor.u32 %v5790_v38, %v4899_v56  ;;  %v5718_v0 = vld [vmem:[#allocation12 + $0x14c] sm:$0xf]  ;;  %v5395_v38 = vld [vmem:[#allocation12 + $0x778] sm:$0xf0] }
 0x258   :  { %v4614_v6 = vor.u32 %v5718_v0, %v4611_v45  ;;  %v5702_v59 = vld [vmem:[#allocation12 + $0xcc] sm:$0xf]  ;;  %v5840_v45 = vld [vmem:[#allocation12 + $0x51c] sm:$0xf] }
 0x259   :  { %3066 = vmatpush.bf16.msra.mxu2 %v4974_v34  ;;  %3079 = vmatpush.bf16.msra.mxu3 %v5230_v37  ;;  %v4482_v34 = vor.u32 %v5690_v63, %v4481_v11  ;;  %v4738_v37 = vor.u32 %v5754_v29, %v4737_v14  ;;  %v4867_v11 = vld [vmem:[#allocation12 + $0x368] sm:$0xf0]  ;;  %v4977_v63 = vld [vmem:[#allocation12 + $0x418] sm:$0xf] }
 0x25a   :  { %2882 = vmatpush.bf16.msrb.mxu0 %v4514_v52  ;;  %2895 = vmatpush.bf16.msrb.mxu1 %v4770_v53  ;;  %v5010_v52 = vor.u32 %v5820_v2, %v5009_v39  ;;  %v5812_v14 = vld [vmem:[#allocation12 + $0x434] sm:$0xf0]  ;;  %v5694_v2 = vld [vmem:[#allocation12 + $0x8c] sm:$0xf] }
 0x25b   :  { %v5233_v29 = vld [vmem:[#allocation12 + $0x618] sm:$0xf]  ;;  %v4978_v46 = vor.u32 %v5812_v14, %v4977_v63  ;;  %v5686_v14 = vld [vmem:[#allocation12 + $0x4c] sm:$0xf] }
 0x25c   :  { %3067 = vmatmul.bf16.vlgmr.msra.gmra.mxu2 %v7008_v35  ;;  %3080 = vmatmul.bf16.vlgmr.msra.gmra.mxu3 %v7010_v32 }
 0x25d   :  { %3111 = vmatpush.bf16.msrb.mxu2 %v5202_v51  ;;  %3124 = vmatpush.bf16.msrb.mxu3 %v5458_v54  ;;  %v5746_v51 = vld [vmem:[#allocation12 + $0x224] sm:$0xf0]  ;;  %v5734_v54 = vld [vmem:[#allocation12 + $0x1cc] sm:$0xf] }
 0x25e   :  { %2883 = vmatpush.bf16.msrb.mxu0 %v4482_v34  ;;  %2896 = vmatpush.bf16.msrb.mxu1 %v4738_v37  ;;  %v4870_v34 = vor.u32 %v5782_v7, %v4867_v11  ;;  %v5710_v37 = vld [vmem:[#allocation12 + $0x10c] sm:$0xf]  ;;  %v5107_v7 = vld [vmem:[#allocation12 + $0x538] sm:$0xf0] }
 0x261   :  { %3112 = vmatpush.bf16.msrb.mxu2 %v5170_v28  ;;  %3125 = vmatpush.bf16.msrb.mxu3 %v5426_v43  ;;  %v4706_v28 = vor.u32 %v5746_v51, %v4705_v50  ;;  %v4678_v43 = vor.u32 %v5734_v54, %v4675_v55  ;;  %v4579_v50 = vld [vmem:[#allocation12 + $0x128] sm:$0xf0] }
 0x262   :  { %2884 = vmatpush.bf16.msrb.mxu0 %v4450_v62  ;;  %v5774_v51 = vld [vmem:[#allocation12 + $0x30c] sm:$0xf]  ;;  %v4582_v58 = vor.u32 %v5710_v37, %v4579_v50  ;;  %v5331_v37 = vld [vmem:[#allocation12 + $0x6f8] sm:$0xf0] }
 0x263   :  { %2897 = vmatpush.bf16.msrb.mxu1 %v4706_v28  ;;  %v4835_v54 = vld [vmem:[#allocation12 + $0x328] sm:$0xf0] }
 0x264   :  { %v4838_v25 = vor.u32 %v5774_v51, %v4835_v54  ;;  %v4547_v62 = vld [vmem:[#allocation12 + $0xe8] sm:$0xf0] }
 0x265   :  { %3113 = vmatpush.bf16.msrb.mxu2 %v5138_v3  ;;  %3126 = vmatpush.bf16.msrb.mxu3 %v5394_v44  ;;  %v5884_v3 = vld [vmem:[#allocation12 + $0x674] sm:$0xf0]  ;;  %v4646_v44 = vor.u32 %v5726_v60, %v4643_v41  ;;  %v5766_v28 = vld [vmem:[#allocation12 + $0x2cc] sm:$0xf]  ;;  %v5430_v60 = vor.u32 %v5920_v21, %v5427_v24  ;;  %v5848_v41 = vld [vmem:[#allocation12 + $0x55c] sm:$0xf]  ;;  %v4550_v56 = vor.u32 %v5702_v59, %v4547_v62 }
 0x266   :  { %2929 = vmatpush.bf16.msra.mxu0 %v4678_v43  ;;  %v5266_v53 = vor.u32 %v5884_v3, %v5265_v40  ;;  %2898 = vmatmul.bf16.vlgmr.msrb.gmra.mxu1 %v7038_v48  ;;  %v4803_v43 = vld [vmem:[#allocation12 + $0x2e8] sm:$0xf0]  ;;  %v4937_v24 = vld [vmem:[#allocation12 + $0x3d0] sm:$0xf]  ;;  %v5043_v59 = vld [vmem:[#allocation12 + $0x4b8] sm:$0xf0] }
 0x267   :  { %2942 = vmatpush.bf16.msra.mxu1 %v4934_v57  ;;  %2885 = vmatmul.bf16.vlgmr.msrb.gmra.mxu0 %v7036_v49  ;;  %v4806_v39 = vor.u32 %v5766_v28, %v4803_v43  ;;  %v4515_v40 = vld [vmem:[#allocation12 + $0xa8] sm:$0xf0]  ;;  %v5888_v62 = vld [vmem:[#allocation12 + $0x69c] sm:$0xf] }
 0x268   :  { %v5758_v3 = vld [vmem:[#allocation12 + $0x28c] sm:$0xf]  ;;  %v4518_v11 = vor.u32 %v5694_v2, %v4515_v40  ;;  %v5299_v28 = vld [vmem:[#allocation12 + $0x6b8] sm:$0xf0]  ;;  %v5795_v2 = vld [vmem:[#allocation12 + $0x3ac] sm:$0xf0] }
 0x269   :  { %3114 = vmatpush.bf16.msrb.mxu2 %v5106_v22  ;;  %3127 = vmatpush.bf16.msrb.mxu3 %v5362_v23  ;;  %v5876_v22 = vld [vmem:[#allocation12 + $0x634] sm:$0xf0]  ;;  %v5864_v23 = vld [vmem:[#allocation12 + $0x5dc] sm:$0xf]  ;;  %v5678_v50 = vld [vmem:[#allocation12 + $0xc] sm:$0xf] }
 0x26a   :  { %2930 = vmatpush.bf16.msra.mxu0 %v4646_v44  ;;  %v5234_v47 = vor.u32 %v5876_v22, %v5233_v29  ;;  %v5206_v55 = vor.u32 %v5864_v23, %v5203_v26  ;;  %v4771_v44 = vld [vmem:[#allocation12 + $0x2a8] sm:$0xf0]  ;;  %v5110_v26 = vor.u32 %v5840_v45, %v5107_v7  ;;  %v5816_v40 = vld [vmem:[#allocation12 + $0x45c] sm:$0xf]  ;;  %v4617_v7 = vld [vmem:[#allocation12 + $0x150] sm:$0xf] }
 0x26b   :  { %2943 = vmatpush.bf16.msra.mxu1 %v4902_v1  ;;  %v4774_v63 = vor.u32 %v5758_v3, %v4771_v44  ;;  %v4483_v29 = vld [vmem:[#allocation12 + $0x68] sm:$0xf0]  ;;  %v5011_v3 = vld [vmem:[#allocation12 + $0x478] sm:$0xf0] }
 0x26c   :  { %v5750_v22 = vld [vmem:[#allocation12 + $0x24c] sm:$0xf]  ;;  %v5880_v44 = vld [vmem:[#allocation12 + $0x65c] sm:$0xf] }
 0x26d   :  { %3115 = vmatpush.bf16.msrb.mxu2 %v5074_v16  ;;  %3128 = vmatpush.bf16.msrb.mxu3 %v5330_v17  ;;  %v5462_v16 = vor.u32 %v5928_v27, %v5459_v30  ;;  %v5856_v17 = vld [vmem:[#allocation12 + $0x59c] sm:$0xf]  ;;  %v4739_v23 = vld [vmem:[#allocation12 + $0x268] sm:$0xf0] }
 0x26e   :  { %2931 = vmatpush.bf16.msra.mxu0 %v4614_v6  ;;  %v5174_v57 = vor.u32 %v5856_v17, %v5171_v20  ;;  %v5832_v30 = vld [vmem:[#allocation12 + $0x4dc] sm:$0xf]  ;;  %v4451_v51 = vld [vmem:[#allocation12 + $0x28] sm:$0xf0]  ;;  %v5739_v17 = vld [vmem:[#allocation12 + $0x1ec] sm:$0xf0] }
 0x26f   :  { %2944 = vmatpush.bf16.msra.mxu1 %v4870_v34  ;;  %v5075_v6 = vld [vmem:[#allocation12 + $0x4f8] sm:$0xf0]  ;;  %v5742_v54 = vld [vmem:[#allocation12 + $0x20c] sm:$0xf]  ;;  %v4454_v43 = vor.u32 %v5678_v50, %v4451_v51  ;;  %v5779_v50 = vld [vmem:[#allocation12 + $0x32c] sm:$0xf0] }
 0x270   :  { %v5896_v34 = vld [vmem:[#allocation12 + $0x6dc] sm:$0xf]  ;;  %v5078_v20 = vor.u32 %v5832_v30, %v5075_v6  ;;  %v4585_v6 = vld [vmem:[#allocation12 + $0x110] sm:$0xf]  ;;  %v5940_v51 = vld [vmem:[#allocation16 + $0x38] sm:$0xff] }
 0x271   :  { %3116 = vmatpush.bf16.msrb.mxu2 %v5042_v33  ;;  %3129 = vmatpush.bf16.msrb.mxu3 %v5298_v61  ;;  %v5139_v33 = vld [vmem:[#allocation12 + $0x578] sm:$0xf0]  ;;  %v5334_v21 = vor.u32 %v5896_v34, %v5331_v37 }
 0x272   :  { %v5912_v61 = vld [vmem:[#allocation12 + $0x75c] sm:$0xf]  ;;  %2932 = vmatpush.bf16.msra.mxu0 %v4582_v58  ;;  %v5142_v1 = vor.u32 %v5848_v41, %v5139_v33  ;;  %v5803_v58 = vld [vmem:[#allocation12 + $0x3ec] sm:$0xf0] }
 0x273   :  { %2945 = vmatpush.bf16.msra.mxu1 %v4838_v25  ;;  %v5398_v0 = vor.u32 %v5912_v61, %v5395_v38  ;;  %v5824_v25 = vld [vmem:[#allocation12 + $0x49c] sm:$0xf]  ;;  %v4938_v41 = vor.u32 %v5803_v58, %v4937_v24  ;;  %v4649_v33 = vld [vmem:[#allocation12 + $0x190] sm:$0xf] }
 0x274   :  { %v5731_v61 = vld [vmem:[#allocation12 + $0x1ac] sm:$0xf0]  ;;  %v5046_v38 = vor.u32 %v5824_v25, %v5043_v59  ;;  %v5939_v58 = vld [vmem:[#allocation16 + $0x30] sm:$0xff]  ;;  %v7052_v59 = vpop.f32.mrf.mxu2 }
 0x275   :  { %3117 = vmatpush.bf16.msrb.mxu2 %v5010_v52  ;;  %3130 = vmatpush.bf16.msrb.mxu3 %v5266_v53  ;;  %v5904_v52 = vld [vmem:[#allocation12 + $0x71c] sm:$0xf]  ;;  %v5771_v24 = vld [vmem:[#allocation12 + $0x2ec] sm:$0xf0] }
 0x276   :  { %v5363_v53 = vld [vmem:[#allocation12 + $0x738] sm:$0xf0]  ;;  %2933 = vmatpush.bf16.msra.mxu0 %v4550_v56  ;;  %v5302_v56 = vor.u32 %v5888_v62, %v5299_v28  ;;  %v7054_v62 = vpop.f32.mrf.mxu3 }
 0x277   :  { %2946 = vmatpush.bf16.msra.mxu1 %v4806_v39  ;;  %v5366_v27 = vor.u32 %v5904_v52, %v5363_v53  ;;  %v4905_v39 = vld [vmem:[#allocation12 + $0x390] sm:$0xf]  ;;  %v5014_v53 = vor.u32 %v5816_v40, %v5011_v3  ;;  %v5947_v25 = vld [vmem:[#allocation16 + $0x70] sm:$0xff] }
 0x278   :  { %v4906_v45 = vor.u32 %v5795_v2, %v4905_v39  ;;  %v5723_v52 = vld [vmem:[#allocation12 + $0x16c] sm:$0xf0] }
 0x279   :  { %3118 = vmatpush.bf16.msrb.mxu2 %v4978_v46  ;;  %3131 = vmatpush.bf16.msrb.mxu3 %v5234_v47  ;;  %v4486_v46 = vor.u32 %v5686_v14, %v4483_v29  ;;  %v4742_v47 = vor.u32 %v5750_v22, %v4739_v23  ;;  %v5787_v14 = vld [vmem:[#allocation12 + $0x36c] sm:$0xf0]  ;;  %v5808_v29 = vld [vmem:[#allocation12 + $0x41c] sm:$0xf] }
 0x27a   :  { %2934 = vmatpush.bf16.msra.mxu0 %v4518_v11  ;;  %v4979_v22 = vld [vmem:[#allocation12 + $0x438] sm:$0xf0]  ;;  %v4489_v2 = vld [vmem:[#allocation12 + $0x50] sm:$0xf] }
 0x27b   :  { %2947 = vmatpush.bf16.msra.mxu1 %v4774_v63  ;;  %v4873_v63 = vld [vmem:[#allocation12 + $0x350] sm:$0xf]  ;;  %v5872_v23 = vld [vmem:[#allocation12 + $0x61c] sm:$0xf]  ;;  %v4982_v34 = vor.u32 %v5808_v29, %v4979_v22  ;;  %v5735_v22 = vld [vmem:[#allocation12 + $0x1d4] sm:$0xf] }
 0x27c   :  { %3119 = vmatmul.bf16.vlgmr.msrb.gmra.mxu2 %v7008_v35  ;;  %3132 = vmatmul.bf16.vlgmr.msrb.gmra.mxu3 %v7010_v32  ;;  %v4874_v30 = vor.u32 %v5787_v14, %v4873_v63  ;;  %v5691_v40 = vld [vmem:[#allocation12 + $0x6c] sm:$0xf0] }
 0x27d   :  { %3163 = vmatpush.bf16.msra.mxu2 %v5206_v55  ;;  %3176 = vmatpush.bf16.msra.mxu3 %v5462_v16  ;;  %v4707_v55 = vld [vmem:[#allocation12 + $0x228] sm:$0xf0]  ;;  %v4681_v16 = vld [vmem:[#allocation12 + $0x1d0] sm:$0xf] }
 0x27e   :  { %2935 = vmatpush.bf16.msra.mxu0 %v4486_v46  ;;  %v5715_v46 = vld [vmem:[#allocation12 + $0x12c] sm:$0xf0] }
 0x27f   :  { %2948 = vmatpush.bf16.msra.mxu1 %v4742_v47  ;;  %v4841_v47 = vld [vmem:[#allocation12 + $0x310] sm:$0xf] }
 0x280   :  { %v4745_v3 = vld [vmem:[#allocation12 + $0x250] sm:$0xf] }
 0x281   :  { %3164 = vmatpush.bf16.msra.mxu2 %v5174_v57  ;;  %3177 = vmatpush.bf16.msra.mxu3 %v5430_v60  ;;  %v4710_v57 = vor.u32 %v5742_v54, %v4707_v55  ;;  %v4682_v60 = vor.u32 %v5739_v17, %v4681_v16  ;;  %v5948_v54 = vld [vmem:[#allocation16 + $0x78] sm:$0xff]  ;;  %v4586_v55 = vor.u32 %v5715_v46, %v4585_v6  ;;  %v4553_v17 = vld [vmem:[#allocation12 + $0xd0] sm:$0xf]  ;;  %v5935_v46 = vld [vmem:[#allocation16 + $0x10] sm:$0xff] }
 0x282   :  { %2936 = vmatpush.bf16.msra.mxu0 %v4454_v43  ;;  %v4842_v16 = vor.u32 %v5779_v50, %v4841_v47  ;;  %v5683_v63 = vld [vmem:[#allocation12 + $0x2c] sm:$0xf0]  ;;  %v5943_v47 = vld [vmem:[#allocation16 + $0x50] sm:$0xff]  ;;  %v5727_v50 = vld [vmem:[#allocation12 + $0x194] sm:$0xf] }
 0x283   :  { %2949 = vmatpush.bf16.msra.mxu1 %v4710_v57  ;;  %v4521_v57 = vld [vmem:[#allocation12 + $0x90] sm:$0xf] }
 0x284   :  { %v4713_v14 = vld [vmem:[#allocation12 + $0x210] sm:$0xf] }
 0x285   :  { %3165 = vmatpush.bf16.msra.mxu2 %v5142_v1  ;;  %3178 = vmatpush.bf16.msra.mxu3 %v5398_v0  ;;  %v5267_v1 = vld [vmem:[#allocation12 + $0x678] sm:$0xf0]  ;;  %v4650_v0 = vor.u32 %v5731_v61, %v4649_v33  ;;  %v5763_v33 = vld [vmem:[#allocation12 + $0x2ac] sm:$0xf0] }
 0x286   :  { %2981 = vmatpush.bf16.msrb.mxu0 %v4682_v60  ;;  %v5270_v11 = vor.u32 %v5880_v44, %v5267_v1  ;;  %2950 = vmatmul.bf16.vlgmr.msra.gmra.mxu1 %v7038_v48  ;;  %v5699_v60 = vld [vmem:[#allocation12 + $0xac] sm:$0xf0]  ;;  %v5937_v1 = vld [vmem:[#allocation16 + $0x20] sm:$0xff] }
 0x287   :  { %2994 = vmatpush.bf16.msrb.mxu1 %v4938_v41  ;;  %2937 = vmatmul.bf16.vlgmr.msra.gmra.mxu0 %v7036_v49  ;;  %v4777_v41 = vld [vmem:[#allocation12 + $0x290] sm:$0xf] }
 0x288   :  { %v5938_v61 = vld [vmem:[#allocation16 + $0x28] sm:$0xff]  ;;  %v4778_v39 = vor.u32 %v5763_v33, %v4777_v41  ;;  %v5933_v33 = vld [vmem:[#allocation16] sm:$0xff] }
 0x289   :  { %3166 = vmatpush.bf16.msra.mxu2 %v5110_v26  ;;  %3179 = vmatpush.bf16.msra.mxu3 %v5366_v27  ;;  %v5235_v26 = vld [vmem:[#allocation12 + $0x638] sm:$0xf0]  ;;  %v4618_v27 = vor.u32 %v5723_v52, %v4617_v7  ;;  %v5755_v44 = vld [vmem:[#allocation12 + $0x26c] sm:$0xf0]  ;;  %v5936_v52 = vld [vmem:[#allocation16 + $0x18] sm:$0xff] }
 0x28a   :  { %2982 = vmatpush.bf16.msrb.mxu0 %v4650_v0  ;;  %v5238_v37 = vor.u32 %v5872_v23, %v5235_v26  ;;  %v5945_v0 = vld [vmem:[#allocation16 + $0x60] sm:$0xff]  ;;  %v4746_v7 = vor.u32 %v5755_v44, %v4745_v3  ;;  %v5747_v29 = vld [vmem:[#allocation12 + $0x22c] sm:$0xf0]  ;;  %v4683_v23 = vld [vmem:[#allocation12 + $0x1f0] sm:$0xf0] }
 0x28b   :  { %2995 = vmatpush.bf16.msrb.mxu1 %v4906_v45  ;;  %v2810_v45 = vpop.f32.mrf.mxu2  ;;  %v5799_v26 = vld [vmem:[#allocation12 + $0x3d4] sm:$0xf]  ;;  %v4714_v6 = vor.u32 %v5747_v29, %v4713_v14 }
 0x28c   :  { %v4843_v3 = vld [vmem:[#allocation12 + $0x330] sm:$0xf0] }
 0x28d   :  { %3167 = vmatpush.bf16.msra.mxu2 %v5078_v20  ;;  %3180 = vmatpush.bf16.msra.mxu3 %v5334_v21  ;;  %v5707_v20 = vld [vmem:[#allocation12 + $0xec] sm:$0xf0]  ;;  %v5759_v14 = vld [vmem:[#allocation12 + $0x294] sm:$0xf] }
 0x28e   :  { %2983 = vmatpush.bf16.msrb.mxu0 %v4618_v27  ;;  %v4809_v21 = vld [vmem:[#allocation12 + $0x2d0] sm:$0xf]  ;;  %v4554_v28 = vor.u32 %v5707_v20, %v4553_v17  ;;  %v4939_v27 = vld [vmem:[#allocation12 + $0x3f0] sm:$0xf0] }
 0x28f   :  { %2996 = vmatpush.bf16.msrb.mxu1 %v4874_v30  ;;  %v4810_v43 = vor.u32 %v5771_v24, %v4809_v21  ;;  %v5934_v24 = vld [vmem:[#allocation16 + $0x8] sm:$0xff] }
 0x290   :  { %v4779_v29 = vld [vmem:[#allocation12 + $0x2b0] sm:$0xf0] }
 0x291   :  { %3168 = vmatpush.bf16.msra.mxu2 %v5046_v38  ;;  %3181 = vmatpush.bf16.msra.mxu3 %v5302_v56  ;;  %v5946_v38 = vld [vmem:[#allocation16 + $0x68] sm:$0xff]  ;;  %v4522_v56 = vor.u32 %v5699_v60, %v4521_v57 }
 0x292   :  { %2984 = vmatpush.bf16.msrb.mxu0 %v4586_v55  ;;  %v4907_v55 = vld [vmem:[#allocation12 + $0x3b0] sm:$0xf0] }
 0x293   :  { %2997 = vmatpush.bf16.msrb.mxu1 %v4842_v16  ;;  %v7058_v16 = vpop.f32.mrf.mxu2  ;;  %v4875_v57 = vld [vmem:[#allocation12 + $0x370] sm:$0xf0] }
 0x295   :  { %3169 = vmatpush.bf16.msra.mxu2 %v5014_v53  ;;  %3182 = vmatpush.bf16.msra.mxu3 %v5270_v11  ;;  %v5944_v53 = vld [vmem:[#allocation16 + $0x58] sm:$0xff]  ;;  %v4457_v11 = vld [vmem:[#allocation12 + $0x10] sm:$0xf] }
 0x296   :  { %2985 = vmatpush.bf16.msrb.mxu0 %v4554_v28  ;;  %v4458_v30 = vor.u32 %v5683_v63, %v4457_v11  ;;  %v4619_v28 = vld [vmem:[#allocation12 + $0x170] sm:$0xf0] }
 0x297   :  { %2998 = vmatpush.bf16.msrb.mxu1 %v4810_v43  ;;  %v5783_v43 = vld [vmem:[#allocation12 + $0x354] sm:$0xf] }
 0x298   :  { %v4878_v41 = vor.u32 %v5783_v43, %v4875_v57  ;;  %v5695_v11 = vld [vmem:[#allocation12 + $0x94] sm:$0xf]  ;;  %v4689_v57 = vld [vmem:[#allocation12 + $0x1d8] sm:$0xf] }
 0x299   :  { %3170 = vmatpush.bf16.msra.mxu2 %v4982_v34  ;;  %3183 = vmatpush.bf16.msra.mxu3 %v5238_v37  ;;  %v4686_v34 = vor.u32 %v5735_v22, %v4683_v23  ;;  %v4942_v37 = vor.u32 %v5799_v26, %v4939_v27  ;;  %v4523_v63 = vld [vmem:[#allocation12 + $0xb0] sm:$0xf0] }
 0x29a   :  { %2986 = vmatpush.bf16.msrb.mxu0 %v4522_v56  ;;  %v984_v56 = vadd.f32 %v6999_v12, %v890_v10  ;;  %v4715_v43 = vld [vmem:[#allocation12 + $0x230] sm:$0xf0] }
 0x29b   :  { %2999 = vmatpush.bf16.msrb.mxu1 %v4778_v39  ;;  %v997_v39 = vadd.f32 %v7001_v13, %v891_v31  ;;  %v2862_v44 = vpop.f32.mrf.mxu2  ;;  %v4555_v31 = vld [vmem:[#allocation12 + $0xf0] sm:$0xf0] }
 0x29c   :  { %3171 = vmatmul.bf16.vlgmr.msra.gmra.mxu2 %v7008_v35  ;;  %3184 = vmatmul.bf16.vlgmr.msra.gmra.mxu3 %v7010_v32  ;;  %v2823_v35 = vpop.f32.mrf.mxu3  ;;  %v4490_v32 = vor.u32 %v5691_v40, %v4489_v2  ;;  %v4587_v2 = vld [vmem:[#allocation12 + $0x130] sm:$0xf0]  ;;  %v3656_v45 = vpack.c.bf16 %v984_v56, %v984_v56 }
 0x29d   :  { %3943 = vmatpush.bf16.msrb.mxu2 %v5940_v51  ;;  %3956 = vmatpush.bf16.msrb.mxu3 %v5948_v54  ;;  %v4651_v51 = vld [vmem:[#allocation12 + $0x1b0] sm:$0xf0]  ;;  %v3657_v13 = vpack.c.bf16 %v997_v39, %v997_v39 }
 0x29e   :  { %2987 = vmatpush.bf16.msrb.mxu0 %v4490_v32  ;;  %v5791_v54 = vld [vmem:[#allocation12 + $0x394] sm:$0xf]  ;;  %v4654_v20 = vor.u32 %v5727_v50, %v4651_v51 }
 0x29f   :  { %3000 = vmatpush.bf16.msrb.mxu1 %v4746_v7  ;;  %v4910_v21 = vor.u32 %v5791_v54, %v4907_v55  ;;  %v5775_v40 = vld [vmem:[#allocation12 + $0x314] sm:$0xf] }
 0x2a0   :  { %v4846_v10 = vor.u32 %v5775_v40, %v4843_v3  ;;  %v5767_v35 = vld [vmem:[#allocation12 + $0x2d4] sm:$0xf] }
 0x2a1   :  { %3944 = vmatpush.bf16.msrb.mxu2 %v5939_v58  ;;  %3957 = vmatpush.bf16.msrb.mxu3 %v5947_v25  ;;  %v5942_v58 = vld [vmem:[#allocation16 + $0x48] sm:$0xff] }
 0x2a2   :  { %2988 = vmatpush.bf16.msrb.mxu0 %v4458_v30  ;;  %v5719_v25 = vld [vmem:[#allocation12 + $0x154] sm:$0xf]  ;;  %v4526_v30 = vor.u32 %v5695_v11, %v4523_v63 }
 0x2a3   :  { %3001 = vmatpush.bf16.msrb.mxu1 %v4714_v6  ;;  %v4622_v60 = vor.u32 %v5719_v25, %v4619_v28  ;;  %v4811_v32 = vld [vmem:[#allocation12 + $0x2f0] sm:$0xf0]  ;;  %v7077_v23 = vpop.f32.mrf.mxu2  ;;  %v4782_v6 = vor.u32 %v5759_v14, %v4779_v29  ;;  %v4625_v29 = vld [vmem:[#allocation12 + $0x158] sm:$0xf] }
 0x2a4   :  { %v7060_v17 = vpop.f32.mrf.mxu3  ;;  %v4747_v50 = vld [vmem:[#allocation12 + $0x270] sm:$0xf0] }
 0x2a5   :  { %3945 = vmatpush.bf16.msrb.mxu2 %v5938_v61  ;;  %3958 = vmatpush.bf16.msrb.mxu3 %v5946_v38  ;;  %v5941_v61 = vld [vmem:[#allocation16 + $0x40] sm:$0xff]  ;;  %v5711_v38 = vld [vmem:[#allocation12 + $0x114] sm:$0xf] }
 0x2a6   :  { %3033 = vmatpush.bf16.msra.mxu0 %v4686_v34  ;;  %3002 = vmatmul.bf16.vlgmr.msrb.gmra.mxu1 %v7038_v48  ;;  %v4590_v12 = vor.u32 %v5711_v38, %v4587_v2  ;;  %v5687_v34 = vld [vmem:[#allocation12 + $0x54] sm:$0xf] }
 0x2a7   :  { %3046 = vmatpush.bf16.msra.mxu1 %v4942_v37  ;;  %2989 = vmatmul.bf16.vlgmr.msrb.gmra.mxu0 %v7036_v49  ;;  %v5743_v28 = vld [vmem:[#allocation12 + $0x214] sm:$0xf] }
 0x2a8   :  { %v4718_v3 = vor.u32 %v5743_v28, %v4715_v43  ;;  %v4561_v43 = vld [vmem:[#allocation12 + $0xd8] sm:$0xf] }
 0x2a9   :  { %3946 = vmatpush.bf16.msrb.mxu2 %v5937_v1  ;;  %3959 = vmatpush.bf16.msrb.mxu3 %v5945_v0  ;;  %v7073_v0 = vld [vmem:[%s7538_s13] sm:$0xff] }
 0x2aa   :  { %3034 = vmatpush.bf16.msra.mxu0 %v4654_v20  ;;  %v3624_v7 = vsel %vm3623_vm0, %v7073_v0, -inf  ;;  %v3631_v27 = vsel %vm3623_vm0, %v7073_v0, inf }
 0x2ab   :  { %3047 = vmatpush.bf16.msra.mxu1 %v4910_v21  ;;  %v3625_v22 = vrot.slane %v3624_v7, 4  ;;  %v3632_v37 = vrot.slane %v3631_v27, 4  ;;  %v5679_v21 = vld [vmem:[#allocation12 + $0x14] sm:$0xf]  ;;  %v2914_v38 = vpop.f32.mrf.mxu2 }
 0x2ac   :  { %v2875_v1 = vpop.f32.mrf.mxu3 }
 0x2ad   :  { %3947 = vmatpush.bf16.msrb.mxu2 %v5936_v52  ;;  %3960 = vmatpush.bf16.msrb.mxu3 %v5944_v53  ;;  %v4558_v52 = vor.u32 %v5703_v19, %v4555_v31  ;;  %v4814_v53 = vor.u32 %v5767_v35, %v4811_v32  ;;  %v3626_v51 = vmax.f32 %v3624_v7, %v3625_v22  ;;  %v1468_v31 = vld [vmem:[%s7455_s11] sm:$0xff]  ;;  %v4913_v35 = vld [vmem:[#allocation12 + $0x398] sm:$0xf]  ;;  %s4097_s11 = sshll.u32 %s7469_s26, 4  ;;  %s4098_s11 = int_to_ptr.hbm [resolvable:$true] %s4097_s11 }
 0x2ae   :  { %3035 = vmatpush.bf16.msra.mxu0 %v4622_v60  ;;  %v3633_v54 = vmin.f32 %v3631_v27, %v3632_v37  ;;  %v1472_v60 = vpop.permute.xlu0 %1471  ;;  %v5796_v32 = vld [vmem:[#allocation12 + $0x3b4] sm:$0xf0] }
 0x2af   :  { %3048 = vmatpush.bf16.msra.mxu1 %v4878_v41  ;;  %v5740_v41 = vld [vmem:[#allocation12 + $0x1f4] sm:$0xf0]  ;;  %v1474_v19 = vperm.slane %v1472_v60, 0  ;;  %v4914_v14 = vor.u32 %v5796_v32, %v4913_v35 }
 0x2b0   :  { %v3634_v25 = vrot.slane %v3633_v54, 2  ;;  %v5724_v22 = vld [vmem:[#allocation12 + $0x174] sm:$0xf0] }
 0x2b1   :  { %3948 = vmatpush.bf16.msrb.mxu2 %v5935_v46  ;;  %3961 = vmatpush.bf16.msrb.mxu3 %v5943_v47  ;;  %v4491_v46 = vld [vmem:[#allocation12 + $0x70] sm:$0xf0]  ;;  %v7089_v11 = vmul.f32 %v1474_v19, %v1468_v31  ;;  %v4881_v27 = vld [vmem:[#allocation12 + $0x358] sm:$0xf] }
 0x2b2   :  { %3036 = vmatpush.bf16.msra.mxu0 %v4590_v12  ;;  %v5751_v47 = vld [vmem:[#allocation12 + $0x254] sm:$0xf]  ;;  %v4494_v55 = vor.u32 %v5687_v34, %v4491_v46  ;;  %v3635_v2 = vmin.f32 %v3633_v54, %v3634_v25  ;;  %v4690_v12 = vor.u32 %v5740_v41, %v4689_v57  ;;  %v4626_v46 = vor.u32 %v5724_v22, %v4625_v29  ;;  %v5716_v54 = vld [vmem:[#allocation12 + $0x134] sm:$0xf0] }
 0x2b3   :  { %3049 = vmatpush.bf16.msra.mxu1 %v4846_v10  ;;  %v4750_v20 = vor.u32 %v5751_v47, %v4747_v50  ;;  %v2757_v50 = vperm.slane %v7089_v11, 0  ;;  %v5708_v60 = vld [vmem:[#allocation12 + $0xf4] sm:$0xf0] }
 0x2b4   :  { %v7079_v26 = vpop.f32.mrf.mxu3  ;;  %v3636_v1 = vrot.slane %v3635_v2, 1  ;;  %v4817_v41 = vld [vmem:[#allocation12 + $0x2d8] sm:$0xf] }
 0x2b5   :  { %3949 = vmatpush.bf16.msrb.mxu2 %v5934_v24  ;;  %3962 = vmatpush.bf16.msrb.mxu3 %v5942_v58  ;;  %v4459_v24 = vld [vmem:[#allocation12 + $0x30] sm:$0xf0]  ;;  %v3627_v58 = vrot.slane %v3626_v51, 2  ;;  %v5764_v19 = vld [vmem:[#allocation12 + $0x2b4] sm:$0xf0] }
 0x2b6   :  { %3037 = vmatpush.bf16.msra.mxu0 %v4558_v52  ;;  %v4462_v40 = vor.u32 %v5679_v21, %v4459_v24  ;;  %v7086_v52 = vmin.f32 %v3635_v2, %v3636_v1  ;;  %v5756_v22 = vld [vmem:[#allocation12 + $0x274] sm:$0xf0] }
 0x2b7   :  { %3050 = vmatpush.bf16.msra.mxu1 %v4814_v53  ;;  %v3628_v39 = vmax.f32 %v3626_v51, %v3627_v58  ;;  %v4593_v51 = vld [vmem:[#allocation12 + $0x118] sm:$0xf] }
 0x2b8   :  { %v4594_v25 = vor.u32 %v5716_v54, %v4593_v51 }
 0x2b9   :  { %3950 = vmatpush.bf16.msrb.mxu2 %v5933_v33  ;;  %3963 = vmatpush.bf16.msrb.mxu3 %v5941_v61  ;;  %v4945_v33 = vld [vmem:[#allocation12 + $0x3d8] sm:$0xf]  ;;  %v3629_v44 = vrot.slane %v3628_v39, 1 }
 0x2ba   :  { %3038 = vmatpush.bf16.msra.mxu0 %v4526_v30  ;;  %v5804_v61 = vld [vmem:[#allocation12 + $0x3f4] sm:$0xf0] }
 0x2bb   :  { %3051 = vmatpush.bf16.msra.mxu1 %v4782_v6  ;;  %v4946_v10 = vor.u32 %v5804_v61, %v4945_v33  ;;  %v3630_v7 = vmax.f32 %v3628_v39, %v3629_v44  ;;  %v5788_v30 = vld [vmem:[#allocation12 + $0x374] sm:$0xf0]  ;;  %v7091_v6 = vpop.f32.mrf.mxu2 }
 0x2bc   :  { %3951 = vmatmul.bf16.vlgmr.msrb.gmra.mxu2 %v3656_v45  ;;  %3964 = vmatmul.bf16.vlgmr.msrb.gmra.mxu3 %v3657_v13  ;;  %v2927_v56 = vpop.f32.mrf.mxu3  ;;  %v4657_v45 = vld [vmem:[#allocation12 + $0x198] sm:$0xf]  ;;  %v4882_v47 = vor.u32 %v5788_v30, %v4881_v27 }
 0x2bd   :  { %v5732_v13 = vld [vmem:[#allocation12 + $0x1b4] sm:$0xf0]  ;;  %v3639_v53 = vsub.f32 %v3630_v7, %v7086_v52 }
 0x2be   :  { %3039 = vmatpush.bf16.msra.mxu0 %v4494_v55  ;;  %v4658_v63 = vor.u32 %v5732_v13, %v4657_v45  ;;  %v4849_v55 = vld [vmem:[#allocation12 + $0x318] sm:$0xf] }
 0x2bf   :  { %3052 = vmatpush.bf16.msra.mxu1 %v4750_v20  ;;  %v7095_v37 = vadd.f32 1e-05, %v3639_v53  ;;  %v5780_v20 = vld [vmem:[#allocation12 + $0x334] sm:$0xf0] }
 0x2c0   :  { %v4850_v28 = vor.u32 %v5780_v20, %v4849_v55  ;;  %v5772_v33 = vld [vmem:[#allocation12 + $0x2f4] sm:$0xf0]  ;;  %v2758_v55 = vperm.slane %v7089_v11, 1 }
 0x2c1   :  { %5993 = vrcp.f32 %v7095_v37  ;;  %v2782_v21 = vpop.f32.mrf.mxu0  ;;  %v2795_v24 = vpop.f32.mrf.mxu1  ;;  %v4529_v44 = vld [vmem:[#allocation12 + $0x98] sm:$0xf]  ;;  %v3652_v32 = vand.u32 2147483648, %v7095_v37  ;;  %vm3646_vm1 = vweird.f32 %v7095_v37 }
 0x2c2   :  { %3040 = vmatpush.bf16.msra.mxu0 %v4462_v40  ;;  %v2783_v58 = vadd.f32 %v2782_v21, %v2757_v50  ;;  %v4562_v40 = vor.u32 %v5708_v60, %v4561_v43  ;;  %v4497_v53 = vld [vmem:[#allocation12 + $0x58] sm:$0xf]  ;;  %v4691_v43 = vld [vmem:[#allocation12 + $0x1f8] sm:$0xf0] }
 0x2c3   :  { %3053 = vmatpush.bf16.msra.mxu1 %v4718_v3  ;;  %v2966_v61 = vpop.f32.mrf.mxu2  ;;  %v4818_v3 = vor.u32 %v5772_v33, %v4817_v41  ;;  %v4465_v20 = vld [vmem:[#allocation12 + $0x18] sm:$0xf]  ;;  %v5800_v60 = vld [vmem:[#allocation12 + $0x3dc] sm:$0xf] }
 0x2c4   :  { %v7093_v34 = vpop.f32.mrf.mxu3  ;;  %v2796_v56 = vadd.f32 %v2795_v24, %v2783_v58  ;;  %v5684_v21 = vld [vmem:[#allocation12 + $0x34] sm:$0xf0]  ;;  %v4947_v41 = vld [vmem:[#allocation12 + $0x3f8] sm:$0xf0] }
 0x2c5   :  { %3041 = vmatmul.bf16.vlgmr.msra.gmra.mxu0 %v7036_v49  ;;  %v4721_v58 = vld [vmem:[#allocation12 + $0x218] sm:$0xf]  ;;  %v4466_v33 = vor.u32 %v5684_v21, %v4465_v20  ;;  %v4563_v20 = vld [vmem:[#allocation12 + $0xf8] sm:$0xf0] }
 0x2c6   :  { %3085 = vmatpush.bf16.msrb.mxu0 %v4690_v12  ;;  %3054 = vmatmul.bf16.vlgmr.msra.gmra.mxu1 %v7038_v48  ;;  %v2809_v2 = vadd.f32 %v7052_v59, %v2796_v56  ;;  %v5700_v12 = vld [vmem:[#allocation12 + $0xb4] sm:$0xf0]  ;;  %v4950_v56 = vor.u32 %v5800_v60, %v4947_v41  ;;  %v5768_v21 = vld [vmem:[#allocation12 + $0x2dc] sm:$0xf] }
 0x2c7   :  { %3098 = vmatpush.bf16.msrb.mxu1 %v4946_v10  ;;  %v5994_v57 = vpop.eup %5993  ;;  %v4785_v10 = vld [vmem:[#allocation12 + $0x298] sm:$0xf]  ;;  %v4530_v59 = vor.u32 %v5700_v12, %v4529_v44  ;;  %v4659_v44 = vld [vmem:[#allocation12 + $0x1b8] sm:$0xf0] }
 0x2c8   :  { %v3642_v39 = vmul.f32 %v5994_v57, %v7095_v37  ;;  %v7104_v45 = vadd.f32 %v7054_v62, %v2809_v2  ;;  %v4786_v7 = vor.u32 %v5764_v19, %v4785_v10  ;;  %vm3647_vm2 = vweird.f32 %v5994_v57  ;;  %v4915_v12 = vld [vmem:[#allocation12 + $0x3b8] sm:$0xf0] }
 0x2c9   :  { %v2784_v31 = vpop.f32.mrf.mxu0  ;;  %v2797_v35 = vpop.f32.mrf.mxu1  ;;  %v3650_v62 = vand.u32 2147483647, %v7095_v37  ;;  %vm3648_vm3 = vmor %vm3646_vm1, %vm3647_vm2  ;;  %v5696_v60 = vld [vmem:[#allocation12 + $0x9c] sm:$0xf] }
 0x2ca   :  { %3086 = vmatpush.bf16.msrb.mxu0 %v4658_v63  ;;  %v3643_v1 = vsub.f32 1.0, %v3642_v39  ;;  %v5692_v63 = vld [vmem:[#allocation12 + $0x74] sm:$0xf0]  ;;  %v5728_v39 = vld [vmem:[#allocation12 + $0x19c] sm:$0xf] }
 0x2cb   :  { %3099 = vmatpush.bf16.msrb.mxu1 %v4914_v14  ;;  %v4753_v14 = vld [vmem:[#allocation12 + $0x258] sm:$0xf]  ;;  %v7107_v27 = vpop.f32.mrf.mxu2  ;;  %vm3651_vm4 = vcmp.eq.f32.partialorder %v3650_v62, 8.507059e+37  ;;  %v4498_v51 = vor.u32 %v5692_v63, %v4497_v53  ;;  %v4662_v19 = vor.u32 %v5728_v39, %v4659_v44  ;;  %v5720_v31 = vld [vmem:[#allocation12 + $0x15c] sm:$0xf] }
 0x2cc   :  { %v2979_v38 = vpop.f32.mrf.mxu3  ;;  %v3644_v13 = vmul.f32 %v5994_v57, %v3643_v1  ;;  %v4754_v54 = vor.u32 %v5756_v22, %v4753_v14  ;;  %v5792_v1 = vld [vmem:[#allocation12 + $0x39c] sm:$0xf] }
 0x2cd   :  { %v5752_v44 = vld [vmem:[#allocation12 + $0x25c] sm:$0xf] }
 0x2ce   :  { %3087 = vmatpush.bf16.msrb.mxu0 %v4626_v46  ;;  %v3645_v29 = vadd.f32 %v5994_v57, %v3644_v13  ;;  %v3653_v46 = vor.u32 1.1754944e-38, %v3652_v32  ;;  %v4918_v13 = vor.u32 %v5792_v1, %v4915_v12  ;;  %v4627_v32 = vld [vmem:[#allocation12 + $0x178] sm:$0xf0] }
 0x2cf   :  { %3100 = vmatpush.bf16.msrb.mxu1 %v4882_v47  ;;  %v3638_v47 = vsub.f32 %v7073_v0, %v7086_v52  ;;  %v4755_v1 = vld [vmem:[#allocation12 + $0x278] sm:$0xf0] }
 0x2d0   :  { %v3649_v50 = vsel %vm3648_vm3, %v5994_v57, %v3645_v29  ;;  %v5712_v29 = vld [vmem:[#allocation12 + $0x11c] sm:$0xf] }
 0x2d1   :  { %v3654_v24 = vsel %vm3651_vm4, %v3653_v46, %v3649_v50  ;;  %v2834_v0 = vpop.f32.mrf.mxu0  ;;  %v2847_v52 = vpop.f32.mrf.mxu1  ;;  %v5776_v46 = vld [vmem:[#allocation12 + $0x31c] sm:$0xf]  ;;  %v2759_v50 = vperm.slane %v7089_v11, 2 }
 0x2d2   :  { %3088 = vmatpush.bf16.msrb.mxu0 %v4594_v25  ;;  %v5748_v25 = vld [vmem:[#allocation12 + $0x234] sm:$0xf0]  ;;  %v3655_v37 = vmul.f32 %v3654_v24, %v3638_v47  ;;  %v2835_v57 = vadd.f32 %v2834_v0, %v2758_v55  ;;  %v4851_v47 = vld [vmem:[#allocation12 + $0x338] sm:$0xf0] }
 0x2d3   :  { %3101 = vmatpush.bf16.msrb.mxu1 %v4850_v28  ;;  %v5736_v28 = vld [vmem:[#allocation12 + $0x1dc] sm:$0xf]  ;;  %v4722_v61 = vor.u32 %v5748_v25, %v4721_v58  ;;  %v3018_v2 = vpop.f32.mrf.mxu2 }
 0x2d4   :  { %v7109_v30 = vpop.f32.mrf.mxu3  ;;  %3972 = vperm.xlu0 %5982, %v3655_v37   ;;  %v4694_v38 = vor.u32 %v5736_v28, %v4691_v43  ;;  %v5704_v55 = vld [vmem:[#allocation12 + $0xdc] sm:$0xf] }
 0x2d5   :  { %v4819_v24 = vld [vmem:[#allocation12 + $0x2f8] sm:$0xf0]  ;;  %v4566_v37 = vor.u32 %v5704_v55, %v4563_v20 }
 0x2d6   :  { %3089 = vmatpush.bf16.msrb.mxu0 %v4562_v40  ;;  %v4822_v43 = vor.u32 %v5768_v21, %v4819_v24  ;;  %v5688_v2 = vld [vmem:[#allocation12 + $0x5c] sm:$0xf] }
 0x2d7   :  { %3102 = vmatpush.bf16.msrb.mxu1 %v4818_v3  ;;  %v2848_v3 = vadd.f32 %v2847_v52, %v2835_v57  ;;  %v4531_v57 = vld [vmem:[#allocation12 + $0xb8] sm:$0xf0] }
 0x2d9   :  { %v2861_v10 = vadd.f32 %v7058_v16, %v2848_v3  ;;  %v2836_v53 = vpop.f32.mrf.mxu0  ;;  %v2849_v63 = vpop.f32.mrf.mxu1  ;;  %v4630_v16 = vor.u32 %v5720_v31, %v4627_v32  ;;  %v4499_v3 = vld [vmem:[#allocation12 + $0x78] sm:$0xf0]  ;;  %v4758_v31 = vor.u32 %v5752_v44, %v4755_v1 }
 0x2da   :  { %3090 = vmatpush.bf16.msrb.mxu0 %v4530_v59  ;;  %v5784_v59 = vld [vmem:[#allocation12 + $0x35c] sm:$0xf]  ;;  %v7136_v63 = vpop.permute.xlu0 %3192 }
 0x2db   :  { %3103 = vmatpush.bf16.msrb.mxu1 %v4786_v7  ;;  %v7118_v35 = vadd.f32 %v7060_v17, %v2861_v10  ;;  %v4883_v7 = vld [vmem:[#allocation12 + $0x378] sm:$0xf0] }
 0x2dc   :  { %v3031_v40 = vpop.f32.mrf.mxu3  ;;  %v4886_v14 = vor.u32 %v5784_v59, %v4883_v7  ;;  %v4595_v17 = vld [vmem:[#allocation12 + $0x138] sm:$0xf0] }
 0x2dd   :  { %v5680_v32 = vld [vmem:[#allocation12 + $0x1c] sm:$0xf] }
 0x2de   :  { %3091 = vmatpush.bf16.msrb.mxu0 %v4498_v51  ;;  %v4598_v51 = vor.u32 %v5712_v29, %v4595_v17  ;;  %v4467_v59 = vld [vmem:[#allocation12 + $0x38] sm:$0xf0] }
 0x2df   :  { %3104 = vmatpush.bf16.msrb.mxu1 %v4754_v54  ;;  %v7122_v22 = vpop.f32.mrf.mxu2  ;;  %v4854_v54 = vor.u32 %v5776_v46, %v4851_v47  ;;  %v5744_v7 = vld [vmem:[#allocation12 + $0x21c] sm:$0xf] }
 0x2e2   :  { %3092 = vmatpush.bf16.msrb.mxu0 %v4466_v33  ;;  %v5760_v33 = vld [vmem:[#allocation12 + $0x29c] sm:$0xf] }
 0x2e3   :  { %3105 = vmatpush.bf16.msrb.mxu1 %v4722_v61  ;;  %v2899_v25 = vpop.f32.mrf.mxu1  ;;  %v4787_v61 = vld [vmem:[#allocation12 + $0x2b8] sm:$0xf0] }
 0x2e4   :  { %v7124_v62 = vpop.f32.mrf.mxu3  ;;  %v2886_v58 = vpop.f32.mrf.mxu0  ;;  %v4790_v39 = vor.u32 %v5760_v33, %v4787_v61 }
 0x2e5   :  { %3093 = vmatmul.bf16.vlgmr.msrb.gmra.mxu0 %v7036_v49  ;;  %v2887_v28 = vadd.f32 %v2886_v58, %v2759_v50 }
 0x2e6   :  { %3137 = vmatpush.bf16.msra.mxu0 %v4694_v38  ;;  %3106 = vmatmul.bf16.vlgmr.msrb.gmra.mxu1 %v7038_v48 }
 0x2e7   :  { %3150 = vmatpush.bf16.msra.mxu1 %v4950_v56  ;;  %v3070_v41 = vpop.f32.mrf.mxu2  ;;  %v2900_v52 = vadd.f32 %v2899_v25, %v2887_v28  ;;  %v4534_v56 = vor.u32 %v5696_v60, %v4531_v57 }
 0x2e9   :  { %v2913_v38 = vadd.f32 %v7077_v23, %v2900_v52  ;;  %v4502_v23 = vor.u32 %v5688_v2, %v4499_v3 }
 0x2ea   :  { %3138 = vmatpush.bf16.msra.mxu0 %v4662_v19  ;;  %v7132_v19 = vld [vmem:[%s7456_s12] sm:$0xff]  ;;  %s4095_s12 = sshll.u32 %s6366_s17, 4  ;;  %s4096_s12 = int_to_ptr.vmem [resolvable:$true] %s4095_s12 }
 0x2eb   :  { %3151 = vmatpush.bf16.msra.mxu1 %v4918_v13  ;;  %v2926_v40 = vadd.f32 %v7079_v26, %v2913_v38  ;;  %v2901_v10 = vpop.f32.mrf.mxu1  ;;  %v3198_v13 = vperm.slane %v7132_v19, 2  ;;  %v4723_v26 = vld [vmem:[#allocation12 + $0x238] sm:$0xf0]  ;;  %v3196_v53 = vperm.slane %v7132_v19, 0  ;;  %v3197_v33 = vperm.slane %v7132_v19, 1 }
 0x2ec   :  { %v3083_v0 = vpop.f32.mrf.mxu3  ;;  %v2888_v12 = vpop.f32.mrf.mxu0  ;;  %v4726_v29 = vor.u32 %v5744_v7, %v4723_v26 }
 0x2ed   :  { %v3212_v17 = vmul.f32 %v3196_v53, %v7136_v63 }
 0x2ee   :  { %3139 = vmatpush.bf16.msra.mxu0 %v4630_v16  ;;  %v3214_v16 = vmul.f32 %v3198_v13, %v7136_v63 }
 0x2ef   :  { %3152 = vmatpush.bf16.msra.mxu1 %v4886_v14  ;;  %v4470_v14 = vor.u32 %v5680_v32, %v4467_v59 }
 0x2f0   :  { %v3230_v50 = vrot.slane %v3214_v16, 3 }
 0x2f2   :  { %3140 = vmatpush.bf16.msra.mxu0 %v4598_v51  ;;  %v3228_v51 = vrot.slane %v3212_v17, 3  ;;  %v3246_v55 = vadd.f32 %v3230_v50, %v2926_v40  ;;  %v2761_v50 = vperm.slane %v7089_v11, 4 }
 0x2f3   :  { %3153 = vmatpush.bf16.msra.mxu1 %v4854_v54  ;;  %v7144_v54 = vld [vmem:[#allocation13] sm:$0xff] }
 0x2f4   :  { %v3256_v20 = vperm.slane %v7144_v54, 2  ;;  %v3254_v21 = vperm.slane %v7144_v54, 0  ;;  %v3244_v24 = vadd.f32 %v3228_v51, %v7104_v45  ;;  %v3255_v59 = vperm.slane %v7144_v54, 1 }
 0x2f5   :  { %v3200_v51 = vperm.slane %v7132_v19, 4 }
 0x2f6   :  { %3141 = vmatpush.bf16.msra.mxu0 %v4566_v37  ;;  %v3272_v28 = vadd.f32 %v3256_v20, %v3246_v55  ;;  %v2760_v37 = vperm.slane %v7089_v11, 3 }
 0x2f7   :  { %3154 = vmatpush.bf16.msra.mxu1 %v4822_v43  ;;  %v3270_v43 = vadd.f32 %v3254_v21, %v3244_v24 }
 0x2f8   :  { %v5465_v0 = vmul.f32 -1.442695, %v3272_v28 }
 0x2fa   :  { %3142 = vmatpush.bf16.msra.mxu0 %v4534_v56  ;;  %5995 = vpow2.f32 %v5465_v0 }
 0x2fb   :  { %3155 = vmatpush.bf16.msra.mxu1 %v4790_v39  ;;  %v3213_v39 = vmul.f32 %v3197_v33, %v7136_v63 }
 0x2fd   :  { %v3229_v1 = vrot.slane %v3213_v39, 3 }
 0x2fe   :  { %3143 = vmatpush.bf16.msra.mxu0 %v4502_v23  ;;  %v3257_v23 = vperm.slane %v7144_v54, 3 }
 0x2ff   :  { %3156 = vmatpush.bf16.msra.mxu1 %v4758_v31  ;;  %v7140_v46 = vpop.f32.mrf.mxu2  ;;  %v7142_v47 = vpop.f32.mrf.mxu3  ;;  %v3245_v32 = vadd.f32 %v3229_v1, %v7118_v35  ;;  %v7195_v1 = vld [vmem:[%s7541_s15] sm:$0x3] }
 0x300   :  { %v5996_v2 = vpop.eup %5995 }
 0x301   :  { %v7158_v12 = vadd.f32 1.0, %v5996_v2  ;;  %v3271_v7 = vadd.f32 %v3255_v59, %v3245_v32  ;;  %v3396_v59 = vperm.slane %v7195_v1, 0 }
 0x302   :  { %3144 = vmatpush.bf16.msra.mxu0 %v4470_v14 }
 0x303   :  { %3157 = vmatpush.bf16.msra.mxu1 %v4726_v29  ;;  %v2951_v41 = vpop.f32.mrf.mxu1  ;;  %v5464_v17 = vmul.f32 -1.442695, %v3271_v7  ;;  %v3335_v2 = vand.u32 2147483648, %v7158_v12  ;;  %vm3329_vm7 = vweird.f32 %v7158_v12 }
 0x304   :  { %v2938_v60 = vpop.f32.mrf.mxu0 }
 0x305   :  { %3145 = vmatmul.bf16.vlgmr.msra.gmra.mxu0 %v7036_v49  ;;  %v2939_v52 = vadd.f32 %v2938_v60, %v2760_v37  ;;  %v5463_v49 = vmul.f32 -1.442695, %v3270_v43 }
 0x306   :  { %3158 = vmatmul.bf16.vlgmr.msra.gmra.mxu1 %v7038_v48  ;;  %v3199_v48 = vperm.slane %v7132_v19, 3 }
 0x307   :  { %v3122_v58 = vpop.f32.mrf.mxu2  ;;  %v3135_v25 = vpop.f32.mrf.mxu3  ;;  %v2952_v57 = vadd.f32 %v2951_v41, %v2939_v52  ;;  %5997 = vpow2.f32 %v5463_v49 }
 0x308   :  { %v3215_v61 = vmul.f32 %v3199_v48, %v7136_v63  ;;  %5999 = vrcp.f32 %v7158_v12  ;;  %v3216_v58 = vmul.f32 %v3200_v51, %v7136_v63 }
 0x309   :  { %v2965_v45 = vadd.f32 %v7091_v6, %v2952_v57  ;;  %v3258_v57 = vperm.slane %v7144_v54, 4 }
 0x30a   :  { %v3231_v3 = vrot.slane %v3215_v61, 3  ;;  %v3232_v41 = vrot.slane %v3216_v58, 3 }
 0x30b   :  { %v2953_v56 = vpop.f32.mrf.mxu1  ;;  %v2978_v40 = vadd.f32 %v7093_v34, %v2965_v45 }
 0x30c   :  { %v2940_v38 = vpop.f32.mrf.mxu0 }
 0x30d   :  { %v5998_v44 = vpop.eup %5997  ;;  %v3247_v13 = vadd.f32 %v3231_v3, %v2978_v40  ;;  %v3333_v40 = vand.u32 2147483647, %v7158_v12 }
 0x30e   :  { %v7160_v10 = vadd.f32 1.0, %v5998_v44  ;;  %v6000_v26 = vpop.eup %5999 }
 0x30f   :  { %v3273_v34 = vadd.f32 %v3257_v23, %v3247_v13  ;;  %v3325_v35 = vmul.f32 %v6000_v26, %v7158_v12  ;;  %vm3330_vm5 = vweird.f32 %v6000_v26  ;;  %v3336_v23 = vor.u32 1.1754944e-38, %v3335_v2 }
 0x310   :  { %6001 = vrcp.f32 %v7160_v10  ;;  %vm7187_vm8 = vmor %vm3329_vm7, %vm3330_vm5  ;;  %v3297_v44 = vand.u32 2147483648, %v7160_v10  ;;  %vm3291_vm9 = vweird.f32 %v7160_v10  ;;  %v3295_v13 = vand.u32 2147483647, %v7160_v10 }
 0x311   :  { %v5466_v53 = vmul.f32 -1.442695, %v3273_v34  ;;  %v3326_v25 = vsub.f32 1.0, %v3325_v35  ;;  %vm3334_vm11 = vcmp.eq.f32.partialorder %v3333_v40, 8.507059e+37 }
 0x312   :  { %vm3296_vm12 = vcmp.eq.f32.partialorder %v3295_v13, 8.507059e+37 }
 0x313   :  { %6003 = vpow2.f32 %v5466_v53  ;;  %v3327_v0 = vmul.f32 %v6000_v26, %v3326_v25  ;;  %v3298_v53 = vor.u32 1.1754944e-38, %v3297_v44  ;;  %v6034_v44 = vld [vmem:[#allocation4] sm:$0xff] }
 0x314   :  { %6005 = vpow2.f32 %v5464_v17 }
 0x315   :  { %v3328_v39 = vadd.f32 %v6000_v26, %v3327_v0  ;;  %v2762_v0 = vperm.slane %v7089_v11, 5 }
 0x316   :  { %v6002_v29 = vpop.eup %6001 }
 0x317   :  { %v3287_v21 = vmul.f32 %v6002_v29, %v7160_v10  ;;  %vm3292_vm6 = vweird.f32 %v6002_v29  ;;  %v3332_v12 = vsel %vm7187_vm8, %v6000_v26, %v3328_v39 }
 0x318   :  { %vm3293_vm10 = vmor %vm3291_vm9, %vm3292_vm6  ;;  %vm3413_vm6 = vcmask 1040384  }
 0x319   :  { %v3288_v37 = vsub.f32 1.0, %v3287_v21  ;;  %v6004_v43 = vpop.eup %6003 }
 0x31a   :  { %v6006_v52 = vpop.eup %6005  ;;  %v7179_v48 = vadd.f32 1.0, %v6004_v43 }
 0x31b   :  { %v3289_v33 = vmul.f32 %v6002_v29, %v3288_v37  ;;  %v7181_v56 = vadd.f32 1.0, %v6006_v52  ;;  %v3201_v52 = vperm.slane %v7132_v19, 5 }
 0x31c   :  { %6007 = vrcp.f32 %v7179_v48  ;;  %vm3344_vm15 = vweird.f32 %v7179_v48 }
 0x31d   :  { %v3217_v40 = vmul.f32 %v3201_v52, %v7136_v63  ;;  %vm3306_vm2 = vweird.f32 %v7181_v56 }
 0x31f   :  { %v7163_v6 = vpop.f32.mrf.mxu2  ;;  %v7165_v31 = vpop.f32.mrf.mxu3 }
 0x323   :  { %v3003_v20 = vpop.f32.mrf.mxu1 }
 0x324   :  { %v2990_v55 = vpop.f32.mrf.mxu0 }
 0x325   :  { %v2991_v24 = vadd.f32 %v2990_v55, %v2761_v50 }
 0x327   :  { %v3174_v16 = vpop.f32.mrf.mxu2  ;;  %v3187_v14 = vpop.f32.mrf.mxu3  ;;  %v3004_v28 = vadd.f32 %v3003_v20, %v2991_v24  ;;  %v6033_v20 = vld [vmem:[#allocation7] sm:$0xff] }
 0x328   :  { %v3337_v16 = vsel %vm3334_vm11, %v3336_v23, %v3332_v12  ;;  %v7207_v14 = vpop.eup %6007  ;;  %v3427_v21 = vperm.slane %v6033_v20, 0  ;;  %v3476_v24 = vperm.slane %v6033_v20, 1  ;;  %v3428_v37 = vperm.slane %v6033_v20, 4 }
 0x329   :  { %v3017_v60 = vadd.f32 %v7107_v27, %v3004_v28  ;;  %v3400_v26 = vmul.f32 %v3396_v59, %v3337_v16  ;;  %v3526_v28 = vperm.slane %v6033_v20, 2  ;;  %v3477_v43 = vperm.slane %v6033_v20, 5 }
 0x32a   :  { %vm3345_vm13 = vweird.f32 %v7207_v14 }
 0x32b   :  { %v3030_v49 = vadd.f32 %v7109_v30, %v3017_v60  ;;  %v3005_v61 = vpop.f32.mrf.mxu1  ;;  %v3290_v30 = vadd.f32 %v6002_v29, %v3289_v33  ;;  %v3542_v33 = vperm.slane %v3526_v28, 2  ;;  %vm7236_vm1 = vmor %vm3344_vm15, %vm3345_vm13 }
 0x32c   :  { %v2992_v45 = vpop.f32.mrf.mxu0  ;;  %v3527_v61 = vperm.slane %v6033_v20, 6  ;;  %v3310_v20 = vand.u32 2147483647, %v7181_v56 }
 0x32d   :  { %v3248_v38 = vadd.f32 %v3232_v41, %v3030_v49  ;;  %v3294_v32 = vsel %vm3293_vm10, %v6002_v29, %v3290_v30  ;;  %v3340_v29 = vmul.f32 %v7207_v14, %v7179_v48  ;;  %v3443_v49 = vperm.slane %v3427_v21, 0 }
 0x32e   :  { %v3299_v10 = vsel %vm3296_vm12, %v3298_v53, %v3294_v32  ;;  %v3444_v45 = vperm.slane %v3428_v37, 0  ;;  %v7222_v23 = vsub.f32 %v6034_v44, %v3542_v33  ;;  %v6035_v32 = vld [vmem:[#allocation4 + $0x8] sm:$0xff]  ;;  %v3543_v53 = vperm.slane %v3527_v61, 2 }
 0x32f   :  { %v3274_v27 = vadd.f32 %v3258_v57, %v3248_v38  ;;  %v3341_v60 = vsub.f32 1.0, %v3340_v29  ;;  %v3492_v57 = vperm.slane %v3476_v24, 1  ;;  %v3493_v38 = vperm.slane %v3477_v43, 1 }
 0x330   :  { %v3451_v13 = vsub.f32 %v6034_v44, %v3443_v49  ;;  %v3452_v59 = vsub.f32 %v6035_v32, %v3444_v45  ;;  %v3233_v29 = vrot.slane %v3217_v40, 3  ;;  %v3312_v21 = vand.u32 2147483648, %v7181_v56  ;;  %v5956_v49 = vld [vmem:[#allocation15 + $0x38] sm:$0xff]  ;;  %v5955_v40 = vld [vmem:[#allocation15 + $0x30] sm:$0xff] }
 0x331   :  { %6009 = vtanh.f32 %v3274_v27  ;;  %v3342_v39 = vmul.f32 %v7207_v14, %v3341_v60  ;;  %v3500_v12 = vsub.f32 %v6034_v44, %v3492_v57  ;;  %v3348_v24 = vand.u32 2147483647, %v7179_v48  ;;  %3820 = vmatpush.bf16.msrb.mxu0 %v5956_v49 }
 0x332   :  { %6011 = vrcp.f32 %v7181_v56  ;;  %v7243_v37 = vsub.f32 %v6035_v32, %v3543_v53  ;;  %v3576_v43 = vperm.slane %v6926_v5, 3  ;;  %v3577_v60 = vperm.slane %v6931_v9, 3  ;;  %v7259_v9 = vld [vmem:[#allocation7 + $0x8] sm:$0xff] }
 0x333   :  { %v3429_v57 = vperm.slane %v7259_v9, 0  ;;  %vm3311_vm4 = vcmp.eq.f32.partialorder %v3310_v20, 8.507059e+37  ;;  %v3313_v33 = vor.u32 1.1754944e-38, %v3312_v21  ;;  %vm3349_vm5 = vcmp.eq.f32.partialorder %v3348_v24, 8.507059e+37 }
 0x334   :  { %v3397_v45 = vperm.slane %v7195_v1, 1  ;;  %v3202_v21 = vperm.slane %v7132_v19, 6 }
 0x335   :  { %3821 = vmatpush.bf16.msrb.mxu0 %v5955_v40 }
 0x337   :  { %v6010_v17 = vpop.eup %6009 }
 0x338   :  { %v7209_v50 = vpop.eup %6011  ;;  %v3402_v51 = vmul.f32 %v6010_v17, %v3299_v10  ;;  %v3501_v17 = vsub.f32 %v6035_v32, %v3493_v38  ;;  %v3343_v10 = vadd.f32 %v7207_v14, %v3342_v39  ;;  %v3430_v38 = vperm.slane %v7259_v9, 4 }
 0x339   :  { %v3302_v55 = vmul.f32 %v7209_v50, %v7181_v56  ;;  %vm3307_vm14 = vweird.f32 %v7209_v50  ;;  %v3445_v39 = vperm.slane %v3429_v57, 0 }
 0x33a   :  { %v7213_v35 = vadd.f32 %v3402_v51, %v3400_v26  ;;  %v3350_v26 = vand.u32 2147483648, %v7179_v48  ;;  %vm7249_vm3 = vmor %vm3306_vm2, %vm3307_vm14  ;;  %v3446_v53 = vperm.slane %v3430_v38, 0 }
 0x33b   :  { %v3303_v41 = vsub.f32 1.0, %v3302_v55 }
 0x33c   :  { %v3351_v52 = vor.u32 1.1754944e-38, %v3350_v26  ;;  %v3459_v26 = vmul.f32 %v3451_v13, %v3451_v13  ;;  %v7279_v13 = vld [vmem:[#allocation7 + $0x18] sm:$0xff] }
 0x33d   :  { %v3304_v3 = vmul.f32 %v7209_v50, %v3303_v41  ;;  %v3434_v49 = vperm.slane %v7279_v13, 4 }
 0x33f   :  { %v7203_v34 = vpop.f32.mrf.mxu2  ;;  %v7205_v7 = vpop.f32.mrf.mxu3  ;;  %v3305_v55 = vadd.f32 %v7209_v50, %v3304_v3  ;;  %v7266_v3 = vld [vmem:[#allocation7 + $0x10] sm:$0xff] }
 0x341   :  { %v3309_v5 = vsel %vm7249_vm3, %v7209_v50, %v3305_v55  ;;  %v3585_v50 = vsub.f32 %v6035_v32, %v3577_v60  ;;  %v7282_v60 = vld [vmem:[#allocation4 + $0x20] sm:$0xff] }
 0x342   :  { %v3042_v2 = vpop.f32.mrf.mxu0 }
 0x343   :  { %v3055_v27 = vpop.f32.mrf.mxu1  ;;  %v3043_v30 = vadd.f32 %v3042_v2, %v2762_v0  ;;  %v7264_v2 = vmul.f32 %v3501_v17, %v3501_v17  ;;  %v3528_v17 = vperm.slane %v7259_v9, 2 }
 0x345   :  { %v3056_v16 = vadd.f32 %v3055_v27, %v3043_v30  ;;  %v3584_v27 = vsub.f32 %v6034_v44, %v3576_v43  ;;  %v3314_v30 = vsel %vm3311_vm4, %v3313_v33, %v3309_v5  ;;  %v3432_v44 = vperm.slane %v7266_v3, 4  ;;  %v7288_v33 = vld [vmem:[#allocation4 + $0x28] sm:$0xff] }
 0x347   :  { %v3954_v58 = vpop.f32.mrf.mxu2  ;;  %v3967_v25 = vpop.f32.mrf.mxu3  ;;  %v3069_v51 = vadd.f32 %v7122_v22, %v3056_v16  ;;  %v3259_v22 = vperm.slane %v7144_v54, 5  ;;  %v7269_v16 = vld [vmem:[#allocation4 + $0x10] sm:$0xff]  ;;  %v3448_v43 = vperm.slane %v3432_v44, 0 }
 0x348   :  { %v7234_v58 = vmul.f32 %v3500_v12, %v3500_v12  ;;  %v3431_v12 = vperm.slane %v7266_v3, 0  ;;  %v3453_v1 = vsub.f32 %v7269_v16, %v3445_v39  ;;  %v3529_v25 = vperm.slane %v7259_v9, 6 }
 0x349   :  { %v3082_v28 = vadd.f32 %v7124_v62, %v3069_v51  ;;  %v3347_v62 = vsel %vm7236_vm1, %v7207_v14, %v3343_v10  ;;  %v3460_v51 = vmul.f32 %v3452_v59, %v3452_v59  ;;  %v3433_v59 = vperm.slane %v7279_v13, 0 }
 0x34a   :  { %v3044_v41 = vpop.f32.mrf.mxu0  ;;  %v3352_v14 = vsel %vm3349_vm5, %v3351_v52, %v3347_v62  ;;  %v3447_v32 = vperm.slane %v3431_v12, 0  ;;  %v3461_v20 = vmul.f32 %v3453_v1, %v3453_v1  ;;  %v3545_v52 = vperm.slane %v3529_v25, 2  ;;  %v5953_v12 = vld [vmem:[#allocation15 + $0x20] sm:$0xff] }
 0x34b   :  { %v3057_v0 = vpop.f32.mrf.mxu1  ;;  %v3249_v56 = vadd.f32 %v3233_v29, %v3082_v28  ;;  %v3401_v10 = vmul.f32 %v3397_v45, %v3352_v14  ;;  %v7274_v29 = vld [vmem:[#allocation4 + $0x18] sm:$0xff]  ;;  %v3467_v24 = vadd.f32 %v3460_v51, %v3459_v26  ;;  %v3544_v28 = vperm.slane %v3528_v17, 2  ;;  %v7292_v1 = vld [vmem:[#allocation4 + $0x30] sm:$0xff] }
 0x34c   :  { %v3454_v55 = vsub.f32 %v7274_v29, %v3446_v53  ;;  %v3455_v48 = vsub.f32 %v7282_v60, %v3447_v32  ;;  %v3530_v0 = vperm.slane %v7266_v3, 2  ;;  %v3449_v57 = vperm.slane %v3433_v59, 0 }
 0x34d   :  { %v3275_v61 = vadd.f32 %v3259_v22, %v3249_v56  ;;  %v5954_v22 = vld [vmem:[#allocation15 + $0x28] sm:$0xff]  ;;  %v3468_v41 = vadd.f32 %v3467_v24, %v3461_v20  ;;  %v3552_v56 = vsub.f32 %v7269_v16, %v3544_v28  ;;  %v3456_v45 = vsub.f32 %v7288_v33, %v3448_v43 }
 0x34e   :  { %v3462_v62 = vmul.f32 %v3454_v55, %v3454_v55  ;;  %3822 = vmatpush.bf16.msrb.mxu0 %v5954_v22  ;;  %v3531_v39 = vperm.slane %v7266_v3, 6  ;;  %v3546_v40 = vperm.slane %v3530_v0, 2  ;;  %v3450_v53 = vperm.slane %v3434_v49, 0 }
 0x34f   :  { %6013 = vtanh.f32 %v3275_v61  ;;  %v3463_v61 = vmul.f32 %v3455_v48, %v3455_v48  ;;  %v3457_v26 = vsub.f32 %v7292_v1, %v3449_v57  ;;  %v3464_v51 = vmul.f32 %v3456_v45, %v3456_v45 }
 0x350   :  { %v3469_v38 = vadd.f32 %v3468_v41, %v3462_v62  ;;  %v3532_v17 = vperm.slane %v7279_v13, 2  ;;  %v3547_v55 = vperm.slane %v3531_v39, 2  ;;  %v3553_v20 = vsub.f32 %v7274_v29, %v3545_v52  ;;  %v5952_v41 = vld [vmem:[#allocation15 + $0x18] sm:$0xff] }
 0x351   :  { %v3465_v25 = vmul.f32 %v3457_v26, %v3457_v26  ;;  %v3533_v28 = vperm.slane %v7279_v13, 6  ;;  %v7303_v59 = vmul.f32 %v3584_v27, %v3584_v27  ;;  %v7305_v43 = vmul.f32 %v3585_v50, %v3585_v50 }
 0x352   :  { %v3470_v32 = vadd.f32 %v3469_v38, %v3463_v61  ;;  %3823 = vmatpush.bf16.msrb.mxu0 %v5953_v12  ;;  %v3548_v22 = vperm.slane %v3532_v17, 2  ;;  %v2763_v62 = vperm.slane %v7089_v11, 6  ;;  %v3554_v57 = vsub.f32 %v7282_v60, %v3546_v40 }
 0x353   :  { %v3549_v52 = vperm.slane %v3533_v28, 2  ;;  %v3559_v27 = vmul.f32 %v7243_v37, %v7243_v37  ;;  %v3560_v45 = vmul.f32 %v3552_v56, %v3552_v56  ;;  %v3218_v50 = vmul.f32 %v3202_v21, %v7136_v63 }
 0x354   :  { %v3471_v48 = vadd.f32 %v3470_v32, %v3464_v51  ;;  %v3555_v61 = vsub.f32 %v7288_v33, %v3547_v55  ;;  %v3561_v38 = vmul.f32 %v3553_v20, %v3553_v20  ;;  %v5951_v51 = vld [vmem:[#allocation15 + $0x10] sm:$0xff]  ;;  %v3480_v56 = vperm.slane %v7266_v3, 1 }
 0x355   :  { %v6014_v5 = vpop.eup %6013  ;;  %v3481_v21 = vperm.slane %v7266_v3, 5  ;;  %v3482_v17 = vperm.slane %v7279_v13, 1  ;;  %v3562_v55 = vmul.f32 %v3554_v57, %v3554_v57  ;;  %v3579_v3 = vperm.slane %v6965_v18, 3 }
 0x356   :  { %v3403_v14 = vmul.f32 %v6014_v5, %v3314_v30  ;;  %v7299_v30 = vld [vmem:[#allocation4 + $0x38] sm:$0xff]  ;;  %v3558_v5 = vmul.f32 %v7222_v23, %v7222_v23  ;;  %v3472_v49 = vadd.f32 %v3471_v48, %v3465_v25  ;;  %3824 = vmatpush.bf16.msrb.mxu0 %v5952_v41  ;;  %v3479_v23 = vperm.slane %v7259_v9, 5 }
 0x357   :  { %v3458_v24 = vsub.f32 %v7299_v30, %v3450_v53  ;;  %v3478_v53 = vperm.slane %v7259_v9, 1  ;;  %v3557_v37 = vsub.f32 %v7299_v30, %v3549_v52  ;;  %v3563_v25 = vmul.f32 %v3555_v61, %v3555_v61 }
 0x358   :  { %v7296_v44 = vadd.f32 %v3403_v14, %v3401_v10  ;;  %v3578_v10 = vperm.slane %v6963_v15, 3  ;;  %v3556_v14 = vsub.f32 %v7292_v1, %v3548_v22  ;;  %v3566_v12 = vadd.f32 %v3559_v27, %v3558_v5  ;;  %v5950_v5 = vld [vmem:[#allocation15 + $0x8] sm:$0xff] }
 0x359   :  { %v3466_v0 = vmul.f32 %v3458_v24, %v3458_v24  ;;  %v3494_v24 = vperm.slane %v3478_v53, 1  ;;  %v3483_v9 = vperm.slane %v7279_v13, 5  ;;  %v3495_v28 = vperm.slane %v3479_v23, 1 }
 0x35a   :  { %v3567_v20 = vadd.f32 %v3566_v12, %v3560_v45  ;;  %3825 = vmatpush.bf16.msrb.mxu0 %v5951_v51  ;;  %v3496_v22 = vperm.slane %v3480_v56, 1  ;;  %v3416_v57 = vlaneseq  ;;  %v3234_v45 = vrot.slane %v3218_v50, 3 }
 0x35b   :  { %v3473_v39 = vadd.f32 %v3472_v49, %v3466_v0  ;;  %v3497_v0 = vperm.slane %v3481_v21, 1  ;;  %v3502_v52 = vsub.f32 %v7269_v16, %v3494_v24  ;;  %v3498_v49 = vperm.slane %v3482_v17, 1  ;;  %v5949_v21 = vld [vmem:[#allocation15] sm:$0xff] }
 0x35c   :  { %v3568_v41 = vadd.f32 %v3567_v20, %v3561_v38  ;;  %v3564_v61 = vmul.f32 %v3556_v14, %v3556_v14  ;;  %v3260_v13 = vperm.slane %v7144_v54, 6  ;;  %v3565_v12 = vmul.f32 %v3557_v37, %v3557_v37 }
 0x35d   :  { %3474 = vadd.xlane.f32.xlu1 %v3473_v39  ;;  %v3504_v38 = vsub.f32 %v7282_v60, %v3496_v22  ;;  %v3510_v53 = vmul.f32 %v3502_v52, %v3502_v52  ;;  %v3516_v14 = vadd.f32 %v7264_v2, %v7234_v58  ;;  %v3580_v37 = vperm.slane %v6943_v36, 3 }
 0x35e   :  { %v3569_v39 = vadd.f32 %v3568_v41, %v3562_v55  ;;  %3826 = vmatpush.bf16.msrb.mxu0 %v5950_v5  ;;  %v5964_v55 = vld [vmem:[#allocation15 + $0x78] sm:$0xff]  ;;  %v3586_v20 = vsub.f32 %v7269_v16, %v3578_v10  ;;  %vm7341_vm7 = vcmp.lt.s32.totalorder %v3416_v57, 256  ;;  %v3600_v5 = vadd.f32 %v7305_v43, %v7303_v59 }
 0x35f   :  { %v3512_v24 = vmul.f32 %v3504_v38, %v3504_v38  ;;  %3833 = vmatpush.bf16.msrb.mxu1 %v5964_v55  ;;  %v3588_v16 = vsub.f32 %v7282_v60, %v3580_v37 }
 0x360   :  { %v3570_v23 = vadd.f32 %v3569_v39, %v3563_v25  ;;  %v3517_v25 = vadd.f32 %v3516_v14, %v3510_v53  ;;  %v3594_v10 = vmul.f32 %v3586_v20, %v3586_v20  ;;  %v5962_v39 = vld [vmem:[#allocation15 + $0x68] sm:$0xff] }
 0x361   :  { %v5958_v20 = vld [vmem:[#allocation15 + $0x48] sm:$0xff] }
 0x362   :  { %v3094_v26 = vpop.f32.mrf.mxu0  ;;  %3827 = vmatpush.bf16.msrb.mxu0 %v5949_v21 }
 0x363   :  { %v3107_v40 = vpop.f32.mrf.mxu1  ;;  %v3095_v32 = vadd.f32 %v3094_v26, %v2763_v62  ;;  %v3503_v62 = vsub.f32 %v7274_v29, %v3495_v28  ;;  %v3499_v26 = vperm.slane %v3483_v9, 1  ;;  %v3587_v9 = vsub.f32 %v7274_v29, %v3579_v3  ;;  %v4029_v28 = vld [vmem:[%s7466_s22 + $0x60] sm:$0xff] }
 0x364   :  { %v3583_v29 = vperm.slane %v6981_v8, 3 }
 0x365   :  { %v3108_v48 = vadd.f32 %v3107_v40, %v3095_v32  ;;  %v3505_v40 = vsub.f32 %v7288_v33, %v3497_v0  ;;  %v3511_v50 = vmul.f32 %v3503_v62, %v3503_v62  ;;  %v3571_v32 = vadd.f32 %v3570_v23, %v3564_v61 }
 0x366   :  { %v3507_v2 = vsub.f32 %v7299_v30, %v3499_v26  ;;  %v3595_v3 = vmul.f32 %v3587_v9, %v3587_v9  ;;  %v3591_v59 = vsub.f32 %v7299_v30, %v3583_v29  ;;  %v5961_v26 = vld [vmem:[#allocation15 + $0x60] sm:$0xff]  ;;  %v2764_v30 = vperm.slane %v7089_v11, 7 }
 0x367   :  { %v3121_v27 = vadd.f32 %v7140_v46, %v3108_v48  ;;  %v3506_v46 = vsub.f32 %v7292_v1, %v3498_v49  ;;  %v3572_v36 = vadd.f32 %v3571_v32, %v3565_v12  ;;  %v3513_v22 = vmul.f32 %v3505_v40, %v3505_v40  ;;  %v5963_v49 = vld [vmem:[#allocation15 + $0x70] sm:$0xff] }
 0x368   :  { %v3518_v15 = vadd.f32 %v3517_v25, %v3511_v50  ;;  %v3515_v62 = vmul.f32 %v3507_v2, %v3507_v2  ;;  %3834 = vmatpush.bf16.msrb.mxu1 %v5963_v49  ;;  %v3261_v2 = vperm.slane %v7144_v54, 7  ;;  %v6045_v54 = vld [vmem:[%s7538_s13] sm:$0xff] }
 0x369   :  { %v3134_v18 = vadd.f32 %v7142_v47, %v3121_v27  ;;  %v3581_v47 = vperm.slane %v6948_v42, 3  ;;  %v3582_v42 = vperm.slane %v6979_v4, 3  ;;  %3573 = vadd.xlane.f32.xlu2 %v3572_v36  ;;  %v3514_v41 = vmul.f32 %v3506_v46, %v3506_v46 }
 0x36a   :  { %v3096_v51 = vpop.f32.mrf.mxu0  ;;  %v3519_v52 = vadd.f32 %v3518_v15, %v3512_v24  ;;  %v3423_v4 = vrot.slane %v7296_v44, 7  ;;  %v3596_v27 = vmul.f32 %v3588_v16, %v3588_v16  ;;  %v3203_v46 = vperm.slane %v7132_v19, 7 }
 0x36b   :  { %v3109_v56 = vpop.f32.mrf.mxu1  ;;  %v3250_v17 = vadd.f32 %v3234_v45, %v3134_v18  ;;  %v3589_v0 = vsub.f32 %v7288_v33, %v3581_v47  ;;  %v3590_v60 = vsub.f32 %v7292_v1, %v3582_v42  ;;  %v3601_v45 = vadd.f32 %v3600_v5, %v3594_v10  ;;  %v5957_v42 = vld [vmem:[#allocation15 + $0x40] sm:$0xff] }
 0x36c   :  { %v3520_v57 = vadd.f32 %v3519_v52, %v3513_v22  ;;  %v3424_v8 = vsel %vm3413_vm6, %v7213_v35, %v3423_v4  ;;  %3835 = vmatpush.bf16.msrb.mxu1 %v5962_v39  ;;  %v3599_v18 = vmul.f32 %v3591_v59, %v3591_v59  ;;  %v5960_v56 = vld [vmem:[#allocation15 + $0x58] sm:$0xff]  ;;  %v3219_v47 = vmul.f32 %v3203_v46, %v7136_v63  ;;  %v5986_v52 = vld [vmem:[#allocation2] ss:$0 sm:$0xff] }
 0x36d   :  { %v3276_v58 = vadd.f32 %v3260_v13, %v3250_v17  ;;  %3426 = vst.msk [vmem:[#allocation22] sm:$0x3] %vm7341_vm7, %v3424_v8  ;;  %v3597_v43 = vmul.f32 %v3589_v0, %v3589_v0  ;;  %v3602_v61 = vadd.f32 %v3601_v45, %v3595_v3  ;;  %v3598_v12 = vmul.f32 %v3590_v60, %v3590_v60  ;;  %v5959_v17 = vld [vmem:[#allocation15 + $0x50] sm:$0xff] }
 0x36e   :  { %v3521_v33 = vadd.f32 %v3520_v57, %v3514_v41  ;;  %v3235_v36 = vrot.slane %v3219_v47, 3  ;;  %v3999_v3 = vsub.f32 %v6045_v54, %v5986_v52  ;;  %v4022_v47 = vld [vmem:[%s7466_s22 + $0x28] sm:$0xff]  ;;  %4100 = dma.vmem_to_hbm [thread:$0]  %s4096_s12, 32, %s4098_s11, [#allocation23]  }
 0x36f   :  { %v5467_v48 = vmul.f32 -1.442695, %v3276_v58  ;;  %v3603_v38 = vadd.f32 %v3602_v61, %v3596_v27 }
 0x370   :  { %v3522_v13 = vadd.f32 %v3521_v33, %v3515_v62  ;;  %3836 = vmatpush.bf16.msrb.mxu1 %v5961_v26 }
 0x371   :  { %6015 = vpow2.f32 %v5467_v48  ;;  %v3604_v23 = vadd.f32 %v3603_v38, %v3597_v43 }
 0x372   :  { %3523 = vadd.xlane.f32.xlu1 %v3522_v13 }
 0x373   :  { %v3605_v40 = vadd.f32 %v3604_v23, %v3598_v12  ;;  %v4028_v23 = vld [vmem:[%s7466_s22 + $0x58] sm:$0xff] }
 0x374   :  { %3837 = vmatpush.bf16.msrb.mxu1 %v5960_v56 }
 0x375   :  { %v3606_v51 = vadd.f32 %v3605_v40, %v3599_v18  ;;  %v4030_v18 = vld [vmem:[%s7466_s22 + $0x68] sm:$0xff] }
 0x377   :  { %v6016_v1 = vpop.eup %6015  ;;  %3607 = vadd.xlane.f32.xlu2 %v3606_v51 }
 0x378   :  { %v3362_v53 = vadd.f32 1.0, %v6016_v1  ;;  %3838 = vmatpush.bf16.msrb.mxu1 %v5959_v17  ;;  %v4032_v1 = vld [vmem:[%s7466_s22 + $0x78] sm:$0xff] }
 0x379   :  { %4037 = vmatpush.msra.mxu0 %v4032_v1  ;;  %v4024_v17 = vld [vmem:[%s7466_s22 + $0x38] sm:$0xff] }
 0x37a   :  { %6017 = vrcp.f32 %v3362_v53  ;;  %v3375_v25 = vand.u32 2147483648, %v3362_v53  ;;  %v3373_v9 = vand.u32 2147483647, %v3362_v53  ;;  %vm3369_vm9 = vweird.f32 %v3362_v53 }
 0x37b   :  { %6019 = vtanh.f32 %v7213_v35 }
 0x37c   :  { %3839 = vmatpush.bf16.msrb.mxu1 %v5958_v20  ;;  %v3376_v35 = vor.u32 1.1754944e-38, %v3375_v25  ;;  %vm3374_vm11 = vcmp.eq.f32.partialorder %v3373_v9, 8.507059e+37  ;;  %v4020_v25 = vld [vmem:[%s7466_s22 + $0x18] sm:$0xff] }
 0x380   :  { %v6018_v21 = vpop.eup %6017  ;;  %3840 = vmatpush.bf16.msrb.mxu1 %v5957_v42 }
 0x381   :  { %v3365_v32 = vmul.f32 %v6018_v21, %v3362_v53  ;;  %vm3370_vm8 = vweird.f32 %v6018_v21  ;;  %v4031_v53 = vld [vmem:[%s7466_s22 + $0x70] sm:$0xff] }
 0x382   :  { %v3146_v50 = vpop.f32.mrf.mxu0  ;;  %vm3371_vm10 = vmor %vm3369_vm9, %vm3370_vm8  ;;  %4038 = vmatpush.msra.mxu0 %v4031_v53 }
 0x383   :  { %v3159_v14 = vpop.f32.mrf.mxu1  ;;  %v3147_v37 = vadd.f32 %v3146_v50, %v2764_v30  ;;  %v3366_v24 = vsub.f32 1.0, %v3365_v32  ;;  %v4027_v50 = vld [vmem:[%s7466_s22 + $0x50] sm:$0xff] }
 0x384   :  { %4039 = vmatpush.msra.mxu0 %v4030_v18  ;;  %v4023_v32 = vld [vmem:[%s7466_s22 + $0x30] sm:$0xff] }
 0x385   :  { %v3160_v55 = vadd.f32 %v3159_v14, %v3147_v37  ;;  %v3367_v19 = vmul.f32 %v6018_v21, %v3366_v24  ;;  %v4026_v14 = vld [vmem:[%s7466_s22 + $0x48] sm:$0xff]  ;;  %v4025_v37 = vld [vmem:[%s7466_s22 + $0x40] sm:$0xff] }
 0x386   :  { %4040 = vmatpush.msra.mxu0 %v4029_v28  ;;  %v4021_v24 = vld [vmem:[%s7466_s22 + $0x20] sm:$0xff] }
 0x387   :  { %v3173_v11 = vadd.f32 %v7163_v6, %v3160_v55  ;;  %v3368_v15 = vadd.f32 %v6018_v21, %v3367_v19  ;;  %v6020_v6 = vpop.eup %6019  ;;  %v4019_v19 = vld [vmem:[%s7466_s22 + $0x10] sm:$0xff] }
 0x388   :  { %4041 = vmatpush.msra.mxu0 %v4028_v23 }
 0x389   :  { %v3186_v58 = vadd.f32 %v7165_v31, %v3173_v11  ;;  %v3372_v10 = vsel %vm3371_vm10, %v6018_v21, %v3368_v15 }
 0x38a   :  { %v3148_v22 = vpop.f32.mrf.mxu0  ;;  %v3377_v41 = vsel %vm3374_vm11, %v3376_v35, %v3372_v10  ;;  %4042 = vmatpush.msra.mxu0 %v4027_v50  ;;  %v5987_v35 = vld [vmem:[%s7460_s16] ss:$0 sm:$0xff]  ;;  %s6365_s16 = smov [#allocation21]  }
 0x38b   :  { %v3161_v63 = vpop.f32.mrf.mxu1  ;;  %v3251_v16 = vadd.f32 %v3235_v36, %v3186_v58  ;;  %v3408_v29 = vmul.f32 %v6020_v6, %v3377_v41  ;;  %3983 = vperm.xlu1 %5983, %v6045_v54   ;;  %v4018_v58 = vld [vmem:[%s7466_s22 + $0x8] sm:$0xff]  ;;  %v4017_v36 = vld [vmem:[%s7466_s22] sm:$0xff] }
 0x38c   :  { %4043 = vmatpush.msra.mxu0 %v4026_v14  ;;  %v5988_v6 = vld [vmem:[%s7462_s18] ss:$0 sm:$0xff]  ;;  %s4084_s18 = sshll.u32 %s6365_s16, 4  ;;  %s4085_s18 = int_to_ptr.vmem [resolvable:$true] %s4084_s18 }
 0x38d   :  { %v3277_v48 = vadd.f32 %v3261_v2, %v3251_v16  ;;  %v3690_v0 = vpack.c.bf16 %v3408_v29, %v3408_v29 }
 0x38e   :  { %4044 = vmatpush.msra.mxu0 %v4025_v37 }
 0x38f   :  { %v5468_v31 = vmul.f32 -1.442695, %v3277_v48  ;;  %3828 = vmatmul.bf16.vlgmr.msrb.gmra.mxu0 %v3690_v0  ;;  %4003 = vperm.xlu2 %5984, %v3999_v3   ;;  %v3973_v48 = vpop.permute.xlu0 %3972 }
 0x390   :  { %4045 = vmatpush.msra.mxu0 %v4024_v17  ;;  %v3978_v52 = vmul.f32 %v5987_v35, %v3973_v48 }
 0x391   :  { %6021 = vpow2.f32 %v5468_v31 }
 0x392   :  { %4046 = vmatpush.msra.mxu0 %v4023_v32 }
 0x394   :  { %4047 = vmatpush.msra.mxu0 %v4022_v47 }
 0x396   :  { %4048 = vmatpush.msra.mxu0 %v4021_v24 }
 0x397   :  { %v6022_v5 = vpop.eup %6021 }
 0x398   :  { %v3363_v49 = vadd.f32 1.0, %v6022_v5  ;;  %4049 = vmatpush.msra.mxu0 %v4020_v25  ;;  %v5989_v5 = vld [vmem:[%s7463_s19] ss:$0 sm:$0xff]  ;;  %s4086_s19 = sshll.u32 %s7468_s25, 4  ;;  %s4087_s19 = int_to_ptr.hbm [resolvable:$true] %s4086_s19 }
 0x39a   :  { %6023 = vrcp.f32 %v3363_v49  ;;  %v3390_v57 = vand.u32 2147483648, %v3363_v49  ;;  %v3388_v45 = vand.u32 2147483647, %v3363_v49  ;;  %vm3384_vm13 = vweird.f32 %v3363_v49  ;;  %4050 = vmatpush.msra.mxu0 %v4019_v19 }
 0x39b   :  { %6025 = vtanh.f32 %v7296_v44 }
 0x39c   :  { %v3391_v33 = vor.u32 1.1754944e-38, %v3390_v57  ;;  %vm3389_vm15 = vcmp.eq.f32.partialorder %v3388_v45, 8.507059e+37  ;;  %4051 = vmatpush.msra.mxu0 %v4018_v58 }
 0x39e   :  { %4052 = vmatpush.msra.mxu0 %v4017_v36 }
 0x3a0   :  { %v6024_v4 = vpop.eup %6023 }
 0x3a1   :  { %v3380_v62 = vmul.f32 %v6024_v4, %v3363_v49  ;;  %vm3385_vm12 = vweird.f32 %v6024_v4  ;;  %v6026_v43 = vpop.eup %6025  ;;  %v5990_v49 = vld [vmem:[#allocation18] ss:$0 sm:$0xff] }
 0x3a2   :  { %vm3386_vm14 = vmor %vm3384_vm13, %vm3385_vm12 }
 0x3a3   :  { %v3381_v60 = vsub.f32 1.0, %v3380_v62 }
 0x3a5   :  { %v3382_v27 = vmul.f32 %v6024_v4, %v3381_v60 }
 0x3a7   :  { %v3383_v8 = vadd.f32 %v6024_v4, %v3382_v27 }
 0x3a9   :  { %v3387_v59 = vsel %vm3386_vm14, %v6024_v4, %v3383_v8 }
 0x3aa   :  { %v3392_v61 = vsel %vm3389_vm15, %v3391_v33, %v3387_v59  ;;  %v5991_v33 = vld [vmem:[#allocation19] ss:$0 sm:$0xff] }
 0x3ab   :  { %v3409_v39 = vmul.f32 %v6026_v43, %v3392_v61 }
 0x3ad   :  { %v3691_v13 = vpack.c.bf16 %v3409_v39, %v3409_v39  ;;  %v3412_v12 = vrot.slane %v3409_v39, 7 }
 0x3af   :  { %3841 = vmatmul.bf16.vlgmr.msrb.gmra.mxu1 %v3691_v13  ;;  %v3414_v38 = vsel %vm3413_vm6, %v3408_v29, %v3412_v12 }
 0x3b0   :  { %3420 = vst.msk [vmem:[#allocation21] sm:$0x3] %vm7341_vm7, %v3414_v38 }
 0x3b1   :  { %4089 = dma.vmem_to_hbm [thread:$0]  %s4085_s18, 32, %s4087_s19, [#allocation6]  }
 0x3d0   :  { %v3475_v44 = vpop.xlane.xlu1 %3474 }
 0x3dc   :  { %v3574_v26 = vpop.xlane.xlu2 %3573 }
 0x3e5   :  { %v3524_v40 = vpop.xlane.xlu1 %3523 }
 0x3e6   :  { %v3525_v51 = vmin.f32 %v3475_v44, %v3524_v40 }
 0x3e8   :  { %v3575_v56 = vmin.f32 %v3525_v51, %v3574_v26 }
 0x3ea   :  { %v3608_v30 = vpop.xlane.xlu2 %3607 }
 0x3eb   :  { %v3609_v46 = vmin.f32 %v3575_v56, %v3608_v30 }
 0x3ed   :  { %6027 = vrsqrt.f32 %v3609_v46  ;;  %vm3617_vm1 = vcmp.eq.f32.partialorder %v3609_v46, inf  ;;  %v3620_v29 = vand.u32 2147483648, %v3609_v46  ;;  %vm3619_vm2 = vcmp.eq.f32.partialorder %v3609_v46, 0.0 }
 0x3f2   :  { %v4004_v62 = vpop.permute.xlu2 %4003 }
 0x3f3   :  { %v6028_v55 = vpop.eup %6027  ;;  %v4009_v8 = vmul.f32 %v5990_v49, %v4004_v62 }
 0x3f4   :  { %v3611_v11 = vmul.f32 %v6028_v55, %v3609_v46 }
 0x3f6   :  { %v3612_v9 = vmul.f32 %v6028_v55, %v3611_v11 }
 0x3f8   :  { %v3613_v2 = vmul.f32 0.5, %v3612_v9 }
 0x3fa   :  { %v3614_v42 = vsub.f32 1.5, %v3613_v2 }
 0x3fc   :  { %v3615_v22 = vmul.f32 %v6028_v55, %v3614_v42 }
 0x3fd   :  { %v3984_v41 = vpop.permute.xlu1 %3983 }
 0x3fe   :  { %v3616_v16 = vmul.f32 %v3615_v22, %v3609_v46  ;;  %v3989_v3 = vmul.f32 %v5988_v6, %v3984_v41 }
 0x400   :  { %v3618_v0 = vsel %vm3617_vm1, %v3609_v46, %v3616_v16 }
 0x401   :  { %v3621_v60 = vsel %vm3619_vm2, %v3620_v29, %v3618_v0 }
 0x402   :  { %v3995_v45 = vmul.f32 %v5989_v5, %v3621_v60 }
 0x40c   :  { %v3829_v21 = vpop.f32.mrf.mxu0 }
 0x414   :  { %v3831_v20 = vpop.f32.mrf.mxu0 }
 0x42c   :  { %v3842_v63 = vpop.f32.mrf.mxu1 }
 0x42d   :  { %v3843_v15 = vadd.f32 %v3842_v63, %v3829_v21 }
 0x42f   :  { %v3846_v10 = vperm.slane %v3843_v15, 0 }
 0x431   :  { %v3953_v31 = vadd.f32 %v7203_v34, %v3846_v10 }
 0x433   :  { %v3966_v54 = vadd.f32 %v7205_v7, %v3953_v31  ;;  %v5992_v7 = vld [vmem:[#allocation3] ss:$0 sm:$0xff] }
 0x434   :  { %v3844_v4 = vpop.f32.mrf.mxu1 }
 0x435   :  { %v3979_v57 = vadd.f32 %v3978_v52, %v3966_v54 }
 0x437   :  { %v3990_v27 = vadd.f32 %v3989_v3, %v3979_v57 }
 0x439   :  { %v3996_v34 = vadd.f32 %v3995_v45, %v3990_v27 }
 0x43b   :  { %v4010_v59 = vadd.f32 %v4009_v8, %v3996_v34 }
 0x43d   :  { %v4015_v43 = vadd.f32 %v5991_v33, %v4010_v59 }
 0x43f   :  { %v4016_v61 = vmax.f32 %v4015_v43, 0.0 }
 0x441   :  { %4053 = vmatmul.f32.vlgmr.msra.gmra.mxu0 %v4016_v61 }
 0x4be   :  { %v4054_v39 = vpop.f32.mrf.mxu0 }
 0x4bf   :  { %v4055_v13 = vadd.f32 %v5992_v7, %v4054_v39 }
 0x4c1   :  { %v4057_v12 = vsel %vm3623_vm0, %v4055_v13, -inf }
 0x4c2   :  { %v4058_v38 = vrot.slane %v4057_v12, 4 }
 0x4c4   :  { %v4059_v44 = vmax.f32 %v4057_v12, %v4058_v38 }
 0x4c6   :  { %v4060_v1 = vrot.slane %v4059_v44, 2 }
 0x4c8   :  { %v4061_v53 = vmax.f32 %v4059_v44, %v4060_v1 }
 0x4ca   :  { %v4062_v18 = vrot.slane %v4061_v53, 1 }
 0x4cc   :  { %v4063_v28 = vmax.f32 %v4061_v53, %v4062_v18 }
 0x4ce   :  { %v4064_v23 = vsub.f32 %v4055_v13, %v4063_v28 }
 0x4d0   :  { %v4065_v26 = vmul.f32 1.442695, %v4064_v23 }
 0x4d2   :  { %6029 = vpow2.f32 %v4065_v26 }
 0x4d8   :  { %v6030_v40 = vpop.eup %6029 }
 0x4d9   :  { %v4067_v51 = vsel %vm3623_vm0, %v6030_v40, 0.0 }
 0x4da   :  { %v4068_v56 = vrot.slane %v4067_v51, 4 }
 0x4dc   :  { %v4069_v30 = vadd.f32 %v4068_v56, %v4067_v51 }
 0x4de   :  { %v4070_v46 = vrot.slane %v4069_v30, 2 }
 0x4e0   :  { %v4071_v50 = vadd.f32 %v4070_v46, %v4069_v30 }
 0x4e2   :  { %v4072_v14 = vrot.slane %v4071_v50, 1 }
 0x4e4   :  { %v4073_v21 = vadd.f32 %v4072_v14, %v4071_v50 }
 0x4e6   :  { %6031 = vrcp.f32 %v4073_v21 }
 0x4ec   :  { %v6032_v37 = vpop.eup %6031 }
 0x4ed   :  { %v4075_v17 = vmul.f32 %v6032_v37, %v6030_v40 }
 0x4ef   :  { %4076 = vst.msk [vmem:[%s7467_s24] sm:$0xff] %vm3623_vm0, %v4075_v17 }
 0x4f0   :  { %6346 = dma.done.wait [#allocation6], 32  }
 0x4f1   :  { %6347 = vsyncadd [#allocation6], 4294967264 }
 0x4f2   :  { %6348 = dma.done.wait [#allocation23], 32  }
 0x4f3   :  { %6349 = vsyncadd [#allocation23], 4294967264 }
 0x4f4   :  { %4111 = vsyncpa [#allocation5], 1 }
 0x4f5   :  { %4112 = vsyncpa [#allocation8], 1 }
 0x4f6   :  { %4113 = vsyncpa [#allocation11], 1 }
 0x4f7   :  { %4114 = vsyncpa [#allocation14], 1 }
 0x4f8   :  { %4115 = vsyncpa [#allocation17], 1 }
 0x4f9   :  { %4116 = vsyncpa [#allocation20], 1 }
 0x4fa   :  { %4117 = vsyncpa [#allocation6], 1 }
 0x4fb   :  { %4118 = vsyncpa [#allocation23], 1 }

</bundles_post_ra>
